<compile_context>
chip_gen: v7x
topology: tpu7x:2x2x1
jax: 0.10.0
libtpu: 0.0.40
codegen_flags: <defaults>
</compile_context>

<pallas_src>
import functools

import numpy as np
import jax
import jax.numpy as jnp
from jax import lax
from jax.experimental import pallas as pl
from jax.experimental.pallas import tpu as pltpu


# ---------------------------------------------------------------------------
# Bicubic upsampling of S (matches torch F.interpolate bicubic, A=-0.75,
# align_corners=False, border clamp) via a precomputed separable matrix.
# ---------------------------------------------------------------------------
def _bicubic_weight_matrix(in_size, out_size):
    A = -0.75
    scale = in_size / out_size  # align_corners=False, no explicit scale_factor

    def cubic1(t):
        return ((A + 2.0) * t - (A + 3.0)) * t * t + 1.0

    def cubic2(t):
        return ((A * t - 5.0 * A) * t + 8.0 * A) * t - 4.0 * A

    W = np.zeros((out_size, in_size), dtype=np.float64)
    for o in range(out_size):
        x = (o + 0.5) * scale - 0.5
        xf = np.floor(x)
        t = x - xf
        w = (cubic2(t + 1.0), cubic1(t), cubic1(1.0 - t), cubic2(2.0 - t))
        for k in range(4):
            idx = int(np.clip(xf - 1 + k, 0, in_size - 1))
            W[o, idx] += w[k]
    return jnp.asarray(W, dtype=jnp.float32)


def _bicubic_upsample(x, factor):
    # x: (B, 1, H, W) -> (B, 1, H*factor, W*factor)
    _, _, h, w = x.shape
    Wh = _bicubic_weight_matrix(h, h * factor)
    Ww = _bicubic_weight_matrix(w, w * factor)
    return jnp.einsum("oh,bchw,pw->bcop", Wh, x, Ww)


# ---------------------------------------------------------------------------
# Device-aware VMEM budgeting [R2,R5]
# ---------------------------------------------------------------------------
def _vmem_budgets():
    cap = 128 * 2**20
    try:
        info = pltpu.get_tpu_info()
        cap = int(getattr(info, "vmem_capacity_bytes", cap))
    except Exception:
        pass
    # Honest scoped-footprint budget for the input tiles, plus an explicit
    # scoped-VMEM limit with headroom for compiler-internal scratch.
    tile_budget = min(cap // 3, 24 * 2**20)     # v7x(64MiB) -> ~21MiB, else 24MiB
    vmem_limit = min((cap * 3) // 4, 48 * 2**20)
    return int(tile_budget), int(vmem_limit)


# ---------------------------------------------------------------------------
# Pallas kernel: per-(batch, split) weighted error partial sums
#   acc(1,128) lanes hold partial sums of |(map - T) * sigmoid(S)|^p
# ---------------------------------------------------------------------------
def _make_level_kernel(loss_type, use_S, n_blocks, unroll):
    def compute(m_ref, tgt_ref, s_ref, out_ref, acc_ref):
        ti = pl.program_id(2)

        @pl.when(ti == 0)
        def _init():
            acc_ref[...] = jnp.zeros_like(acc_ref)

        def step(j, partial):
            lo = j * 128
            if not isinstance(lo, (int, np.integer)):
                lo = pl.multiple_of(lo, 128)
            m = m_ref[:, pl.ds(lo, 128)].astype(jnp.float32)
            t = tgt_ref[:, pl.ds(lo, 128)].astype(jnp.float32)
            d = m - t
            if use_S:
                # sigmoid -> EUP (free slot); (1,128) gate broadcast over C.
                d = d * jax.nn.sigmoid(s_ref[:, pl.ds(lo, 128)].astype(jnp.float32))
            e = jnp.abs(d) if loss_type == "l1" else d * d
            # Cross-sublane reduce over C -> XLU (free slot in HBM-bound kernel).
            return partial + jnp.sum(e, axis=0, keepdims=True)

        zero = jnp.zeros((1, 128), jnp.float32)
        if n_blocks <= 32:
            partial = zero
            for j in range(n_blocks):      # static unroll: LLO sees everything
                partial = step(j, partial)
        else:
            partial = lax.fori_loop(0, n_blocks, step, zero, unroll=unroll)

        # Single tiny accumulator RMW per grid step. [R1]
        acc_ref[...] += partial

        @pl.when(ti == pl.num_programs(2) - 1)
        def _finalize():
            # Lane-dense (1,128) store of per-lane partials; final reduce in
            # the wrapper.
            out_ref[...] = acc_ref[...]

    if use_S:
        def kernel(m_ref, tgt_ref, s_ref, out_ref, acc_ref):
            compute(m_ref, tgt_ref, s_ref, out_ref, acc_ref)
    else:
        # No S stream at all when use_S=False (don't DMA dead data).
        def kernel(m_ref, tgt_ref, out_ref, acc_ref):
            compute(m_ref, tgt_ref, None, out_ref, acc_ref)
    return kernel


def _weighted_err_sum(m, tgt, s, loss_type, use_S, tile_budget_bytes,
                      vmem_limit_bytes):
    # m, tgt: (B, C, HW) ; s: (B, 1, HW) (or None when use_S=False)
    B, C, HW = m.shape

    # Zero-pad HW to a multiple of 128 (padding contributes zero error).
    HW_pad = ((HW + 127) // 128) * 128
    if HW_pad != HW:
        pad = ((0, 0), (0, 0), (0, HW_pad - HW))
        m = jnp.pad(m, pad)
        tgt = jnp.pad(tgt, pad)
        if use_S:
            s = jnp.pad(s, pad)

    # Honest scoped-VMEM footprint per lane-column of tile. [R4]
    itemsize = jnp.dtype(m.dtype).itemsize
    sub = 8 if itemsize >= 4 else (16 if itemsize == 2 else 32)
    c_pad = ((C + sub - 1) // sub) * sub
    per_col = 2 * 2 * c_pad * itemsize            # 2 inputs x 2 pipeline bufs
    if use_S:
        s_item = jnp.dtype(s.dtype).itemsize
        s_sub = 8 if s_item >= 4 else (16 if s_item == 2 else 32)
        per_col += 2 * s_sub * s_item             # padded S block, double-buffered
    max_tile = max(128, ((tile_budget_bytes // per_col) // 128) * 128)

    # Largest multiple of 128 dividing HW_pad that fits the budget.
    hw_tile = 128
    t = 128
    while t <= HW_pad:
        if HW_pad % t == 0 and t <= max_tile:
            hw_tile = t
        t += 128

    n_tiles = HW_pad // hw_tile
    # [R3] split the reduction axis when B alone can't feed both v7x cores.
    n_par = 2 if ((B % 2 == 1) and (n_tiles % 2 == 0)) else 1
    n_inner = n_tiles // n_par
    n_blocks = hw_tile // 128
    unroll = next(u for u in (8, 4, 2, 1) if n_blocks % u == 0)

    data_spec = pl.BlockSpec((None, C, hw_tile),
                             lambda b, p, k: (b, 0, p * n_inner + k))
    in_specs = [data_spec, data_spec]
    args = [m, tgt]
    if use_S:
        in_specs.append(pl.BlockSpec((None, 1, hw_tile),
                                     lambda b, p, k: (b, 0, p * n_inner + k)))
        args.append(s)

    out = pl.pallas_call(
        _make_level_kernel(loss_type, use_S, n_blocks, unroll),
        out_shape=jax.ShapeDtypeStruct((B * n_par, 1, 128), jnp.float32),
        grid_spec=pltpu.PrefetchScalarGridSpec(
            num_scalar_prefetch=0,
            grid=(B, n_par, n_inner),
            in_specs=in_specs,
            # One distinct lane-dense (1,128) row per (batch, split).
            out_specs=pl.BlockSpec((None, 1, 128),
                                   lambda b, p, k: (b * n_par + p, 0, 0)),
            scratch_shapes=[pltpu.VMEM((1, 128), jnp.float32)],
        ),
        compiler_params=pltpu.CompilerParams(
            dimension_semantics=("parallel", "parallel", "arbitrary"),
            vmem_limit_bytes=vmem_limit_bytes),
    )(*args)
    # Rows hold per-lane partial sums; final reduce here (tiny).
    return jnp.sum(out)


# ---------------------------------------------------------------------------
# TPerceptualLoss.forward (use_S=True, type='l2' defaults; 'l1' also supported)
# ---------------------------------------------------------------------------
def t_perceptual_loss(map_lv3, map_lv2, map_lv1, S, T_lv3, T_lv2, T_lv1,
                      use_S=True, loss_type="l2", tile_budget_bytes=None):
    auto_budget, vmem_limit = _vmem_budgets()
    tile_budget = auto_budget if tile_budget_bytes is None else int(tile_budget_bytes)

    def flat(x):
        b, c, h, w = x.shape
        return x.reshape(b, c, h * w)

    if use_S:
        # TODO(synk): for very small C the upsampled S stream could be stored
        # bf16 / fused in-kernel; kept f32+in-kernel sigmoid for exactness.
        s_levels = (flat(S),
                    flat(_bicubic_upsample(S, 2)),
                    flat(_bicubic_upsample(S, 4)))
    else:
        s_levels = (None, None, None)

    loss = jnp.float32(0.0)
    levels = ((map_lv3, T_lv3, s_levels[0]),
              (map_lv2, T_lv2, s_levels[1]),
              (map_lv1, T_lv1, s_levels[2]))
    for m, tgt, s in levels:
        err_sum = _weighted_err_sum(flat(m), flat(tgt), s, loss_type, use_S,
                                    tile_budget, vmem_limit)
        loss = loss + err_sum / jnp.float32(m.size)  # F.{l1,mse}_loss mean
    return loss / 3.0


# ---------------------------------------------------------------------------
if __name__ == "__main__":
    key = jax.random.PRNGKey(0)
    ks = jax.random.split(key, 7)

    B = 2
    h = w = 16                  # lv3 spatial; lv2 = 2x, lv1 = 4x
    C3, C2, C1 = 8, 8, 4

    map_lv3 = jax.random.normal(ks[0], (B, C3, h, w), jnp.float32)
    map_lv2 = jax.random.normal(ks[1], (B, C2, 2 * h, 2 * w), jnp.float32)
    map_lv1 = jax.random.normal(ks[2], (B, C1, 4 * h, 4 * w), jnp.float32)
    S       = jax.random.normal(ks[3], (B, 1, h, w), jnp.float32)
    T_lv3   = jax.random.normal(ks[4], (B, C3, h, w), jnp.float32)
    T_lv2   = jax.random.normal(ks[5], (B, C2, 2 * h, 2 * w), jnp.float32)
    T_lv1   = jax.random.normal(ks[6], (B, C1, 4 * h, 4 * w), jnp.float32)

    args = (map_lv3, map_lv2, map_lv1, S, T_lv3, T_lv2, T_lv1)
    args_b1 = tuple(x[:1] for x in args)

    loss_fn = jax.jit(t_perceptual_loss,
                      static_argnames=("use_S", "loss_type", "tile_budget_bytes"))

    # Pallas paths: default (device-sized tiles), forced small tiles (exercises
    # the multi-tile accumulation path), no-S variant, and B=1 with forced
    # tiling (exercises the 2-way parallel split of the reduction axis).
    loss = loss_fn(*args)
    loss_tiled = loss_fn(*args, tile_budget_bytes=4096)
    loss_no_s = loss_fn(*args, use_S=False)
    loss_b1_tiled = loss_fn(*args_b1, tile_budget_bytes=4096)
    jax.block_until_ready((loss, loss_tiled, loss_no_s, loss_b1_tiled))

    # Pure-JAX reference mirroring the PyTorch forward.
    def ref_loss(m3, m2, m1, s, t3, t2, t1, use_S=True):
        if use_S:
            g3 = jax.nn.sigmoid(s)
            g2 = jax.nn.sigmoid(_bicubic_upsample(s, 2))
            g1 = jax.nn.sigmoid(_bicubic_upsample(s, 4))
        else:
            g3 = g2 = g1 = 1.0
        return (jnp.mean((m3 * g3 - t3 * g3) ** 2)
                + jnp.mean((m2 * g2 - t2 * g2) ** 2)
                + jnp.mean((m1 * g1 - t1 * g1) ** 2)) / 3.0

    ref = ref_loss(*args)
    ref_no_s = ref_loss(*args, use_S=False)
    ref_b1 = ref_loss(*args_b1)

    assert jnp.allclose(loss, ref, rtol=2e-5, atol=1e-6), (loss, ref)
    assert jnp.allclose(loss_tiled, ref, rtol=2e-5, atol=1e-6), (loss_tiled, ref)
    assert jnp.allclose(loss_no_s, ref_no_s, rtol=2e-5, atol=1e-6), (loss_no_s, ref_no_s)
    assert jnp.allclose(loss_b1_tiled, ref_b1, rtol=2e-5, atol=1e-6), (loss_b1_tiled, ref_b1)
    print("KERNEL_OK")
</pallas_src>

<mosaic_0001>
module attributes {stable_mosaic.version = 11 : i64} {
  func.func @kernel(%arg0: i32, %arg1: i32, %arg2: i32, %arg3: memref<1x8x256xf32, #tpu.memory_space<vmem>>, %arg4: memref<1x8x256xf32, #tpu.memory_space<vmem>>, %arg5: memref<1x1x256xf32, #tpu.memory_space<vmem>>, %arg6: memref<1x1x128xf32, #tpu.memory_space<vmem>>, %arg7: memref<1x128xf32, #tpu.memory_space<vmem>>) attributes {dimension_semantics = [#tpu.dimension_semantics<parallel>, #tpu.dimension_semantics<parallel>, #tpu.dimension_semantics<arbitrary>], iteration_bounds = array<i64: 2, 1, 1>, scalar_prefetch = 0 : i64, scratch_operands = 1 : i64, tpu.core_type = #tpu.core_type<tc>, window_params = [{transform_indices = @transform_0, window_bounds = array<i64: 1, 8, 256>}, {transform_indices = @transform_1, window_bounds = array<i64: 1, 8, 256>}, {transform_indices = @transform_2, window_bounds = array<i64: 1, 1, 256>}, {transform_indices = @transform_3, window_bounds = array<i64: 1, 1, 128>}]} {
    %c0_i32 = arith.constant 0 : i32
    %0 = arith.cmpi eq, %arg2, %c0_i32 : i32
    %1 = arith.extui %0 : i1 to i32
    %c0_i32_0 = arith.constant 0 : i32
    %2 = arith.cmpi ne, %1, %c0_i32_0 : i32
    scf.if %2 {
      %cst_27 = arith.constant 0.000000e+00 : f32
      %46 = vector.broadcast %cst_27 : f32 to vector<1x128xf32>
      %c0_28 = arith.constant 0 : index
      %c0_29 = arith.constant 0 : index
      %47 = vector.load %arg7[%c0_28, %c0_29] : memref<1x128xf32, #tpu.memory_space<vmem>>, vector<1x128xf32>
      tpu.vector_store %arg7[%c0_28, %c0_29], %46 {strides = array<i32>} : memref<1x128xf32, #tpu.memory_space<vmem>>, vector<1x128xf32>,
    } else {
    }
    %cst = arith.constant 0.000000e+00 : f32
    %3 = vector.broadcast %cst : f32 to vector<1x128xf32>
    %c0 = arith.constant 0 : index
    %c0_1 = arith.constant 0 : index
    %c0_2 = arith.constant 0 : index
    %4 = vector.load %arg3[%c0, %c0_1, %c0_2] : memref<1x8x256xf32, #tpu.memory_space<vmem>>, vector<1x8x128xf32>
    %5 = vector.shape_cast %4 : vector<1x8x128xf32> to vector<8x128xf32>
    %c0_3 = arith.constant 0 : index
    %c0_4 = arith.constant 0 : index
    %c0_5 = arith.constant 0 : index
    %6 = vector.load %arg4[%c0_3, %c0_4, %c0_5] : memref<1x8x256xf32, #tpu.memory_space<vmem>>, vector<1x8x128xf32>
    %7 = vector.shape_cast %6 : vector<1x8x128xf32> to vector<8x128xf32>
    %8 = arith.subf %5, %7 : vector<8x128xf32>
    %c0_6 = arith.constant 0 : index
    %c0_7 = arith.constant 0 : index
    %c0_8 = arith.constant 0 : index
    %9 = vector.load %arg5[%c0_6, %c0_7, %c0_8] : memref<1x1x256xf32, #tpu.memory_space<vmem>>, vector<1x1x128xf32>
    %10 = vector.shape_cast %9 : vector<1x1x128xf32> to vector<1x128xf32>
    %11 = arith.negf %10 : vector<1x128xf32>
    %12 = math.exp %11 : vector<1x128xf32>
    %cst_9 = arith.constant 1.000000e+00 : f32
    %13 = vector.broadcast %cst_9 : f32 to vector<1x128xf32>
    %14 = arith.addf %13, %12 : vector<1x128xf32>
    %15 = arith.divf %13, %14 : vector<1x128xf32>
    %16 = vector.broadcast %15 : vector<1x128xf32> to vector<8x128xf32>
    %17 = arith.mulf %8, %16 : vector<8x128xf32>
    %18 = arith.mulf %17, %17 : vector<8x128xf32>
    %cst_10 = arith.constant dense<0.000000e+00> : vector<128xf32>
    %19 = vector.multi_reduction <add>, %18, %cst_10 [0] : vector<8x128xf32> to vector<128xf32>
    %20 = vector.shape_cast %19 : vector<128xf32> to vector<1x128xf32>
    %21 = arith.addf %3, %20 : vector<1x128xf32>
    %c0_11 = arith.constant 0 : index
    %c0_12 = arith.constant 0 : index
    %c128 = arith.constant 128 : index
    %22 = vector.load %arg3[%c0_11, %c0_12, %c128] : memref<1x8x256xf32, #tpu.memory_space<vmem>>, vector<1x8x128xf32>
    %23 = vector.shape_cast %22 : vector<1x8x128xf32> to vector<8x128xf32>
    %c0_13 = arith.constant 0 : index
    %c0_14 = arith.constant 0 : index
    %c128_15 = arith.constant 128 : index
    %24 = vector.load %arg4[%c0_13, %c0_14, %c128_15] : memref<1x8x256xf32, #tpu.memory_space<vmem>>, vector<1x8x128xf32>
    %25 = vector.shape_cast %24 : vector<1x8x128xf32> to vector<8x128xf32>
    %26 = arith.subf %23, %25 : vector<8x128xf32>
    %c0_16 = arith.constant 0 : index
    %c0_17 = arith.constant 0 : index
    %c128_18 = arith.constant 128 : index
    %27 = vector.load %arg5[%c0_16, %c0_17, %c128_18] : memref<1x1x256xf32, #tpu.memory_space<vmem>>, vector<1x1x128xf32>
    %28 = vector.shape_cast %27 : vector<1x1x128xf32> to vector<1x128xf32>
    %29 = arith.negf %28 : vector<1x128xf32>
    %30 = math.exp %29 : vector<1x128xf32>
    %cst_19 = arith.constant 1.000000e+00 : f32
    %31 = vector.broadcast %cst_19 : f32 to vector<1x128xf32>
    %32 = arith.addf %31, %30 : vector<1x128xf32>
    %33 = arith.divf %31, %32 : vector<1x128xf32>
    %34 = vector.broadcast %33 : vector<1x128xf32> to vector<8x128xf32>
    %35 = arith.mulf %26, %34 : vector<8x128xf32>
    %36 = arith.mulf %35, %35 : vector<8x128xf32>
    %cst_20 = arith.constant dense<0.000000e+00> : vector<128xf32>
    %37 = vector.multi_reduction <add>, %36, %cst_20 [0] : vector<8x128xf32> to vector<128xf32>
    %38 = vector.shape_cast %37 : vector<128xf32> to vector<1x128xf32>
    %39 = arith.addf %21, %38 : vector<1x128xf32>
    %c0_21 = arith.constant 0 : index
    %c0_22 = arith.constant 0 : index
    %40 = vector.load %arg7[%c0_21, %c0_22] : memref<1x128xf32, #tpu.memory_space<vmem>>, vector<1x128xf32>
    %41 = arith.addf %40, %39 : vector<1x128xf32>
    %c0_23 = arith.constant 0 : index
    %c0_24 = arith.constant 0 : index
    %42 = vector.load %arg7[%c0_23, %c0_24] : memref<1x128xf32, #tpu.memory_space<vmem>>, vector<1x128xf32>
    tpu.vector_store %arg7[%c0_23, %c0_24], %41 {strides = array<i32>} : memref<1x128xf32, #tpu.memory_space<vmem>>, vector<1x128xf32>,
    %c0_i32_25 = arith.constant 0 : i32
    %43 = arith.cmpi eq, %arg2, %c0_i32_25 : i32
    %44 = arith.extui %43 : i1 to i32
    %c0_i32_26 = arith.constant 0 : i32
    %45 = arith.cmpi ne, %44, %c0_i32_26 : i32
    scf.if %45 {
      %c0_27 = arith.constant 0 : index
      %c0_28 = arith.constant 0 : index
      %46 = vector.load %arg7[%c0_27, %c0_28] : memref<1x128xf32, #tpu.memory_space<vmem>>, vector<1x128xf32>
      %c0_29 = arith.constant 0 : index
      %c0_30 = arith.constant 0 : index
      %c0_31 = arith.constant 0 : index
      %47 = vector.load %arg6[%c0_29, %c0_30, %c0_31] : memref<1x1x128xf32, #tpu.memory_space<vmem>>, vector<1x1x128xf32>
      %48 = vector.shape_cast %47 : vector<1x1x128xf32> to vector<1x128xf32>
      %49 = vector.shape_cast %46 : vector<1x128xf32> to vector<1x1x128xf32>
      tpu.vector_store %arg6[%c0_29, %c0_30, %c0_31], %49 {strides = array<i32>} : memref<1x1x128xf32, #tpu.memory_space<vmem>>, vector<1x1x128xf32>,
    } else {
    }
    return
  }
  func.func @transform_0(%arg0: i32, %arg1: i32, %arg2: i32) -> (i32, i32, i32) {
    %c1_i32 = arith.constant 1 : i32
    %0 = arith.muli %arg1, %c1_i32 : i32
    %1 = arith.addi %0, %arg2 : i32
    %c0_i32 = arith.constant 0 : i32
    %c0_i32_0 = arith.constant 0 : i32
    return %arg0, %c0_i32, %1 : i32, i32, i32
  }
  func.func @transform_1(%arg0: i32, %arg1: i32, %arg2: i32) -> (i32, i32, i32) {
    %c1_i32 = arith.constant 1 : i32
    %0 = arith.muli %arg1, %c1_i32 : i32
    %1 = arith.addi %0, %arg2 : i32
    %c0_i32 = arith.constant 0 : i32
    %c0_i32_0 = arith.constant 0 : i32
    return %arg0, %c0_i32, %1 : i32, i32, i32
  }
  func.func @transform_2(%arg0: i32, %arg1: i32, %arg2: i32) -> (i32, i32, i32) {
    %c1_i32 = arith.constant 1 : i32
    %0 = arith.muli %arg1, %c1_i32 : i32
    %1 = arith.addi %0, %arg2 : i32
    %c0_i32 = arith.constant 0 : i32
    %c0_i32_0 = arith.constant 0 : i32
    return %arg0, %c0_i32, %1 : i32, i32, i32
  }
  func.func @transform_3(%arg0: i32, %arg1: i32, %arg2: i32) -> (i32, i32, i32) {
    %c1_i32 = arith.constant 1 : i32
    %0 = arith.muli %arg0, %c1_i32 : i32
    %1 = arith.addi %0, %arg1 : i32
    %c0_i32 = arith.constant 0 : i32
    %c0_i32_0 = arith.constant 0 : i32
    %c0_i32_1 = arith.constant 0 : i32
    return %1, %c0_i32, %c0_i32_0 : i32, i32, i32
  }
}

module attributes {stable_mosaic.version = 11 : i64} {
  func.func @kernel(%arg0: i32, %arg1: i32, %arg2: i32, %arg3: memref<1x8x1024xf32, #tpu.memory_space<vmem>>, %arg4: memref<1x8x1024xf32, #tpu.memory_space<vmem>>, %arg5: memref<1x1x1024xf32, #tpu.memory_space<vmem>>, %arg6: memref<1x1x128xf32, #tpu.memory_space<vmem>>, %arg7: memref<1x128xf32, #tpu.memory_space<vmem>>) attributes {dimension_semantics = [#tpu.dimension_semantics<parallel>, #tpu.dimension_semantics<parallel>, #tpu.dimension_semantics<arbitrary>], iteration_bounds = array<i64: 2, 1, 1>, scalar_prefetch = 0 : i64, scratch_operands = 1 : i64, tpu.core_type = #tpu.core_type<tc>, window_params = [{transform_indices = @transform_0, window_bounds = array<i64: 1, 8, 1024>}, {transform_indices = @transform_1, window_bounds = array<i64: 1, 8, 1024>}, {transform_indices = @transform_2, window_bounds = array<i64: 1, 1, 1024>}, {transform_indices = @transform_3, window_bounds = array<i64: 1, 1, 128>}]} {
    %c0_i32 = arith.constant 0 : i32
    %0 = arith.cmpi eq, %arg2, %c0_i32 : i32
    %1 = arith.extui %0 : i1 to i32
    %c0_i32_0 = arith.constant 0 : i32
    %2 = arith.cmpi ne, %1, %c0_i32_0 : i32
    scf.if %2 {
      %cst_87 = arith.constant 0.000000e+00 : f32
      %154 = vector.broadcast %cst_87 : f32 to vector<1x128xf32>
      %c0_88 = arith.constant 0 : index
      %c0_89 = arith.constant 0 : index
      %155 = vector.load %arg7[%c0_88, %c0_89] : memref<1x128xf32, #tpu.memory_space<vmem>>, vector<1x128xf32>
      tpu.vector_store %arg7[%c0_88, %c0_89], %154 {strides = array<i32>} : memref<1x128xf32, #tpu.memory_space<vmem>>, vector<1x128xf32>,
    } else {
    }
    %cst = arith.constant 0.000000e+00 : f32
    %3 = vector.broadcast %cst : f32 to vector<1x128xf32>
    %c0 = arith.constant 0 : index
    %c0_1 = arith.constant 0 : index
    %c0_2 = arith.constant 0 : index
    %4 = vector.load %arg3[%c0, %c0_1, %c0_2] : memref<1x8x1024xf32, #tpu.memory_space<vmem>>, vector<1x8x128xf32>
    %5 = vector.shape_cast %4 : vector<1x8x128xf32> to vector<8x128xf32>
    %c0_3 = arith.constant 0 : index
    %c0_4 = arith.constant 0 : index
    %c0_5 = arith.constant 0 : index
    %6 = vector.load %arg4[%c0_3, %c0_4, %c0_5] : memref<1x8x1024xf32, #tpu.memory_space<vmem>>, vector<1x8x128xf32>
    %7 = vector.shape_cast %6 : vector<1x8x128xf32> to vector<8x128xf32>
    %8 = arith.subf %5, %7 : vector<8x128xf32>
    %c0_6 = arith.constant 0 : index
    %c0_7 = arith.constant 0 : index
    %c0_8 = arith.constant 0 : index
    %9 = vector.load %arg5[%c0_6, %c0_7, %c0_8] : memref<1x1x1024xf32, #tpu.memory_space<vmem>>, vector<1x1x128xf32>
    %10 = vector.shape_cast %9 : vector<1x1x128xf32> to vector<1x128xf32>
    %11 = arith.negf %10 : vector<1x128xf32>
    %12 = math.exp %11 : vector<1x128xf32>
    %cst_9 = arith.constant 1.000000e+00 : f32
    %13 = vector.broadcast %cst_9 : f32 to vector<1x128xf32>
    %14 = arith.addf %13, %12 : vector<1x128xf32>
    %15 = arith.divf %13, %14 : vector<1x128xf32>
    %16 = vector.broadcast %15 : vector<1x128xf32> to vector<8x128xf32>
    %17 = arith.mulf %8, %16 : vector<8x128xf32>
    %18 = arith.mulf %17, %17 : vector<8x128xf32>
    %cst_10 = arith.constant dense<0.000000e+00> : vector<128xf32>
    %19 = vector.multi_reduction <add>, %18, %cst_10 [0] : vector<8x128xf32> to vector<128xf32>
    %20 = vector.shape_cast %19 : vector<128xf32> to vector<1x128xf32>
    %21 = arith.addf %3, %20 : vector<1x128xf32>
    %c0_11 = arith.constant 0 : index
    %c0_12 = arith.constant 0 : index
    %c128 = arith.constant 128 : index
    %22 = vector.load %arg3[%c0_11, %c0_12, %c128] : memref<1x8x1024xf32, #tpu.memory_space<vmem>>, vector<1x8x128xf32>
    %23 = vector.shape_cast %22 : vector<1x8x128xf32> to vector<8x128xf32>
    %c0_13 = arith.constant 0 : index
    %c0_14 = arith.constant 0 : index
    %c128_15 = arith.constant 128 : index
    %24 = vector.load %arg4[%c0_13, %c0_14, %c128_15] : memref<1x8x1024xf32, #tpu.memory_space<vmem>>, vector<1x8x128xf32>
    %25 = vector.shape_cast %24 : vector<1x8x128xf32> to vector<8x128xf32>
    %26 = arith.subf %23, %25 : vector<8x128xf32>
    %c0_16 = arith.constant 0 : index
    %c0_17 = arith.constant 0 : index
    %c128_18 = arith.constant 128 : index
    %27 = vector.load %arg5[%c0_16, %c0_17, %c128_18] : memref<1x1x1024xf32, #tpu.memory_space<vmem>>, vector<1x1x128xf32>
    %28 = vector.shape_cast %27 : vector<1x1x128xf32> to vector<1x128xf32>
    %29 = arith.negf %28 : vector<1x128xf32>
    %30 = math.exp %29 : vector<1x128xf32>
    %cst_19 = arith.constant 1.000000e+00 : f32
    %31 = vector.broadcast %cst_19 : f32 to vector<1x128xf32>
    %32 = arith.addf %31, %30 : vector<1x128xf32>
    %33 = arith.divf %31, %32 : vector<1x128xf32>
    %34 = vector.broadcast %33 : vector<1x128xf32> to vector<8x128xf32>
    %35 = arith.mulf %26, %34 : vector<8x128xf32>
    %36 = arith.mulf %35, %35 : vector<8x128xf32>
    %cst_20 = arith.constant dense<0.000000e+00> : vector<128xf32>
    %37 = vector.multi_reduction <add>, %36, %cst_20 [0] : vector<8x128xf32> to vector<128xf32>
    %38 = vector.shape_cast %37 : vector<128xf32> to vector<1x128xf32>
    %39 = arith.addf %21, %38 : vector<1x128xf32>
    %c0_21 = arith.constant 0 : index
    %c0_22 = arith.constant 0 : index
    %c256 = arith.constant 256 : index
    %40 = vector.load %arg3[%c0_21, %c0_22, %c256] : memref<1x8x1024xf32, #tpu.memory_space<vmem>>, vector<1x8x128xf32>
    %41 = vector.shape_cast %40 : vector<1x8x128xf32> to vector<8x128xf32>
    %c0_23 = arith.constant 0 : index
    %c0_24 = arith.constant 0 : index
    %c256_25 = arith.constant 256 : index
    %42 = vector.load %arg4[%c0_23, %c0_24, %c256_25] : memref<1x8x1024xf32, #tpu.memory_space<vmem>>, vector<1x8x128xf32>
    %43 = vector.shape_cast %42 : vector<1x8x128xf32> to vector<8x128xf32>
    %44 = arith.subf %41, %43 : vector<8x128xf32>
    %c0_26 = arith.constant 0 : index
    %c0_27 = arith.constant 0 : index
    %c256_28 = arith.constant 256 : index
    %45 = vector.load %arg5[%c0_26, %c0_27, %c256_28] : memref<1x1x1024xf32, #tpu.memory_space<vmem>>, vector<1x1x128xf32>
    %46 = vector.shape_cast %45 : vector<1x1x128xf32> to vector<1x128xf32>
    %47 = arith.negf %46 : vector<1x128xf32>
    %48 = math.exp %47 : vector<1x128xf32>
    %cst_29 = arith.constant 1.000000e+00 : f32
    %49 = vector.broadcast %cst_29 : f32 to vector<1x128xf32>
    %50 = arith.addf %49, %48 : vector<1x128xf32>
    %51 = arith.divf %49, %50 : vector<1x128xf32>
    %52 = vector.broadcast %51 : vector<1x128xf32> to vector<8x128xf32>
    %53 = arith.mulf %44, %52 : vector<8x128xf32>
    %54 = arith.mulf %53, %53 : vector<8x128xf32>
    %cst_30 = arith.constant dense<0.000000e+00> : vector<128xf32>
    %55 = vector.multi_reduction <add>, %54, %cst_30 [0] : vector<8x128xf32> to vector<128xf32>
    %56 = vector.shape_cast %55 : vector<128xf32> to vector<1x128xf32>
    %57 = arith.addf %39, %56 : vector<1x128xf32>
    %c0_31 = arith.constant 0 : index
    %c0_32 = arith.constant 0 : index
    %c384 = arith.constant 384 : index
    %58 = vector.load %arg3[%c0_31, %c0_32, %c384] : memref<1x8x1024xf32, #tpu.memory_space<vmem>>, vector<1x8x128xf32>
    %59 = vector.shape_cast %58 : vector<1x8x128xf32> to vector<8x128xf32>
    %c0_33 = arith.constant 0 : index
    %c0_34 = arith.constant 0 : index
    %c384_35 = arith.constant 384 : index
    %60 = vector.load %arg4[%c0_33, %c0_34, %c384_35] : memref<1x8x1024xf32, #tpu.memory_space<vmem>>, vector<1x8x128xf32>
    %61 = vector.shape_cast %60 : vector<1x8x128xf32> to vector<8x128xf32>
    %62 = arith.subf %59, %61 : vector<8x128xf32>
    %c0_36 = arith.constant 0 : index
    %c0_37 = arith.constant 0 : index
    %c384_38 = arith.constant 384 : index
    %63 = vector.load %arg5[%c0_36, %c0_37, %c384_38] : memref<1x1x1024xf32, #tpu.memory_space<vmem>>, vector<1x1x128xf32>
    %64 = vector.shape_cast %63 : vector<1x1x128xf32> to vector<1x128xf32>
    %65 = arith.negf %64 : vector<1x128xf32>
    %66 = math.exp %65 : vector<1x128xf32>
    %cst_39 = arith.constant 1.000000e+00 : f32
    %67 = vector.broadcast %cst_39 : f32 to vector<1x128xf32>
    %68 = arith.addf %67, %66 : vector<1x128xf32>
    %69 = arith.divf %67, %68 : vector<1x128xf32>
    %70 = vector.broadcast %69 : vector<1x128xf32> to vector<8x128xf32>
    %71 = arith.mulf %62, %70 : vector<8x128xf32>
    %72 = arith.mulf %71, %71 : vector<8x128xf32>
    %cst_40 = arith.constant dense<0.000000e+00> : vector<128xf32>
    %73 = vector.multi_reduction <add>, %72, %cst_40 [0] : vector<8x128xf32> to vector<128xf32>
    %74 = vector.shape_cast %73 : vector<128xf32> to vector<1x128xf32>
    %75 = arith.addf %57, %74 : vector<1x128xf32>
    %c0_41 = arith.constant 0 : index
    %c0_42 = arith.constant 0 : index
    %c512 = arith.constant 512 : index
    %76 = vector.load %arg3[%c0_41, %c0_42, %c512] : memref<1x8x1024xf32, #tpu.memory_space<vmem>>, vector<1x8x128xf32>
    %77 = vector.shape_cast %76 : vector<1x8x128xf32> to vector<8x128xf32>
    %c0_43 = arith.constant 0 : index
    %c0_44 = arith.constant 0 : index
    %c512_45 = arith.constant 512 : index
    %78 = vector.load %arg4[%c0_43, %c0_44, %c512_45] : memref<1x8x1024xf32, #tpu.memory_space<vmem>>, vector<1x8x128xf32>
    %79 = vector.shape_cast %78 : vector<1x8x128xf32> to vector<8x128xf32>
    %80 = arith.subf %77, %79 : vector<8x128xf32>
    %c0_46 = arith.constant 0 : index
    %c0_47 = arith.constant 0 : index
    %c512_48 = arith.constant 512 : index
    %81 = vector.load %arg5[%c0_46, %c0_47, %c512_48] : memref<1x1x1024xf32, #tpu.memory_space<vmem>>, vector<1x1x128xf32>
    %82 = vector.shape_cast %81 : vector<1x1x128xf32> to vector<1x128xf32>
    %83 = arith.negf %82 : vector<1x128xf32>
    %84 = math.exp %83 : vector<1x128xf32>
    %cst_49 = arith.constant 1.000000e+00 : f32
    %85 = vector.broadcast %cst_49 : f32 to vector<1x128xf32>
    %86 = arith.addf %85, %84 : vector<1x128xf32>
    %87 = arith.divf %85, %86 : vector<1x128xf32>
    %88 = vector.broadcast %87 : vector<1x128xf32> to vector<8x128xf32>
    %89 = arith.mulf %80, %88 : vector<8x128xf32>
    %90 = arith.mulf %89, %89 : vector<8x128xf32>
    %cst_50 = arith.constant dense<0.000000e+00> : vector<128xf32>
    %91 = vector.multi_reduction <add>, %90, %cst_50 [0] : vector<8x128xf32> to vector<128xf32>
    %92 = vector.shape_cast %91 : vector<128xf32> to vector<1x128xf32>
    %93 = arith.addf %75, %92 : vector<1x128xf32>
    %c0_51 = arith.constant 0 : index
    %c0_52 = arith.constant 0 : index
    %c640 = arith.constant 640 : index
    %94 = vector.load %arg3[%c0_51, %c0_52, %c640] : memref<1x8x1024xf32, #tpu.memory_space<vmem>>, vector<1x8x128xf32>
    %95 = vector.shape_cast %94 : vector<1x8x128xf32> to vector<8x128xf32>
    %c0_53 = arith.constant 0 : index
    %c0_54 = arith.constant 0 : index
    %c640_55 = arith.constant 640 : index
    %96 = vector.load %arg4[%c0_53, %c0_54, %c640_55] : memref<1x8x1024xf32, #tpu.memory_space<vmem>>, vector<1x8x128xf32>
    %97 = vector.shape_cast %96 : vector<1x8x128xf32> to vector<8x128xf32>
    %98 = arith.subf %95, %97 : vector<8x128xf32>
    %c0_56 = arith.constant 0 : index
    %c0_57 = arith.constant 0 : index
    %c640_58 = arith.constant 640 : index
    %99 = vector.load %arg5[%c0_56, %c0_57, %c640_58] : memref<1x1x1024xf32, #tpu.memory_space<vmem>>, vector<1x1x128xf32>
    %100 = vector.shape_cast %99 : vector<1x1x128xf32> to vector<1x128xf32>
    %101 = arith.negf %100 : vector<1x128xf32>
    %102 = math.exp %101 : vector<1x128xf32>
    %cst_59 = arith.constant 1.000000e+00 : f32
    %103 = vector.broadcast %cst_59 : f32 to vector<1x128xf32>
    %104 = arith.addf %103, %102 : vector<1x128xf32>
    %105 = arith.divf %103, %104 : vector<1x128xf32>
    %106 = vector.broadcast %105 : vector<1x128xf32> to vector<8x128xf32>
    %107 = arith.mulf %98, %106 : vector<8x128xf32>
    %108 = arith.mulf %107, %107 : vector<8x128xf32>
    %cst_60 = arith.constant dense<0.000000e+00> : vector<128xf32>
    %109 = vector.multi_reduction <add>, %108, %cst_60 [0] : vector<8x128xf32> to vector<128xf32>
    %110 = vector.shape_cast %109 : vector<128xf32> to vector<1x128xf32>
    %111 = arith.addf %93, %110 : vector<1x128xf32>
    %c0_61 = arith.constant 0 : index
    %c0_62 = arith.constant 0 : index
    %c768 = arith.constant 768 : index
    %112 = vector.load %arg3[%c0_61, %c0_62, %c768] : memref<1x8x1024xf32, #tpu.memory_space<vmem>>, vector<1x8x128xf32>
    %113 = vector.shape_cast %112 : vector<1x8x128xf32> to vector<8x128xf32>
    %c0_63 = arith.constant 0 : index
    %c0_64 = arith.constant 0 : index
    %c768_65 = arith.constant 768 : index
    %114 = vector.load %arg4[%c0_63, %c0_64, %c768_65] : memref<1x8x1024xf32, #tpu.memory_space<vmem>>, vector<1x8x128xf32>
    %115 = vector.shape_cast %114 : vector<1x8x128xf32> to vector<8x128xf32>
    %116 = arith.subf %113, %115 : vector<8x128xf32>
    %c0_66 = arith.constant 0 : index
    %c0_67 = arith.constant 0 : index
    %c768_68 = arith.constant 768 : index
    %117 = vector.load %arg5[%c0_66, %c0_67, %c768_68] : memref<1x1x1024xf32, #tpu.memory_space<vmem>>, vector<1x1x128xf32>
    %118 = vector.shape_cast %117 : vector<1x1x128xf32> to vector<1x128xf32>
    %119 = arith.negf %118 : vector<1x128xf32>
    %120 = math.exp %119 : vector<1x128xf32>
    %cst_69 = arith.constant 1.000000e+00 : f32
    %121 = vector.broadcast %cst_69 : f32 to vector<1x128xf32>
    %122 = arith.addf %121, %120 : vector<1x128xf32>
    %123 = arith.divf %121, %122 : vector<1x128xf32>
    %124 = vector.broadcast %123 : vector<1x128xf32> to vector<8x128xf32>
    %125 = arith.mulf %116, %124 : vector<8x128xf32>
    %126 = arith.mulf %125, %125 : vector<8x128xf32>
    %cst_70 = arith.constant dense<0.000000e+00> : vector<128xf32>
    %127 = vector.multi_reduction <add>, %126, %cst_70 [0] : vector<8x128xf32> to vector<128xf32>
    %128 = vector.shape_cast %127 : vector<128xf32> to vector<1x128xf32>
    %129 = arith.addf %111, %128 : vector<1x128xf32>
    %c0_71 = arith.constant 0 : index
    %c0_72 = arith.constant 0 : index
    %c896 = arith.constant 896 : index
    %130 = vector.load %arg3[%c0_71, %c0_72, %c896] : memref<1x8x1024xf32, #tpu.memory_space<vmem>>, vector<1x8x128xf32>
    %131 = vector.shape_cast %130 : vector<1x8x128xf32> to vector<8x128xf32>
    %c0_73 = arith.constant 0 : index
    %c0_74 = arith.constant 0 : index
    %c896_75 = arith.constant 896 : index
    %132 = vector.load %arg4[%c0_73, %c0_74, %c896_75] : memref<1x8x1024xf32, #tpu.memory_space<vmem>>, vector<1x8x128xf32>
    %133 = vector.shape_cast %132 : vector<1x8x128xf32> to vector<8x128xf32>
    %134 = arith.subf %131, %133 : vector<8x128xf32>
    %c0_76 = arith.constant 0 : index
    %c0_77 = arith.constant 0 : index
    %c896_78 = arith.constant 896 : index
    %135 = vector.load %arg5[%c0_76, %c0_77, %c896_78] : memref<1x1x1024xf32, #tpu.memory_space<vmem>>, vector<1x1x128xf32>
    %136 = vector.shape_cast %135 : vector<1x1x128xf32> to vector<1x128xf32>
    %137 = arith.negf %136 : vector<1x128xf32>
    %138 = math.exp %137 : vector<1x128xf32>
    %cst_79 = arith.constant 1.000000e+00 : f32
    %139 = vector.broadcast %cst_79 : f32 to vector<1x128xf32>
    %140 = arith.addf %139, %138 : vector<1x128xf32>
    %141 = arith.divf %139, %140 : vector<1x128xf32>
    %142 = vector.broadcast %141 : vector<1x128xf32> to vector<8x128xf32>
    %143 = arith.mulf %134, %142 : vector<8x128xf32>
    %144 = arith.mulf %143, %143 : vector<8x128xf32>
    %cst_80 = arith.constant dense<0.000000e+00> : vector<128xf32>
    %145 = vector.multi_reduction <add>, %144, %cst_80 [0] : vector<8x128xf32> to vector<128xf32>
    %146 = vector.shape_cast %145 : vector<128xf32> to vector<1x128xf32>
    %147 = arith.addf %129, %146 : vector<1x128xf32>
    %c0_81 = arith.constant 0 : index
    %c0_82 = arith.constant 0 : index
    %148 = vector.load %arg7[%c0_81, %c0_82] : memref<1x128xf32, #tpu.memory_space<vmem>>, vector<1x128xf32>
    %149 = arith.addf %148, %147 : vector<1x128xf32>
    %c0_83 = arith.constant 0 : index
    %c0_84 = arith.constant 0 : index
    %150 = vector.load %arg7[%c0_83, %c0_84] : memref<1x128xf32, #tpu.memory_space<vmem>>, vector<1x128xf32>
    tpu.vector_store %arg7[%c0_83, %c0_84], %149 {strides = array<i32>} : memref<1x128xf32, #tpu.memory_space<vmem>>, vector<1x128xf32>,
    %c0_i32_85 = arith.constant 0 : i32
    %151 = arith.cmpi eq, %arg2, %c0_i32_85 : i32
    %152 = arith.extui %151 : i1 to i32
    %c0_i32_86 = arith.constant 0 : i32
    %153 = arith.cmpi ne, %152, %c0_i32_86 : i32
    scf.if %153 {
      %c0_87 = arith.constant 0 : index
      %c0_88 = arith.constant 0 : index
      %154 = vector.load %arg7[%c0_87, %c0_88] : memref<1x128xf32, #tpu.memory_space<vmem>>, vector<1x128xf32>
      %c0_89 = arith.constant 0 : index
      %c0_90 = arith.constant 0 : index
      %c0_91 = arith.constant 0 : index
      %155 = vector.load %arg6[%c0_89, %c0_90, %c0_91] : memref<1x1x128xf32, #tpu.memory_space<vmem>>, vector<1x1x128xf32>
      %156 = vector.shape_cast %155 : vector<1x1x128xf32> to vector<1x128xf32>
      %157 = vector.shape_cast %154 : vector<1x128xf32> to vector<1x1x128xf32>
      tpu.vector_store %arg6[%c0_89, %c0_90, %c0_91], %157 {strides = array<i32>} : memref<1x1x128xf32, #tpu.memory_space<vmem>>, vector<1x1x128xf32>,
    } else {
    }
    return
  }
  func.func @transform_0(%arg0: i32, %arg1: i32, %arg2: i32) -> (i32, i32, i32) {
    %c1_i32 = arith.constant 1 : i32
    %0 = arith.muli %arg1, %c1_i32 : i32
    %1 = arith.addi %0, %arg2 : i32
    %c0_i32 = arith.constant 0 : i32
    %c0_i32_0 = arith.constant 0 : i32
    return %arg0, %c0_i32, %1 : i32, i32, i32
  }
  func.func @transform_1(%arg0: i32, %arg1: i32, %arg2: i32) -> (i32, i32, i32) {
    %c1_i32 = arith.constant 1 : i32
    %0 = arith.muli %arg1, %c1_i32 : i32
    %1 = arith.addi %0, %arg2 : i32
    %c0_i32 = arith.constant 0 : i32
    %c0_i32_0 = arith.constant 0 : i32
    return %arg0, %c0_i32, %1 : i32, i32, i32
  }
  func.func @transform_2(%arg0: i32, %arg1: i32, %arg2: i32) -> (i32, i32, i32) {
    %c1_i32 = arith.constant 1 : i32
    %0 = arith.muli %arg1, %c1_i32 : i32
    %1 = arith.addi %0, %arg2 : i32
    %c0_i32 = arith.constant 0 : i32
    %c0_i32_0 = arith.constant 0 : i32
    return %arg0, %c0_i32, %1 : i32, i32, i32
  }
  func.func @transform_3(%arg0: i32, %arg1: i32, %arg2: i32) -> (i32, i32, i32) {
    %c1_i32 = arith.constant 1 : i32
    %0 = arith.muli %arg0, %c1_i32 : i32
    %1 = arith.addi %0, %arg1 : i32
    %c0_i32 = arith.constant 0 : i32
    %c0_i32_0 = arith.constant 0 : i32
    %c0_i32_1 = arith.constant 0 : i32
    return %1, %c0_i32, %c0_i32_0 : i32, i32, i32
  }
}

module attributes {stable_mosaic.version = 11 : i64} {
  func.func @kernel(%arg0: i32, %arg1: i32, %arg2: i32, %arg3: memref<1x4x4096xf32, #tpu.memory_space<vmem>>, %arg4: memref<1x4x4096xf32, #tpu.memory_space<vmem>>, %arg5: memref<1x1x4096xf32, #tpu.memory_space<vmem>>, %arg6: memref<1x1x128xf32, #tpu.memory_space<vmem>>, %arg7: memref<1x128xf32, #tpu.memory_space<vmem>>) attributes {dimension_semantics = [#tpu.dimension_semantics<parallel>, #tpu.dimension_semantics<parallel>, #tpu.dimension_semantics<arbitrary>], iteration_bounds = array<i64: 2, 1, 1>, scalar_prefetch = 0 : i64, scratch_operands = 1 : i64, tpu.core_type = #tpu.core_type<tc>, window_params = [{transform_indices = @transform_0, window_bounds = array<i64: 1, 4, 4096>}, {transform_indices = @transform_1, window_bounds = array<i64: 1, 4, 4096>}, {transform_indices = @transform_2, window_bounds = array<i64: 1, 1, 4096>}, {transform_indices = @transform_3, window_bounds = array<i64: 1, 1, 128>}]} {
    %c0_i32 = arith.constant 0 : i32
    %0 = arith.cmpi eq, %arg2, %c0_i32 : i32
    %1 = arith.extui %0 : i1 to i32
    %c0_i32_0 = arith.constant 0 : i32
    %2 = arith.cmpi ne, %1, %c0_i32_0 : i32
    scf.if %2 {
      %cst_327 = arith.constant 0.000000e+00 : f32
      %586 = vector.broadcast %cst_327 : f32 to vector<1x128xf32>
      %c0_328 = arith.constant 0 : index
      %c0_329 = arith.constant 0 : index
      %587 = vector.load %arg7[%c0_328, %c0_329] : memref<1x128xf32, #tpu.memory_space<vmem>>, vector<1x128xf32>
      tpu.vector_store %arg7[%c0_328, %c0_329], %586 {strides = array<i32>} : memref<1x128xf32, #tpu.memory_space<vmem>>, vector<1x128xf32>,
    } else {
    }
    %cst = arith.constant 0.000000e+00 : f32
    %3 = vector.broadcast %cst : f32 to vector<1x128xf32>
    %c0 = arith.constant 0 : index
    %c0_1 = arith.constant 0 : index
    %c0_2 = arith.constant 0 : index
    %4 = vector.load %arg3[%c0, %c0_1, %c0_2] : memref<1x4x4096xf32, #tpu.memory_space<vmem>>, vector<1x4x128xf32>
    %5 = vector.shape_cast %4 : vector<1x4x128xf32> to vector<4x128xf32>
    %c0_3 = arith.constant 0 : index
    %c0_4 = arith.constant 0 : index
    %c0_5 = arith.constant 0 : index
    %6 = vector.load %arg4[%c0_3, %c0_4, %c0_5] : memref<1x4x4096xf32, #tpu.memory_space<vmem>>, vector<1x4x128xf32>
    %7 = vector.shape_cast %6 : vector<1x4x128xf32> to vector<4x128xf32>
    %8 = arith.subf %5, %7 : vector<4x128xf32>
    %c0_6 = arith.constant 0 : index
    %c0_7 = arith.constant 0 : index
    %c0_8 = arith.constant 0 : index
    %9 = vector.load %arg5[%c0_6, %c0_7, %c0_8] : memref<1x1x4096xf32, #tpu.memory_space<vmem>>, vector<1x1x128xf32>
    %10 = vector.shape_cast %9 : vector<1x1x128xf32> to vector<1x128xf32>
    %11 = arith.negf %10 : vector<1x128xf32>
    %12 = math.exp %11 : vector<1x128xf32>
    %cst_9 = arith.constant 1.000000e+00 : f32
    %13 = vector.broadcast %cst_9 : f32 to vector<1x128xf32>
    %14 = arith.addf %13, %12 : vector<1x128xf32>
    %15 = arith.divf %13, %14 : vector<1x128xf32>
    %16 = vector.broadcast %15 : vector<1x128xf32> to vector<4x128xf32>
    %17 = arith.mulf %8, %16 : vector<4x128xf32>
    %18 = arith.mulf %17, %17 : vector<4x128xf32>
    %cst_10 = arith.constant dense<0.000000e+00> : vector<128xf32>
    %19 = vector.multi_reduction <add>, %18, %cst_10 [0] : vector<4x128xf32> to vector<128xf32>
    %20 = vector.shape_cast %19 : vector<128xf32> to vector<1x128xf32>
    %21 = arith.addf %3, %20 : vector<1x128xf32>
    %c0_11 = arith.constant 0 : index
    %c0_12 = arith.constant 0 : index
    %c128 = arith.constant 128 : index
    %22 = vector.load %arg3[%c0_11, %c0_12, %c128] : memref<1x4x4096xf32, #tpu.memory_space<vmem>>, vector<1x4x128xf32>
    %23 = vector.shape_cast %22 : vector<1x4x128xf32> to vector<4x128xf32>
    %c0_13 = arith.constant 0 : index
    %c0_14 = arith.constant 0 : index
    %c128_15 = arith.constant 128 : index
    %24 = vector.load %arg4[%c0_13, %c0_14, %c128_15] : memref<1x4x4096xf32, #tpu.memory_space<vmem>>, vector<1x4x128xf32>
    %25 = vector.shape_cast %24 : vector<1x4x128xf32> to vector<4x128xf32>
    %26 = arith.subf %23, %25 : vector<4x128xf32>
    %c0_16 = arith.constant 0 : index
    %c0_17 = arith.constant 0 : index
    %c128_18 = arith.constant 128 : index
    %27 = vector.load %arg5[%c0_16, %c0_17, %c128_18] : memref<1x1x4096xf32, #tpu.memory_space<vmem>>, vector<1x1x128xf32>
    %28 = vector.shape_cast %27 : vector<1x1x128xf32> to vector<1x128xf32>
    %29 = arith.negf %28 : vector<1x128xf32>
    %30 = math.exp %29 : vector<1x128xf32>
    %cst_19 = arith.constant 1.000000e+00 : f32
    %31 = vector.broadcast %cst_19 : f32 to vector<1x128xf32>
    %32 = arith.addf %31, %30 : vector<1x128xf32>
    %33 = arith.divf %31, %32 : vector<1x128xf32>
    %34 = vector.broadcast %33 : vector<1x128xf32> to vector<4x128xf32>
    %35 = arith.mulf %26, %34 : vector<4x128xf32>
    %36 = arith.mulf %35, %35 : vector<4x128xf32>
    %cst_20 = arith.constant dense<0.000000e+00> : vector<128xf32>
    %37 = vector.multi_reduction <add>, %36, %cst_20 [0] : vector<4x128xf32> to vector<128xf32>
    %38 = vector.shape_cast %37 : vector<128xf32> to vector<1x128xf32>
    %39 = arith.addf %21, %38 : vector<1x128xf32>
    %c0_21 = arith.constant 0 : index
    %c0_22 = arith.constant 0 : index
    %c256 = arith.constant 256 : index
    %40 = vector.load %arg3[%c0_21, %c0_22, %c256] : memref<1x4x4096xf32, #tpu.memory_space<vmem>>, vector<1x4x128xf32>
    %41 = vector.shape_cast %40 : vector<1x4x128xf32> to vector<4x128xf32>
    %c0_23 = arith.constant 0 : index
    %c0_24 = arith.constant 0 : index
    %c256_25 = arith.constant 256 : index
    %42 = vector.load %arg4[%c0_23, %c0_24, %c256_25] : memref<1x4x4096xf32, #tpu.memory_space<vmem>>, vector<1x4x128xf32>
    %43 = vector.shape_cast %42 : vector<1x4x128xf32> to vector<4x128xf32>
    %44 = arith.subf %41, %43 : vector<4x128xf32>
    %c0_26 = arith.constant 0 : index
    %c0_27 = arith.constant 0 : index
    %c256_28 = arith.constant 256 : index
    %45 = vector.load %arg5[%c0_26, %c0_27, %c256_28] : memref<1x1x4096xf32, #tpu.memory_space<vmem>>, vector<1x1x128xf32>
    %46 = vector.shape_cast %45 : vector<1x1x128xf32> to vector<1x128xf32>
    %47 = arith.negf %46 : vector<1x128xf32>
    %48 = math.exp %47 : vector<1x128xf32>
    %cst_29 = arith.constant 1.000000e+00 : f32
    %49 = vector.broadcast %cst_29 : f32 to vector<1x128xf32>
    %50 = arith.addf %49, %48 : vector<1x128xf32>
    %51 = arith.divf %49, %50 : vector<1x128xf32>
    %52 = vector.broadcast %51 : vector<1x128xf32> to vector<4x128xf32>
    %53 = arith.mulf %44, %52 : vector<4x128xf32>
    %54 = arith.mulf %53, %53 : vector<4x128xf32>
    %cst_30 = arith.constant dense<0.000000e+00> : vector<128xf32>
    %55 = vector.multi_reduction <add>, %54, %cst_30 [0] : vector<4x128xf32> to vector<128xf32>
    %56 = vector.shape_cast %55 : vector<128xf32> to vector<1x128xf32>
    %57 = arith.addf %39, %56 : vector<1x128xf32>
    %c0_31 = arith.constant 0 : index
    %c0_32 = arith.constant 0 : index
    %c384 = arith.constant 384 : index
    %58 = vector.load %arg3[%c0_31, %c0_32, %c384] : memref<1x4x4096xf32, #tpu.memory_space<vmem>>, vector<1x4x128xf32>
    %59 = vector.shape_cast %58 : vector<1x4x128xf32> to vector<4x128xf32>
    %c0_33 = arith.constant 0 : index
    %c0_34 = arith.constant 0 : index
    %c384_35 = arith.constant 384 : index
    %60 = vector.load %arg4[%c0_33, %c0_34, %c384_35] : memref<1x4x4096xf32, #tpu.memory_space<vmem>>, vector<1x4x128xf32>
    %61 = vector.shape_cast %60 : vector<1x4x128xf32> to vector<4x128xf32>
    %62 = arith.subf %59, %61 : vector<4x128xf32>
    %c0_36 = arith.constant 0 : index
    %c0_37 = arith.constant 0 : index
    %c384_38 = arith.constant 384 : index
    %63 = vector.load %arg5[%c0_36, %c0_37, %c384_38] : memref<1x1x4096xf32, #tpu.memory_space<vmem>>, vector<1x1x128xf32>
    %64 = vector.shape_cast %63 : vector<1x1x128xf32> to vector<1x128xf32>
    %65 = arith.negf %64 : vector<1x128xf32>
    %66 = math.exp %65 : vector<1x128xf32>
    %cst_39 = arith.constant 1.000000e+00 : f32
    %67 = vector.broadcast %cst_39 : f32 to vector<1x128xf32>
    %68 = arith.addf %67, %66 : vector<1x128xf32>
    %69 = arith.divf %67, %68 : vector<1x128xf32>
    %70 = vector.broadcast %69 : vector<1x128xf32> to vector<4x128xf32>
    %71 = arith.mulf %62, %70 : vector<4x128xf32>
    %72 = arith.mulf %71, %71 : vector<4x128xf32>
    %cst_40 = arith.constant dense<0.000000e+00> : vector<128xf32>
    %73 = vector.multi_reduction <add>, %72, %cst_40 [0] : vector<4x128xf32> to vector<128xf32>
    %74 = vector.shape_cast %73 : vector<128xf32> to vector<1x128xf32>
    %75 = arith.addf %57, %74 : vector<1x128xf32>
    %c0_41 = arith.constant 0 : index
    %c0_42 = arith.constant 0 : index
    %c512 = arith.constant 512 : index
    %76 = vector.load %arg3[%c0_41, %c0_42, %c512] : memref<1x4x4096xf32, #tpu.memory_space<vmem>>, vector<1x4x128xf32>
    %77 = vector.shape_cast %76 : vector<1x4x128xf32> to vector<4x128xf32>
    %c0_43 = arith.constant 0 : index
    %c0_44 = arith.constant 0 : index
    %c512_45 = arith.constant 512 : index
    %78 = vector.load %arg4[%c0_43, %c0_44, %c512_45] : memref<1x4x4096xf32, #tpu.memory_space<vmem>>, vector<1x4x128xf32>
    %79 = vector.shape_cast %78 : vector<1x4x128xf32> to vector<4x128xf32>
    %80 = arith.subf %77, %79 : vector<4x128xf32>
    %c0_46 = arith.constant 0 : index
    %c0_47 = arith.constant 0 : index
    %c512_48 = arith.constant 512 : index
    %81 = vector.load %arg5[%c0_46, %c0_47, %c512_48] : memref<1x1x4096xf32, #tpu.memory_space<vmem>>, vector<1x1x128xf32>
    %82 = vector.shape_cast %81 : vector<1x1x128xf32> to vector<1x128xf32>
    %83 = arith.negf %82 : vector<1x128xf32>
    %84 = math.exp %83 : vector<1x128xf32>
    %cst_49 = arith.constant 1.000000e+00 : f32
    %85 = vector.broadcast %cst_49 : f32 to vector<1x128xf32>
    %86 = arith.addf %85, %84 : vector<1x128xf32>
    %87 = arith.divf %85, %86 : vector<1x128xf32>
    %88 = vector.broadcast %87 : vector<1x128xf32> to vector<4x128xf32>
    %89 = arith.mulf %80, %88 : vector<4x128xf32>
    %90 = arith.mulf %89, %89 : vector<4x128xf32>
    %cst_50 = arith.constant dense<0.000000e+00> : vector<128xf32>
    %91 = vector.multi_reduction <add>, %90, %cst_50 [0] : vector<4x128xf32> to vector<128xf32>
    %92 = vector.shape_cast %91 : vector<128xf32> to vector<1x128xf32>
    %93 = arith.addf %75, %92 : vector<1x128xf32>
    %c0_51 = arith.constant 0 : index
    %c0_52 = arith.constant 0 : index
    %c640 = arith.constant 640 : index
    %94 = vector.load %arg3[%c0_51, %c0_52, %c640] : memref<1x4x4096xf32, #tpu.memory_space<vmem>>, vector<1x4x128xf32>
    %95 = vector.shape_cast %94 : vector<1x4x128xf32> to vector<4x128xf32>
    %c0_53 = arith.constant 0 : index
    %c0_54 = arith.constant 0 : index
    %c640_55 = arith.constant 640 : index
    %96 = vector.load %arg4[%c0_53, %c0_54, %c640_55] : memref<1x4x4096xf32, #tpu.memory_space<vmem>>, vector<1x4x128xf32>
    %97 = vector.shape_cast %96 : vector<1x4x128xf32> to vector<4x128xf32>
    %98 = arith.subf %95, %97 : vector<4x128xf32>
    %c0_56 = arith.constant 0 : index
    %c0_57 = arith.constant 0 : index
    %c640_58 = arith.constant 640 : index
    %99 = vector.load %arg5[%c0_56, %c0_57, %c640_58] : memref<1x1x4096xf32, #tpu.memory_space<vmem>>, vector<1x1x128xf32>
    %100 = vector.shape_cast %99 : vector<1x1x128xf32> to vector<1x128xf32>
    %101 = arith.negf %100 : vector<1x128xf32>
    %102 = math.exp %101 : vector<1x128xf32>
    %cst_59 = arith.constant 1.000000e+00 : f32
    %103 = vector.broadcast %cst_59 : f32 to vector<1x128xf32>
    %104 = arith.addf %103, %102 : vector<1x128xf32>
    %105 = arith.divf %103, %104 : vector<1x128xf32>
    %106 = vector.broadcast %105 : vector<1x128xf32> to vector<4x128xf32>
    %107 = arith.mulf %98, %106 : vector<4x128xf32>
    %108 = arith.mulf %107, %107 : vector<4x128xf32>
    %cst_60 = arith.constant dense<0.000000e+00> : vector<128xf32>
    %109 = vector.multi_reduction <add>, %108, %cst_60 [0] : vector<4x128xf32> to vector<128xf32>
    %110 = vector.shape_cast %109 : vector<128xf32> to vector<1x128xf32>
    %111 = arith.addf %93, %110 : vector<1x128xf32>
    %c0_61 = arith.constant 0 : index
    %c0_62 = arith.constant 0 : index
    %c768 = arith.constant 768 : index
    %112 = vector.load %arg3[%c0_61, %c0_62, %c768] : memref<1x4x4096xf32, #tpu.memory_space<vmem>>, vector<1x4x128xf32>
    %113 = vector.shape_cast %112 : vector<1x4x128xf32> to vector<4x128xf32>
    %c0_63 = arith.constant 0 : index
    %c0_64 = arith.constant 0 : index
    %c768_65 = arith.constant 768 : index
    %114 = vector.load %arg4[%c0_63, %c0_64, %c768_65] : memref<1x4x4096xf32, #tpu.memory_space<vmem>>, vector<1x4x128xf32>
    %115 = vector.shape_cast %114 : vector<1x4x128xf32> to vector<4x128xf32>
    %116 = arith.subf %113, %115 : vector<4x128xf32>
    %c0_66 = arith.constant 0 : index
    %c0_67 = arith.constant 0 : index
    %c768_68 = arith.constant 768 : index
    %117 = vector.load %arg5[%c0_66, %c0_67, %c768_68] : memref<1x1x4096xf32, #tpu.memory_space<vmem>>, vector<1x1x128xf32>
    %118 = vector.shape_cast %117 : vector<1x1x128xf32> to vector<1x128xf32>
    %119 = arith.negf %118 : vector<1x128xf32>
    %120 = math.exp %119 : vector<1x128xf32>
    %cst_69 = arith.constant 1.000000e+00 : f32
    %121 = vector.broadcast %cst_69 : f32 to vector<1x128xf32>
    %122 = arith.addf %121, %120 : vector<1x128xf32>
    %123 = arith.divf %121, %122 : vector<1x128xf32>
    %124 = vector.broadcast %123 : vector<1x128xf32> to vector<4x128xf32>
    %125 = arith.mulf %116, %124 : vector<4x128xf32>
    %126 = arith.mulf %125, %125 : vector<4x128xf32>
    %cst_70 = arith.constant dense<0.000000e+00> : vector<128xf32>
    %127 = vector.multi_reduction <add>, %126, %cst_70 [0] : vector<4x128xf32> to vector<128xf32>
    %128 = vector.shape_cast %127 : vector<128xf32> to vector<1x128xf32>
    %129 = arith.addf %111, %128 : vector<1x128xf32>
    %c0_71 = arith.constant 0 : index
    %c0_72 = arith.constant 0 : index
    %c896 = arith.constant 896 : index
    %130 = vector.load %arg3[%c0_71, %c0_72, %c896] : memref<1x4x4096xf32, #tpu.memory_space<vmem>>, vector<1x4x128xf32>
    %131 = vector.shape_cast %130 : vector<1x4x128xf32> to vector<4x128xf32>
    %c0_73 = arith.constant 0 : index
    %c0_74 = arith.constant 0 : index
    %c896_75 = arith.constant 896 : index
    %132 = vector.load %arg4[%c0_73, %c0_74, %c896_75] : memref<1x4x4096xf32, #tpu.memory_space<vmem>>, vector<1x4x128xf32>
    %133 = vector.shape_cast %132 : vector<1x4x128xf32> to vector<4x128xf32>
    %134 = arith.subf %131, %133 : vector<4x128xf32>
    %c0_76 = arith.constant 0 : index
    %c0_77 = arith.constant 0 : index
    %c896_78 = arith.constant 896 : index
    %135 = vector.load %arg5[%c0_76, %c0_77, %c896_78] : memref<1x1x4096xf32, #tpu.memory_space<vmem>>, vector<1x1x128xf32>
    %136 = vector.shape_cast %135 : vector<1x1x128xf32> to vector<1x128xf32>
    %137 = arith.negf %136 : vector<1x128xf32>
    %138 = math.exp %137 : vector<1x128xf32>
    %cst_79 = arith.constant 1.000000e+00 : f32
    %139 = vector.broadcast %cst_79 : f32 to vector<1x128xf32>
    %140 = arith.addf %139, %138 : vector<1x128xf32>
    %141 = arith.divf %139, %140 : vector<1x128xf32>
    %142 = vector.broadcast %141 : vector<1x128xf32> to vector<4x128xf32>
    %143 = arith.mulf %134, %142 : vector<4x128xf32>
    %144 = arith.mulf %143, %143 : vector<4x128xf32>
    %cst_80 = arith.constant dense<0.000000e+00> : vector<128xf32>
    %145 = vector.multi_reduction <add>, %144, %cst_80 [0] : vector<4x128xf32> to vector<128xf32>
    %146 = vector.shape_cast %145 : vector<128xf32> to vector<1x128xf32>
    %147 = arith.addf %129, %146 : vector<1x128xf32>
    %c0_81 = arith.constant 0 : index
    %c0_82 = arith.constant 0 : index
    %c1024 = arith.constant 1024 : index
    %148 = vector.load %arg3[%c0_81, %c0_82, %c1024] : memref<1x4x4096xf32, #tpu.memory_space<vmem>>, vector<1x4x128xf32>
    %149 = vector.shape_cast %148 : vector<1x4x128xf32> to vector<4x128xf32>
    %c0_83 = arith.constant 0 : index
    %c0_84 = arith.constant 0 : index
    %c1024_85 = arith.constant 1024 : index
    %150 = vector.load %arg4[%c0_83, %c0_84, %c1024_85] : memref<1x4x4096xf32, #tpu.memory_space<vmem>>, vector<1x4x128xf32>
    %151 = vector.shape_cast %150 : vector<1x4x128xf32> to vector<4x128xf32>
    %152 = arith.subf %149, %151 : vector<4x128xf32>
    %c0_86 = arith.constant 0 : index
    %c0_87 = arith.constant 0 : index
    %c1024_88 = arith.constant 1024 : index
    %153 = vector.load %arg5[%c0_86, %c0_87, %c1024_88] : memref<1x1x4096xf32, #tpu.memory_space<vmem>>, vector<1x1x128xf32>
    %154 = vector.shape_cast %153 : vector<1x1x128xf32> to vector<1x128xf32>
    %155 = arith.negf %154 : vector<1x128xf32>
    %156 = math.exp %155 : vector<1x128xf32>
    %cst_89 = arith.constant 1.000000e+00 : f32
    %157 = vector.broadcast %cst_89 : f32 to vector<1x128xf32>
    %158 = arith.addf %157, %156 : vector<1x128xf32>
    %159 = arith.divf %157, %158 : vector<1x128xf32>
    %160 = vector.broadcast %159 : vector<1x128xf32> to vector<4x128xf32>
    %161 = arith.mulf %152, %160 : vector<4x128xf32>
    %162 = arith.mulf %161, %161 : vector<4x128xf32>
    %cst_90 = arith.constant dense<0.000000e+00> : vector<128xf32>
    %163 = vector.multi_reduction <add>, %162, %cst_90 [0] : vector<4x128xf32> to vector<128xf32>
    %164 = vector.shape_cast %163 : vector<128xf32> to vector<1x128xf32>
    %165 = arith.addf %147, %164 : vector<1x128xf32>
    %c0_91 = arith.constant 0 : index
    %c0_92 = arith.constant 0 : index
    %c1152 = arith.constant 1152 : index
    %166 = vector.load %arg3[%c0_91, %c0_92, %c1152] : memref<1x4x4096xf32, #tpu.memory_space<vmem>>, vector<1x4x128xf32>
    %167 = vector.shape_cast %166 : vector<1x4x128xf32> to vector<4x128xf32>
    %c0_93 = arith.constant 0 : index
    %c0_94 = arith.constant 0 : index
    %c1152_95 = arith.constant 1152 : index
    %168 = vector.load %arg4[%c0_93, %c0_94, %c1152_95] : memref<1x4x4096xf32, #tpu.memory_space<vmem>>, vector<1x4x128xf32>
    %169 = vector.shape_cast %168 : vector<1x4x128xf32> to vector<4x128xf32>
    %170 = arith.subf %167, %169 : vector<4x128xf32>
    %c0_96 = arith.constant 0 : index
    %c0_97 = arith.constant 0 : index
    %c1152_98 = arith.constant 1152 : index
    %171 = vector.load %arg5[%c0_96, %c0_97, %c1152_98] : memref<1x1x4096xf32, #tpu.memory_space<vmem>>, vector<1x1x128xf32>
    %172 = vector.shape_cast %171 : vector<1x1x128xf32> to vector<1x128xf32>
    %173 = arith.negf %172 : vector<1x128xf32>
    %174 = math.exp %173 : vector<1x128xf32>
    %cst_99 = arith.constant 1.000000e+00 : f32
    %175 = vector.broadcast %cst_99 : f32 to vector<1x128xf32>
    %176 = arith.addf %175, %174 : vector<1x128xf32>
    %177 = arith.divf %175, %176 : vector<1x128xf32>
    %178 = vector.broadcast %177 : vector<1x128xf32> to vector<4x128xf32>
    %179 = arith.mulf %170, %178 : vector<4x128xf32>
    %180 = arith.mulf %179, %179 : vector<4x128xf32>
    %cst_100 = arith.constant dense<0.000000e+00> : vector<128xf32>
    %181 = vector.multi_reduction <add>, %180, %cst_100 [0] : vector<4x128xf32> to vector<128xf32>
    %182 = vector.shape_cast %181 : vector<128xf32> to vector<1x128xf32>
    %183 = arith.addf %165, %182 : vector<1x128xf32>
    %c0_101 = arith.constant 0 : index
    %c0_102 = arith.constant 0 : index
    %c1280 = arith.constant 1280 : index
    %184 = vector.load %arg3[%c0_101, %c0_102, %c1280] : memref<1x4x4096xf32, #tpu.memory_space<vmem>>, vector<1x4x128xf32>
    %185 = vector.shape_cast %184 : vector<1x4x128xf32> to vector<4x128xf32>
    %c0_103 = arith.constant 0 : index
    %c0_104 = arith.constant 0 : index
    %c1280_105 = arith.constant 1280 : index
    %186 = vector.load %arg4[%c0_103, %c0_104, %c1280_105] : memref<1x4x4096xf32, #tpu.memory_space<vmem>>, vector<1x4x128xf32>
    %187 = vector.shape_cast %186 : vector<1x4x128xf32> to vector<4x128xf32>
    %188 = arith.subf %185, %187 : vector<4x128xf32>
    %c0_106 = arith.constant 0 : index
    %c0_107 = arith.constant 0 : index
    %c1280_108 = arith.constant 1280 : index
    %189 = vector.load %arg5[%c0_106, %c0_107, %c1280_108] : memref<1x1x4096xf32, #tpu.memory_space<vmem>>, vector<1x1x128xf32>
    %190 = vector.shape_cast %189 : vector<1x1x128xf32> to vector<1x128xf32>
    %191 = arith.negf %190 : vector<1x128xf32>
    %192 = math.exp %191 : vector<1x128xf32>
    %cst_109 = arith.constant 1.000000e+00 : f32
    %193 = vector.broadcast %cst_109 : f32 to vector<1x128xf32>
    %194 = arith.addf %193, %192 : vector<1x128xf32>
    %195 = arith.divf %193, %194 : vector<1x128xf32>
    %196 = vector.broadcast %195 : vector<1x128xf32> to vector<4x128xf32>
    %197 = arith.mulf %188, %196 : vector<4x128xf32>
    %198 = arith.mulf %197, %197 : vector<4x128xf32>
    %cst_110 = arith.constant dense<0.000000e+00> : vector<128xf32>
    %199 = vector.multi_reduction <add>, %198, %cst_110 [0] : vector<4x128xf32> to vector<128xf32>
    %200 = vector.shape_cast %199 : vector<128xf32> to vector<1x128xf32>
    %201 = arith.addf %183, %200 : vector<1x128xf32>
    %c0_111 = arith.constant 0 : index
    %c0_112 = arith.constant 0 : index
    %c1408 = arith.constant 1408 : index
    %202 = vector.load %arg3[%c0_111, %c0_112, %c1408] : memref<1x4x4096xf32, #tpu.memory_space<vmem>>, vector<1x4x128xf32>
    %203 = vector.shape_cast %202 : vector<1x4x128xf32> to vector<4x128xf32>
    %c0_113 = arith.constant 0 : index
    %c0_114 = arith.constant 0 : index
    %c1408_115 = arith.constant 1408 : index
    %204 = vector.load %arg4[%c0_113, %c0_114, %c1408_115] : memref<1x4x4096xf32, #tpu.memory_space<vmem>>, vector<1x4x128xf32>
    %205 = vector.shape_cast %204 : vector<1x4x128xf32> to vector<4x128xf32>
    %206 = arith.subf %203, %205 : vector<4x128xf32>
    %c0_116 = arith.constant 0 : index
    %c0_117 = arith.constant 0 : index
    %c1408_118 = arith.constant 1408 : index
    %207 = vector.load %arg5[%c0_116, %c0_117, %c1408_118] : memref<1x1x4096xf32, #tpu.memory_space<vmem>>, vector<1x1x128xf32>
    %208 = vector.shape_cast %207 : vector<1x1x128xf32> to vector<1x128xf32>
    %209 = arith.negf %208 : vector<1x128xf32>
    %210 = math.exp %209 : vector<1x128xf32>
    %cst_119 = arith.constant 1.000000e+00 : f32
    %211 = vector.broadcast %cst_119 : f32 to vector<1x128xf32>
    %212 = arith.addf %211, %210 : vector<1x128xf32>
    %213 = arith.divf %211, %212 : vector<1x128xf32>
    %214 = vector.broadcast %213 : vector<1x128xf32> to vector<4x128xf32>
    %215 = arith.mulf %206, %214 : vector<4x128xf32>
    %216 = arith.mulf %215, %215 : vector<4x128xf32>
    %cst_120 = arith.constant dense<0.000000e+00> : vector<128xf32>
    %217 = vector.multi_reduction <add>, %216, %cst_120 [0] : vector<4x128xf32> to vector<128xf32>
    %218 = vector.shape_cast %217 : vector<128xf32> to vector<1x128xf32>
    %219 = arith.addf %201, %218 : vector<1x128xf32>
    %c0_121 = arith.constant 0 : index
    %c0_122 = arith.constant 0 : index
    %c1536 = arith.constant 1536 : index
    %220 = vector.load %arg3[%c0_121, %c0_122, %c1536] : memref<1x4x4096xf32, #tpu.memory_space<vmem>>, vector<1x4x128xf32>
    %221 = vector.shape_cast %220 : vector<1x4x128xf32> to vector<4x128xf32>
    %c0_123 = arith.constant 0 : index
    %c0_124 = arith.constant 0 : index
    %c1536_125 = arith.constant 1536 : index
    %222 = vector.load %arg4[%c0_123, %c0_124, %c1536_125] : memref<1x4x4096xf32, #tpu.memory_space<vmem>>, vector<1x4x128xf32>
    %223 = vector.shape_cast %222 : vector<1x4x128xf32> to vector<4x128xf32>
    %224 = arith.subf %221, %223 : vector<4x128xf32>
    %c0_126 = arith.constant 0 : index
    %c0_127 = arith.constant 0 : index
    %c1536_128 = arith.constant 1536 : index
    %225 = vector.load %arg5[%c0_126, %c0_127, %c1536_128] : memref<1x1x4096xf32, #tpu.memory_space<vmem>>, vector<1x1x128xf32>
    %226 = vector.shape_cast %225 : vector<1x1x128xf32> to vector<1x128xf32>
    %227 = arith.negf %226 : vector<1x128xf32>
    %228 = math.exp %227 : vector<1x128xf32>
    %cst_129 = arith.constant 1.000000e+00 : f32
    %229 = vector.broadcast %cst_129 : f32 to vector<1x128xf32>
    %230 = arith.addf %229, %228 : vector<1x128xf32>
    %231 = arith.divf %229, %230 : vector<1x128xf32>
    %232 = vector.broadcast %231 : vector<1x128xf32> to vector<4x128xf32>
    %233 = arith.mulf %224, %232 : vector<4x128xf32>
    %234 = arith.mulf %233, %233 : vector<4x128xf32>
    %cst_130 = arith.constant dense<0.000000e+00> : vector<128xf32>
    %235 = vector.multi_reduction <add>, %234, %cst_130 [0] : vector<4x128xf32> to vector<128xf32>
    %236 = vector.shape_cast %235 : vector<128xf32> to vector<1x128xf32>
    %237 = arith.addf %219, %236 : vector<1x128xf32>
    %c0_131 = arith.constant 0 : index
    %c0_132 = arith.constant 0 : index
    %c1664 = arith.constant 1664 : index
    %238 = vector.load %arg3[%c0_131, %c0_132, %c1664] : memref<1x4x4096xf32, #tpu.memory_space<vmem>>, vector<1x4x128xf32>
    %239 = vector.shape_cast %238 : vector<1x4x128xf32> to vector<4x128xf32>
    %c0_133 = arith.constant 0 : index
    %c0_134 = arith.constant 0 : index
    %c1664_135 = arith.constant 1664 : index
    %240 = vector.load %arg4[%c0_133, %c0_134, %c1664_135] : memref<1x4x4096xf32, #tpu.memory_space<vmem>>, vector<1x4x128xf32>
    %241 = vector.shape_cast %240 : vector<1x4x128xf32> to vector<4x128xf32>
    %242 = arith.subf %239, %241 : vector<4x128xf32>
    %c0_136 = arith.constant 0 : index
    %c0_137 = arith.constant 0 : index
    %c1664_138 = arith.constant 1664 : index
    %243 = vector.load %arg5[%c0_136, %c0_137, %c1664_138] : memref<1x1x4096xf32, #tpu.memory_space<vmem>>, vector<1x1x128xf32>
    %244 = vector.shape_cast %243 : vector<1x1x128xf32> to vector<1x128xf32>
    %245 = arith.negf %244 : vector<1x128xf32>
    %246 = math.exp %245 : vector<1x128xf32>
    %cst_139 = arith.constant 1.000000e+00 : f32
    %247 = vector.broadcast %cst_139 : f32 to vector<1x128xf32>
    %248 = arith.addf %247, %246 : vector<1x128xf32>
    %249 = arith.divf %247, %248 : vector<1x128xf32>
    %250 = vector.broadcast %249 : vector<1x128xf32> to vector<4x128xf32>
    %251 = arith.mulf %242, %250 : vector<4x128xf32>
    %252 = arith.mulf %251, %251 : vector<4x128xf32>
    %cst_140 = arith.constant dense<0.000000e+00> : vector<128xf32>
    %253 = vector.multi_reduction <add>, %252, %cst_140 [0] : vector<4x128xf32> to vector<128xf32>
    %254 = vector.shape_cast %253 : vector<128xf32> to vector<1x128xf32>
    %255 = arith.addf %237, %254 : vector<1x128xf32>
    %c0_141 = arith.constant 0 : index
    %c0_142 = arith.constant 0 : index
    %c1792 = arith.constant 1792 : index
    %256 = vector.load %arg3[%c0_141, %c0_142, %c1792] : memref<1x4x4096xf32, #tpu.memory_space<vmem>>, vector<1x4x128xf32>
    %257 = vector.shape_cast %256 : vector<1x4x128xf32> to vector<4x128xf32>
    %c0_143 = arith.constant 0 : index
    %c0_144 = arith.constant 0 : index
    %c1792_145 = arith.constant 1792 : index
    %258 = vector.load %arg4[%c0_143, %c0_144, %c1792_145] : memref<1x4x4096xf32, #tpu.memory_space<vmem>>, vector<1x4x128xf32>
    %259 = vector.shape_cast %258 : vector<1x4x128xf32> to vector<4x128xf32>
    %260 = arith.subf %257, %259 : vector<4x128xf32>
    %c0_146 = arith.constant 0 : index
    %c0_147 = arith.constant 0 : index
    %c1792_148 = arith.constant 1792 : index
    %261 = vector.load %arg5[%c0_146, %c0_147, %c1792_148] : memref<1x1x4096xf32, #tpu.memory_space<vmem>>, vector<1x1x128xf32>
    %262 = vector.shape_cast %261 : vector<1x1x128xf32> to vector<1x128xf32>
    %263 = arith.negf %262 : vector<1x128xf32>
    %264 = math.exp %263 : vector<1x128xf32>
    %cst_149 = arith.constant 1.000000e+00 : f32
    %265 = vector.broadcast %cst_149 : f32 to vector<1x128xf32>
    %266 = arith.addf %265, %264 : vector<1x128xf32>
    %267 = arith.divf %265, %266 : vector<1x128xf32>
    %268 = vector.broadcast %267 : vector<1x128xf32> to vector<4x128xf32>
    %269 = arith.mulf %260, %268 : vector<4x128xf32>
    %270 = arith.mulf %269, %269 : vector<4x128xf32>
    %cst_150 = arith.constant dense<0.000000e+00> : vector<128xf32>
    %271 = vector.multi_reduction <add>, %270, %cst_150 [0] : vector<4x128xf32> to vector<128xf32>
    %272 = vector.shape_cast %271 : vector<128xf32> to vector<1x128xf32>
    %273 = arith.addf %255, %272 : vector<1x128xf32>
    %c0_151 = arith.constant 0 : index
    %c0_152 = arith.constant 0 : index
    %c1920 = arith.constant 1920 : index
    %274 = vector.load %arg3[%c0_151, %c0_152, %c1920] : memref<1x4x4096xf32, #tpu.memory_space<vmem>>, vector<1x4x128xf32>
    %275 = vector.shape_cast %274 : vector<1x4x128xf32> to vector<4x128xf32>
    %c0_153 = arith.constant 0 : index
    %c0_154 = arith.constant 0 : index
    %c1920_155 = arith.constant 1920 : index
    %276 = vector.load %arg4[%c0_153, %c0_154, %c1920_155] : memref<1x4x4096xf32, #tpu.memory_space<vmem>>, vector<1x4x128xf32>
    %277 = vector.shape_cast %276 : vector<1x4x128xf32> to vector<4x128xf32>
    %278 = arith.subf %275, %277 : vector<4x128xf32>
    %c0_156 = arith.constant 0 : index
    %c0_157 = arith.constant 0 : index
    %c1920_158 = arith.constant 1920 : index
    %279 = vector.load %arg5[%c0_156, %c0_157, %c1920_158] : memref<1x1x4096xf32, #tpu.memory_space<vmem>>, vector<1x1x128xf32>
    %280 = vector.shape_cast %279 : vector<1x1x128xf32> to vector<1x128xf32>
    %281 = arith.negf %280 : vector<1x128xf32>
    %282 = math.exp %281 : vector<1x128xf32>
    %cst_159 = arith.constant 1.000000e+00 : f32
    %283 = vector.broadcast %cst_159 : f32 to vector<1x128xf32>
    %284 = arith.addf %283, %282 : vector<1x128xf32>
    %285 = arith.divf %283, %284 : vector<1x128xf32>
    %286 = vector.broadcast %285 : vector<1x128xf32> to vector<4x128xf32>
    %287 = arith.mulf %278, %286 : vector<4x128xf32>
    %288 = arith.mulf %287, %287 : vector<4x128xf32>
    %cst_160 = arith.constant dense<0.000000e+00> : vector<128xf32>
    %289 = vector.multi_reduction <add>, %288, %cst_160 [0] : vector<4x128xf32> to vector<128xf32>
    %290 = vector.shape_cast %289 : vector<128xf32> to vector<1x128xf32>
    %291 = arith.addf %273, %290 : vector<1x128xf32>
    %c0_161 = arith.constant 0 : index
    %c0_162 = arith.constant 0 : index
    %c2048 = arith.constant 2048 : index
    %292 = vector.load %arg3[%c0_161, %c0_162, %c2048] : memref<1x4x4096xf32, #tpu.memory_space<vmem>>, vector<1x4x128xf32>
    %293 = vector.shape_cast %292 : vector<1x4x128xf32> to vector<4x128xf32>
    %c0_163 = arith.constant 0 : index
    %c0_164 = arith.constant 0 : index
    %c2048_165 = arith.constant 2048 : index
    %294 = vector.load %arg4[%c0_163, %c0_164, %c2048_165] : memref<1x4x4096xf32, #tpu.memory_space<vmem>>, vector<1x4x128xf32>
    %295 = vector.shape_cast %294 : vector<1x4x128xf32> to vector<4x128xf32>
    %296 = arith.subf %293, %295 : vector<4x128xf32>
    %c0_166 = arith.constant 0 : index
    %c0_167 = arith.constant 0 : index
    %c2048_168 = arith.constant 2048 : index
    %297 = vector.load %arg5[%c0_166, %c0_167, %c2048_168] : memref<1x1x4096xf32, #tpu.memory_space<vmem>>, vector<1x1x128xf32>
    %298 = vector.shape_cast %297 : vector<1x1x128xf32> to vector<1x128xf32>
    %299 = arith.negf %298 : vector<1x128xf32>
    %300 = math.exp %299 : vector<1x128xf32>
    %cst_169 = arith.constant 1.000000e+00 : f32
    %301 = vector.broadcast %cst_169 : f32 to vector<1x128xf32>
    %302 = arith.addf %301, %300 : vector<1x128xf32>
    %303 = arith.divf %301, %302 : vector<1x128xf32>
    %304 = vector.broadcast %303 : vector<1x128xf32> to vector<4x128xf32>
    %305 = arith.mulf %296, %304 : vector<4x128xf32>
    %306 = arith.mulf %305, %305 : vector<4x128xf32>
    %cst_170 = arith.constant dense<0.000000e+00> : vector<128xf32>
    %307 = vector.multi_reduction <add>, %306, %cst_170 [0] : vector<4x128xf32> to vector<128xf32>
    %308 = vector.shape_cast %307 : vector<128xf32> to vector<1x128xf32>
    %309 = arith.addf %291, %308 : vector<1x128xf32>
    %c0_171 = arith.constant 0 : index
    %c0_172 = arith.constant 0 : index
    %c2176 = arith.constant 2176 : index
    %310 = vector.load %arg3[%c0_171, %c0_172, %c2176] : memref<1x4x4096xf32, #tpu.memory_space<vmem>>, vector<1x4x128xf32>
    %311 = vector.shape_cast %310 : vector<1x4x128xf32> to vector<4x128xf32>
    %c0_173 = arith.constant 0 : index
    %c0_174 = arith.constant 0 : index
    %c2176_175 = arith.constant 2176 : index
    %312 = vector.load %arg4[%c0_173, %c0_174, %c2176_175] : memref<1x4x4096xf32, #tpu.memory_space<vmem>>, vector<1x4x128xf32>
    %313 = vector.shape_cast %312 : vector<1x4x128xf32> to vector<4x128xf32>
    %314 = arith.subf %311, %313 : vector<4x128xf32>
    %c0_176 = arith.constant 0 : index
    %c0_177 = arith.constant 0 : index
    %c2176_178 = arith.constant 2176 : index
    %315 = vector.load %arg5[%c0_176, %c0_177, %c2176_178] : memref<1x1x4096xf32, #tpu.memory_space<vmem>>, vector<1x1x128xf32>
    %316 = vector.shape_cast %315 : vector<1x1x128xf32> to vector<1x128xf32>
    %317 = arith.negf %316 : vector<1x128xf32>
    %318 = math.exp %317 : vector<1x128xf32>
    %cst_179 = arith.constant 1.000000e+00 : f32
    %319 = vector.broadcast %cst_179 : f32 to vector<1x128xf32>
    %320 = arith.addf %319, %318 : vector<1x128xf32>
    %321 = arith.divf %319, %320 : vector<1x128xf32>
    %322 = vector.broadcast %321 : vector<1x128xf32> to vector<4x128xf32>
    %323 = arith.mulf %314, %322 : vector<4x128xf32>
    %324 = arith.mulf %323, %323 : vector<4x128xf32>
    %cst_180 = arith.constant dense<0.000000e+00> : vector<128xf32>
    %325 = vector.multi_reduction <add>, %324, %cst_180 [0] : vector<4x128xf32> to vector<128xf32>
    %326 = vector.shape_cast %325 : vector<128xf32> to vector<1x128xf32>
    %327 = arith.addf %309, %326 : vector<1x128xf32>
    %c0_181 = arith.constant 0 : index
    %c0_182 = arith.constant 0 : index
    %c2304 = arith.constant 2304 : index
    %328 = vector.load %arg3[%c0_181, %c0_182, %c2304] : memref<1x4x4096xf32, #tpu.memory_space<vmem>>, vector<1x4x128xf32>
    %329 = vector.shape_cast %328 : vector<1x4x128xf32> to vector<4x128xf32>
    %c0_183 = arith.constant 0 : index
    %c0_184 = arith.constant 0 : index
    %c2304_185 = arith.constant 2304 : index
    %330 = vector.load %arg4[%c0_183, %c0_184, %c2304_185] : memref<1x4x4096xf32, #tpu.memory_space<vmem>>, vector<1x4x128xf32>
    %331 = vector.shape_cast %330 : vector<1x4x128xf32> to vector<4x128xf32>
    %332 = arith.subf %329, %331 : vector<4x128xf32>
    %c0_186 = arith.constant 0 : index
    %c0_187 = arith.constant 0 : index
    %c2304_188 = arith.constant 2304 : index
    %333 = vector.load %arg5[%c0_186, %c0_187, %c2304_188] : memref<1x1x4096xf32, #tpu.memory_space<vmem>>, vector<1x1x128xf32>
    %334 = vector.shape_cast %333 : vector<1x1x128xf32> to vector<1x128xf32>
    %335 = arith.negf %334 : vector<1x128xf32>
    %336 = math.exp %335 : vector<1x128xf32>
    %cst_189 = arith.constant 1.000000e+00 : f32
    %337 = vector.broadcast %cst_189 : f32 to vector<1x128xf32>
    %338 = arith.addf %337, %336 : vector<1x128xf32>
    %339 = arith.divf %337, %338 : vector<1x128xf32>
    %340 = vector.broadcast %339 : vector<1x128xf32> to vector<4x128xf32>
    %341 = arith.mulf %332, %340 : vector<4x128xf32>
    %342 = arith.mulf %341, %341 : vector<4x128xf32>
    %cst_190 = arith.constant dense<0.000000e+00> : vector<128xf32>
    %343 = vector.multi_reduction <add>, %342, %cst_190 [0] : vector<4x128xf32> to vector<128xf32>
    %344 = vector.shape_cast %343 : vector<128xf32> to vector<1x128xf32>
    %345 = arith.addf %327, %344 : vector<1x128xf32>
    %c0_191 = arith.constant 0 : index
    %c0_192 = arith.constant 0 : index
    %c2432 = arith.constant 2432 : index
    %346 = vector.load %arg3[%c0_191, %c0_192, %c2432] : memref<1x4x4096xf32, #tpu.memory_space<vmem>>, vector<1x4x128xf32>
    %347 = vector.shape_cast %346 : vector<1x4x128xf32> to vector<4x128xf32>
    %c0_193 = arith.constant 0 : index
    %c0_194 = arith.constant 0 : index
    %c2432_195 = arith.constant 2432 : index
    %348 = vector.load %arg4[%c0_193, %c0_194, %c2432_195] : memref<1x4x4096xf32, #tpu.memory_space<vmem>>, vector<1x4x128xf32>
    %349 = vector.shape_cast %348 : vector<1x4x128xf32> to vector<4x128xf32>
    %350 = arith.subf %347, %349 : vector<4x128xf32>
    %c0_196 = arith.constant 0 : index
    %c0_197 = arith.constant 0 : index
    %c2432_198 = arith.constant 2432 : index
    %351 = vector.load %arg5[%c0_196, %c0_197, %c2432_198] : memref<1x1x4096xf32, #tpu.memory_space<vmem>>, vector<1x1x128xf32>
    %352 = vector.shape_cast %351 : vector<1x1x128xf32> to vector<1x128xf32>
    %353 = arith.negf %352 : vector<1x128xf32>
    %354 = math.exp %353 : vector<1x128xf32>
    %cst_199 = arith.constant 1.000000e+00 : f32
    %355 = vector.broadcast %cst_199 : f32 to vector<1x128xf32>
    %356 = arith.addf %355, %354 : vector<1x128xf32>
    %357 = arith.divf %355, %356 : vector<1x128xf32>
    %358 = vector.broadcast %357 : vector<1x128xf32> to vector<4x128xf32>
    %359 = arith.mulf %350, %358 : vector<4x128xf32>
    %360 = arith.mulf %359, %359 : vector<4x128xf32>
    %cst_200 = arith.constant dense<0.000000e+00> : vector<128xf32>
    %361 = vector.multi_reduction <add>, %360, %cst_200 [0] : vector<4x128xf32> to vector<128xf32>
    %362 = vector.shape_cast %361 : vector<128xf32> to vector<1x128xf32>
    %363 = arith.addf %345, %362 : vector<1x128xf32>
    %c0_201 = arith.constant 0 : index
    %c0_202 = arith.constant 0 : index
    %c2560 = arith.constant 2560 : index
    %364 = vector.load %arg3[%c0_201, %c0_202, %c2560] : memref<1x4x4096xf32, #tpu.memory_space<vmem>>, vector<1x4x128xf32>
    %365 = vector.shape_cast %364 : vector<1x4x128xf32> to vector<4x128xf32>
    %c0_203 = arith.constant 0 : index
    %c0_204 = arith.constant 0 : index
    %c2560_205 = arith.constant 2560 : index
    %366 = vector.load %arg4[%c0_203, %c0_204, %c2560_205] : memref<1x4x4096xf32, #tpu.memory_space<vmem>>, vector<1x4x128xf32>
    %367 = vector.shape_cast %366 : vector<1x4x128xf32> to vector<4x128xf32>
    %368 = arith.subf %365, %367 : vector<4x128xf32>
    %c0_206 = arith.constant 0 : index
    %c0_207 = arith.constant 0 : index
    %c2560_208 = arith.constant 2560 : index
    %369 = vector.load %arg5[%c0_206, %c0_207, %c2560_208] : memref<1x1x4096xf32, #tpu.memory_space<vmem>>, vector<1x1x128xf32>
    %370 = vector.shape_cast %369 : vector<1x1x128xf32> to vector<1x128xf32>
    %371 = arith.negf %370 : vector<1x128xf32>
    %372 = math.exp %371 : vector<1x128xf32>
    %cst_209 = arith.constant 1.000000e+00 : f32
    %373 = vector.broadcast %cst_209 : f32 to vector<1x128xf32>
    %374 = arith.addf %373, %372 : vector<1x128xf32>
    %375 = arith.divf %373, %374 : vector<1x128xf32>
    %376 = vector.broadcast %375 : vector<1x128xf32> to vector<4x128xf32>
    %377 = arith.mulf %368, %376 : vector<4x128xf32>
    %378 = arith.mulf %377, %377 : vector<4x128xf32>
    %cst_210 = arith.constant dense<0.000000e+00> : vector<128xf32>
    %379 = vector.multi_reduction <add>, %378, %cst_210 [0] : vector<4x128xf32> to vector<128xf32>
    %380 = vector.shape_cast %379 : vector<128xf32> to vector<1x128xf32>
    %381 = arith.addf %363, %380 : vector<1x128xf32>
    %c0_211 = arith.constant 0 : index
    %c0_212 = arith.constant 0 : index
    %c2688 = arith.constant 2688 : index
    %382 = vector.load %arg3[%c0_211, %c0_212, %c2688] : memref<1x4x4096xf32, #tpu.memory_space<vmem>>, vector<1x4x128xf32>
    %383 = vector.shape_cast %382 : vector<1x4x128xf32> to vector<4x128xf32>
    %c0_213 = arith.constant 0 : index
    %c0_214 = arith.constant 0 : index
    %c2688_215 = arith.constant 2688 : index
    %384 = vector.load %arg4[%c0_213, %c0_214, %c2688_215] : memref<1x4x4096xf32, #tpu.memory_space<vmem>>, vector<1x4x128xf32>
    %385 = vector.shape_cast %384 : vector<1x4x128xf32> to vector<4x128xf32>
    %386 = arith.subf %383, %385 : vector<4x128xf32>
    %c0_216 = arith.constant 0 : index
    %c0_217 = arith.constant 0 : index
    %c2688_218 = arith.constant 2688 : index
    %387 = vector.load %arg5[%c0_216, %c0_217, %c2688_218] : memref<1x1x4096xf32, #tpu.memory_space<vmem>>, vector<1x1x128xf32>
    %388 = vector.shape_cast %387 : vector<1x1x128xf32> to vector<1x128xf32>
    %389 = arith.negf %388 : vector<1x128xf32>
    %390 = math.exp %389 : vector<1x128xf32>
    %cst_219 = arith.constant 1.000000e+00 : f32
    %391 = vector.broadcast %cst_219 : f32 to vector<1x128xf32>
    %392 = arith.addf %391, %390 : vector<1x128xf32>
    %393 = arith.divf %391, %392 : vector<1x128xf32>
    %394 = vector.broadcast %393 : vector<1x128xf32> to vector<4x128xf32>
    %395 = arith.mulf %386, %394 : vector<4x128xf32>
    %396 = arith.mulf %395, %395 : vector<4x128xf32>
    %cst_220 = arith.constant dense<0.000000e+00> : vector<128xf32>
    %397 = vector.multi_reduction <add>, %396, %cst_220 [0] : vector<4x128xf32> to vector<128xf32>
    %398 = vector.shape_cast %397 : vector<128xf32> to vector<1x128xf32>
    %399 = arith.addf %381, %398 : vector<1x128xf32>
    %c0_221 = arith.constant 0 : index
    %c0_222 = arith.constant 0 : index
    %c2816 = arith.constant 2816 : index
    %400 = vector.load %arg3[%c0_221, %c0_222, %c2816] : memref<1x4x4096xf32, #tpu.memory_space<vmem>>, vector<1x4x128xf32>
    %401 = vector.shape_cast %400 : vector<1x4x128xf32> to vector<4x128xf32>
    %c0_223 = arith.constant 0 : index
    %c0_224 = arith.constant 0 : index
    %c2816_225 = arith.constant 2816 : index
    %402 = vector.load %arg4[%c0_223, %c0_224, %c2816_225] : memref<1x4x4096xf32, #tpu.memory_space<vmem>>, vector<1x4x128xf32>
    %403 = vector.shape_cast %402 : vector<1x4x128xf32> to vector<4x128xf32>
    %404 = arith.subf %401, %403 : vector<4x128xf32>
    %c0_226 = arith.constant 0 : index
    %c0_227 = arith.constant 0 : index
    %c2816_228 = arith.constant 2816 : index
    %405 = vector.load %arg5[%c0_226, %c0_227, %c2816_228] : memref<1x1x4096xf32, #tpu.memory_space<vmem>>, vector<1x1x128xf32>
    %406 = vector.shape_cast %405 : vector<1x1x128xf32> to vector<1x128xf32>
    %407 = arith.negf %406 : vector<1x128xf32>
    %408 = math.exp %407 : vector<1x128xf32>
    %cst_229 = arith.constant 1.000000e+00 : f32
    %409 = vector.broadcast %cst_229 : f32 to vector<1x128xf32>
    %410 = arith.addf %409, %408 : vector<1x128xf32>
    %411 = arith.divf %409, %410 : vector<1x128xf32>
    %412 = vector.broadcast %411 : vector<1x128xf32> to vector<4x128xf32>
    %413 = arith.mulf %404, %412 : vector<4x128xf32>
    %414 = arith.mulf %413, %413 : vector<4x128xf32>
    %cst_230 = arith.constant dense<0.000000e+00> : vector<128xf32>
    %415 = vector.multi_reduction <add>, %414, %cst_230 [0] : vector<4x128xf32> to vector<128xf32>
    %416 = vector.shape_cast %415 : vector<128xf32> to vector<1x128xf32>
    %417 = arith.addf %399, %416 : vector<1x128xf32>
    %c0_231 = arith.constant 0 : index
    %c0_232 = arith.constant 0 : index
    %c2944 = arith.constant 2944 : index
    %418 = vector.load %arg3[%c0_231, %c0_232, %c2944] : memref<1x4x4096xf32, #tpu.memory_space<vmem>>, vector<1x4x128xf32>
    %419 = vector.shape_cast %418 : vector<1x4x128xf32> to vector<4x128xf32>
    %c0_233 = arith.constant 0 : index
    %c0_234 = arith.constant 0 : index
    %c2944_235 = arith.constant 2944 : index
    %420 = vector.load %arg4[%c0_233, %c0_234, %c2944_235] : memref<1x4x4096xf32, #tpu.memory_space<vmem>>, vector<1x4x128xf32>
    %421 = vector.shape_cast %420 : vector<1x4x128xf32> to vector<4x128xf32>
    %422 = arith.subf %419, %421 : vector<4x128xf32>
    %c0_236 = arith.constant 0 : index
    %c0_237 = arith.constant 0 : index
    %c2944_238 = arith.constant 2944 : index
    %423 = vector.load %arg5[%c0_236, %c0_237, %c2944_238] : memref<1x1x4096xf32, #tpu.memory_space<vmem>>, vector<1x1x128xf32>
    %424 = vector.shape_cast %423 : vector<1x1x128xf32> to vector<1x128xf32>
    %425 = arith.negf %424 : vector<1x128xf32>
    %426 = math.exp %425 : vector<1x128xf32>
    %cst_239 = arith.constant 1.000000e+00 : f32
    %427 = vector.broadcast %cst_239 : f32 to vector<1x128xf32>
    %428 = arith.addf %427, %426 : vector<1x128xf32>
    %429 = arith.divf %427, %428 : vector<1x128xf32>
    %430 = vector.broadcast %429 : vector<1x128xf32> to vector<4x128xf32>
    %431 = arith.mulf %422, %430 : vector<4x128xf32>
    %432 = arith.mulf %431, %431 : vector<4x128xf32>
    %cst_240 = arith.constant dense<0.000000e+00> : vector<128xf32>
    %433 = vector.multi_reduction <add>, %432, %cst_240 [0] : vector<4x128xf32> to vector<128xf32>
    %434 = vector.shape_cast %433 : vector<128xf32> to vector<1x128xf32>
    %435 = arith.addf %417, %434 : vector<1x128xf32>
    %c0_241 = arith.constant 0 : index
    %c0_242 = arith.constant 0 : index
    %c3072 = arith.constant 3072 : index
    %436 = vector.load %arg3[%c0_241, %c0_242, %c3072] : memref<1x4x4096xf32, #tpu.memory_space<vmem>>, vector<1x4x128xf32>
    %437 = vector.shape_cast %436 : vector<1x4x128xf32> to vector<4x128xf32>
    %c0_243 = arith.constant 0 : index
    %c0_244 = arith.constant 0 : index
    %c3072_245 = arith.constant 3072 : index
    %438 = vector.load %arg4[%c0_243, %c0_244, %c3072_245] : memref<1x4x4096xf32, #tpu.memory_space<vmem>>, vector<1x4x128xf32>
    %439 = vector.shape_cast %438 : vector<1x4x128xf32> to vector<4x128xf32>
    %440 = arith.subf %437, %439 : vector<4x128xf32>
    %c0_246 = arith.constant 0 : index
    %c0_247 = arith.constant 0 : index
    %c3072_248 = arith.constant 3072 : index
    %441 = vector.load %arg5[%c0_246, %c0_247, %c3072_248] : memref<1x1x4096xf32, #tpu.memory_space<vmem>>, vector<1x1x128xf32>
    %442 = vector.shape_cast %441 : vector<1x1x128xf32> to vector<1x128xf32>
    %443 = arith.negf %442 : vector<1x128xf32>
    %444 = math.exp %443 : vector<1x128xf32>
    %cst_249 = arith.constant 1.000000e+00 : f32
    %445 = vector.broadcast %cst_249 : f32 to vector<1x128xf32>
    %446 = arith.addf %445, %444 : vector<1x128xf32>
    %447 = arith.divf %445, %446 : vector<1x128xf32>
    %448 = vector.broadcast %447 : vector<1x128xf32> to vector<4x128xf32>
    %449 = arith.mulf %440, %448 : vector<4x128xf32>
    %450 = arith.mulf %449, %449 : vector<4x128xf32>
    %cst_250 = arith.constant dense<0.000000e+00> : vector<128xf32>
    %451 = vector.multi_reduction <add>, %450, %cst_250 [0] : vector<4x128xf32> to vector<128xf32>
    %452 = vector.shape_cast %451 : vector<128xf32> to vector<1x128xf32>
    %453 = arith.addf %435, %452 : vector<1x128xf32>
    %c0_251 = arith.constant 0 : index
    %c0_252 = arith.constant 0 : index
    %c3200 = arith.constant 3200 : index
    %454 = vector.load %arg3[%c0_251, %c0_252, %c3200] : memref<1x4x4096xf32, #tpu.memory_space<vmem>>, vector<1x4x128xf32>
    %455 = vector.shape_cast %454 : vector<1x4x128xf32> to vector<4x128xf32>
    %c0_253 = arith.constant 0 : index
    %c0_254 = arith.constant 0 : index
    %c3200_255 = arith.constant 3200 : index
    %456 = vector.load %arg4[%c0_253, %c0_254, %c3200_255] : memref<1x4x4096xf32, #tpu.memory_space<vmem>>, vector<1x4x128xf32>
    %457 = vector.shape_cast %456 : vector<1x4x128xf32> to vector<4x128xf32>
    %458 = arith.subf %455, %457 : vector<4x128xf32>
    %c0_256 = arith.constant 0 : index
    %c0_257 = arith.constant 0 : index
    %c3200_258 = arith.constant 3200 : index
    %459 = vector.load %arg5[%c0_256, %c0_257, %c3200_258] : memref<1x1x4096xf32, #tpu.memory_space<vmem>>, vector<1x1x128xf32>
    %460 = vector.shape_cast %459 : vector<1x1x128xf32> to vector<1x128xf32>
    %461 = arith.negf %460 : vector<1x128xf32>
    %462 = math.exp %461 : vector<1x128xf32>
    %cst_259 = arith.constant 1.000000e+00 : f32
    %463 = vector.broadcast %cst_259 : f32 to vector<1x128xf32>
    %464 = arith.addf %463, %462 : vector<1x128xf32>
    %465 = arith.divf %463, %464 : vector<1x128xf32>
    %466 = vector.broadcast %465 : vector<1x128xf32> to vector<4x128xf32>
    %467 = arith.mulf %458, %466 : vector<4x128xf32>
    %468 = arith.mulf %467, %467 : vector<4x128xf32>
    %cst_260 = arith.constant dense<0.000000e+00> : vector<128xf32>
    %469 = vector.multi_reduction <add>, %468, %cst_260 [0] : vector<4x128xf32> to vector<128xf32>
    %470 = vector.shape_cast %469 : vector<128xf32> to vector<1x128xf32>
    %471 = arith.addf %453, %470 : vector<1x128xf32>
    %c0_261 = arith.constant 0 : index
    %c0_262 = arith.constant 0 : index
    %c3328 = arith.constant 3328 : index
    %472 = vector.load %arg3[%c0_261, %c0_262, %c3328] : memref<1x4x4096xf32, #tpu.memory_space<vmem>>, vector<1x4x128xf32>
    %473 = vector.shape_cast %472 : vector<1x4x128xf32> to vector<4x128xf32>
    %c0_263 = arith.constant 0 : index
    %c0_264 = arith.constant 0 : index
    %c3328_265 = arith.constant 3328 : index
    %474 = vector.load %arg4[%c0_263, %c0_264, %c3328_265] : memref<1x4x4096xf32, #tpu.memory_space<vmem>>, vector<1x4x128xf32>
    %475 = vector.shape_cast %474 : vector<1x4x128xf32> to vector<4x128xf32>
    %476 = arith.subf %473, %475 : vector<4x128xf32>
    %c0_266 = arith.constant 0 : index
    %c0_267 = arith.constant 0 : index
    %c3328_268 = arith.constant 3328 : index
    %477 = vector.load %arg5[%c0_266, %c0_267, %c3328_268] : memref<1x1x4096xf32, #tpu.memory_space<vmem>>, vector<1x1x128xf32>
    %478 = vector.shape_cast %477 : vector<1x1x128xf32> to vector<1x128xf32>
    %479 = arith.negf %478 : vector<1x128xf32>
    %480 = math.exp %479 : vector<1x128xf32>
    %cst_269 = arith.constant 1.000000e+00 : f32
    %481 = vector.broadcast %cst_269 : f32 to vector<1x128xf32>
    %482 = arith.addf %481, %480 : vector<1x128xf32>
    %483 = arith.divf %481, %482 : vector<1x128xf32>
    %484 = vector.broadcast %483 : vector<1x128xf32> to vector<4x128xf32>
    %485 = arith.mulf %476, %484 : vector<4x128xf32>
    %486 = arith.mulf %485, %485 : vector<4x128xf32>
    %cst_270 = arith.constant dense<0.000000e+00> : vector<128xf32>
    %487 = vector.multi_reduction <add>, %486, %cst_270 [0] : vector<4x128xf32> to vector<128xf32>
    %488 = vector.shape_cast %487 : vector<128xf32> to vector<1x128xf32>
    %489 = arith.addf %471, %488 : vector<1x128xf32>
    %c0_271 = arith.constant 0 : index
    %c0_272 = arith.constant 0 : index
    %c3456 = arith.constant 3456 : index
    %490 = vector.load %arg3[%c0_271, %c0_272, %c3456] : memref<1x4x4096xf32, #tpu.memory_space<vmem>>, vector<1x4x128xf32>
    %491 = vector.shape_cast %490 : vector<1x4x128xf32> to vector<4x128xf32>
    %c0_273 = arith.constant 0 : index
    %c0_274 = arith.constant 0 : index
    %c3456_275 = arith.constant 3456 : index
    %492 = vector.load %arg4[%c0_273, %c0_274, %c3456_275] : memref<1x4x4096xf32, #tpu.memory_space<vmem>>, vector<1x4x128xf32>
    %493 = vector.shape_cast %492 : vector<1x4x128xf32> to vector<4x128xf32>
    %494 = arith.subf %491, %493 : vector<4x128xf32>
    %c0_276 = arith.constant 0 : index
    %c0_277 = arith.constant 0 : index
    %c3456_278 = arith.constant 3456 : index
    %495 = vector.load %arg5[%c0_276, %c0_277, %c3456_278] : memref<1x1x4096xf32, #tpu.memory_space<vmem>>, vector<1x1x128xf32>
    %496 = vector.shape_cast %495 : vector<1x1x128xf32> to vector<1x128xf32>
    %497 = arith.negf %496 : vector<1x128xf32>
    %498 = math.exp %497 : vector<1x128xf32>
    %cst_279 = arith.constant 1.000000e+00 : f32
    %499 = vector.broadcast %cst_279 : f32 to vector<1x128xf32>
    %500 = arith.addf %499, %498 : vector<1x128xf32>
    %501 = arith.divf %499, %500 : vector<1x128xf32>
    %502 = vector.broadcast %501 : vector<1x128xf32> to vector<4x128xf32>
    %503 = arith.mulf %494, %502 : vector<4x128xf32>
    %504 = arith.mulf %503, %503 : vector<4x128xf32>
    %cst_280 = arith.constant dense<0.000000e+00> : vector<128xf32>
    %505 = vector.multi_reduction <add>, %504, %cst_280 [0] : vector<4x128xf32> to vector<128xf32>
    %506 = vector.shape_cast %505 : vector<128xf32> to vector<1x128xf32>
    %507 = arith.addf %489, %506 : vector<1x128xf32>
    %c0_281 = arith.constant 0 : index
    %c0_282 = arith.constant 0 : index
    %c3584 = arith.constant 3584 : index
    %508 = vector.load %arg3[%c0_281, %c0_282, %c3584] : memref<1x4x4096xf32, #tpu.memory_space<vmem>>, vector<1x4x128xf32>
    %509 = vector.shape_cast %508 : vector<1x4x128xf32> to vector<4x128xf32>
    %c0_283 = arith.constant 0 : index
    %c0_284 = arith.constant 0 : index
    %c3584_285 = arith.constant 3584 : index
    %510 = vector.load %arg4[%c0_283, %c0_284, %c3584_285] : memref<1x4x4096xf32, #tpu.memory_space<vmem>>, vector<1x4x128xf32>
    %511 = vector.shape_cast %510 : vector<1x4x128xf32> to vector<4x128xf32>
    %512 = arith.subf %509, %511 : vector<4x128xf32>
    %c0_286 = arith.constant 0 : index
    %c0_287 = arith.constant 0 : index
    %c3584_288 = arith.constant 3584 : index
    %513 = vector.load %arg5[%c0_286, %c0_287, %c3584_288] : memref<1x1x4096xf32, #tpu.memory_space<vmem>>, vector<1x1x128xf32>
    %514 = vector.shape_cast %513 : vector<1x1x128xf32> to vector<1x128xf32>
    %515 = arith.negf %514 : vector<1x128xf32>
    %516 = math.exp %515 : vector<1x128xf32>
    %cst_289 = arith.constant 1.000000e+00 : f32
    %517 = vector.broadcast %cst_289 : f32 to vector<1x128xf32>
    %518 = arith.addf %517, %516 : vector<1x128xf32>
    %519 = arith.divf %517, %518 : vector<1x128xf32>
    %520 = vector.broadcast %519 : vector<1x128xf32> to vector<4x128xf32>
    %521 = arith.mulf %512, %520 : vector<4x128xf32>
    %522 = arith.mulf %521, %521 : vector<4x128xf32>
    %cst_290 = arith.constant dense<0.000000e+00> : vector<128xf32>
    %523 = vector.multi_reduction <add>, %522, %cst_290 [0] : vector<4x128xf32> to vector<128xf32>
    %524 = vector.shape_cast %523 : vector<128xf32> to vector<1x128xf32>
    %525 = arith.addf %507, %524 : vector<1x128xf32>
    %c0_291 = arith.constant 0 : index
    %c0_292 = arith.constant 0 : index
    %c3712 = arith.constant 3712 : index
    %526 = vector.load %arg3[%c0_291, %c0_292, %c3712] : memref<1x4x4096xf32, #tpu.memory_space<vmem>>, vector<1x4x128xf32>
    %527 = vector.shape_cast %526 : vector<1x4x128xf32> to vector<4x128xf32>
    %c0_293 = arith.constant 0 : index
    %c0_294 = arith.constant 0 : index
    %c3712_295 = arith.constant 3712 : index
    %528 = vector.load %arg4[%c0_293, %c0_294, %c3712_295] : memref<1x4x4096xf32, #tpu.memory_space<vmem>>, vector<1x4x128xf32>
    %529 = vector.shape_cast %528 : vector<1x4x128xf32> to vector<4x128xf32>
    %530 = arith.subf %527, %529 : vector<4x128xf32>
    %c0_296 = arith.constant 0 : index
    %c0_297 = arith.constant 0 : index
    %c3712_298 = arith.constant 3712 : index
    %531 = vector.load %arg5[%c0_296, %c0_297, %c3712_298] : memref<1x1x4096xf32, #tpu.memory_space<vmem>>, vector<1x1x128xf32>
    %532 = vector.shape_cast %531 : vector<1x1x128xf32> to vector<1x128xf32>
    %533 = arith.negf %532 : vector<1x128xf32>
    %534 = math.exp %533 : vector<1x128xf32>
    %cst_299 = arith.constant 1.000000e+00 : f32
    %535 = vector.broadcast %cst_299 : f32 to vector<1x128xf32>
    %536 = arith.addf %535, %534 : vector<1x128xf32>
    %537 = arith.divf %535, %536 : vector<1x128xf32>
    %538 = vector.broadcast %537 : vector<1x128xf32> to vector<4x128xf32>
    %539 = arith.mulf %530, %538 : vector<4x128xf32>
    %540 = arith.mulf %539, %539 : vector<4x128xf32>
    %cst_300 = arith.constant dense<0.000000e+00> : vector<128xf32>
    %541 = vector.multi_reduction <add>, %540, %cst_300 [0] : vector<4x128xf32> to vector<128xf32>
    %542 = vector.shape_cast %541 : vector<128xf32> to vector<1x128xf32>
    %543 = arith.addf %525, %542 : vector<1x128xf32>
    %c0_301 = arith.constant 0 : index
    %c0_302 = arith.constant 0 : index
    %c3840 = arith.constant 3840 : index
    %544 = vector.load %arg3[%c0_301, %c0_302, %c3840] : memref<1x4x4096xf32, #tpu.memory_space<vmem>>, vector<1x4x128xf32>
    %545 = vector.shape_cast %544 : vector<1x4x128xf32> to vector<4x128xf32>
    %c0_303 = arith.constant 0 : index
    %c0_304 = arith.constant 0 : index
    %c3840_305 = arith.constant 3840 : index
    %546 = vector.load %arg4[%c0_303, %c0_304, %c3840_305] : memref<1x4x4096xf32, #tpu.memory_space<vmem>>, vector<1x4x128xf32>
    %547 = vector.shape_cast %546 : vector<1x4x128xf32> to vector<4x128xf32>
    %548 = arith.subf %545, %547 : vector<4x128xf32>
    %c0_306 = arith.constant 0 : index
    %c0_307 = arith.constant 0 : index
    %c3840_308 = arith.constant 3840 : index
    %549 = vector.load %arg5[%c0_306, %c0_307, %c3840_308] : memref<1x1x4096xf32, #tpu.memory_space<vmem>>, vector<1x1x128xf32>
    %550 = vector.shape_cast %549 : vector<1x1x128xf32> to vector<1x128xf32>
    %551 = arith.negf %550 : vector<1x128xf32>
    %552 = math.exp %551 : vector<1x128xf32>
    %cst_309 = arith.constant 1.000000e+00 : f32
    %553 = vector.broadcast %cst_309 : f32 to vector<1x128xf32>
    %554 = arith.addf %553, %552 : vector<1x128xf32>
    %555 = arith.divf %553, %554 : vector<1x128xf32>
    %556 = vector.broadcast %555 : vector<1x128xf32> to vector<4x128xf32>
    %557 = arith.mulf %548, %556 : vector<4x128xf32>
    %558 = arith.mulf %557, %557 : vector<4x128xf32>
    %cst_310 = arith.constant dense<0.000000e+00> : vector<128xf32>
    %559 = vector.multi_reduction <add>, %558, %cst_310 [0] : vector<4x128xf32> to vector<128xf32>
    %560 = vector.shape_cast %559 : vector<128xf32> to vector<1x128xf32>
    %561 = arith.addf %543, %560 : vector<1x128xf32>
    %c0_311 = arith.constant 0 : index
    %c0_312 = arith.constant 0 : index
    %c3968 = arith.constant 3968 : index
    %562 = vector.load %arg3[%c0_311, %c0_312, %c3968] : memref<1x4x4096xf32, #tpu.memory_space<vmem>>, vector<1x4x128xf32>
    %563 = vector.shape_cast %562 : vector<1x4x128xf32> to vector<4x128xf32>
    %c0_313 = arith.constant 0 : index
    %c0_314 = arith.constant 0 : index
    %c3968_315 = arith.constant 3968 : index
    %564 = vector.load %arg4[%c0_313, %c0_314, %c3968_315] : memref<1x4x4096xf32, #tpu.memory_space<vmem>>, vector<1x4x128xf32>
    %565 = vector.shape_cast %564 : vector<1x4x128xf32> to vector<4x128xf32>
    %566 = arith.subf %563, %565 : vector<4x128xf32>
    %c0_316 = arith.constant 0 : index
    %c0_317 = arith.constant 0 : index
    %c3968_318 = arith.constant 3968 : index
    %567 = vector.load %arg5[%c0_316, %c0_317, %c3968_318] : memref<1x1x4096xf32, #tpu.memory_space<vmem>>, vector<1x1x128xf32>
    %568 = vector.shape_cast %567 : vector<1x1x128xf32> to vector<1x128xf32>
    %569 = arith.negf %568 : vector<1x128xf32>
    %570 = math.exp %569 : vector<1x128xf32>
    %cst_319 = arith.constant 1.000000e+00 : f32
    %571 = vector.broadcast %cst_319 : f32 to vector<1x128xf32>
    %572 = arith.addf %571, %570 : vector<1x128xf32>
    %573 = arith.divf %571, %572 : vector<1x128xf32>
    %574 = vector.broadcast %573 : vector<1x128xf32> to vector<4x128xf32>
    %575 = arith.mulf %566, %574 : vector<4x128xf32>
    %576 = arith.mulf %575, %575 : vector<4x128xf32>
    %cst_320 = arith.constant dense<0.000000e+00> : vector<128xf32>
    %577 = vector.multi_reduction <add>, %576, %cst_320 [0] : vector<4x128xf32> to vector<128xf32>
    %578 = vector.shape_cast %577 : vector<128xf32> to vector<1x128xf32>
    %579 = arith.addf %561, %578 : vector<1x128xf32>
    %c0_321 = arith.constant 0 : index
    %c0_322 = arith.constant 0 : index
    %580 = vector.load %arg7[%c0_321, %c0_322] : memref<1x128xf32, #tpu.memory_space<vmem>>, vector<1x128xf32>
    %581 = arith.addf %580, %579 : vector<1x128xf32>
    %c0_323 = arith.constant 0 : index
    %c0_324 = arith.constant 0 : index
    %582 = vector.load %arg7[%c0_323, %c0_324] : memref<1x128xf32, #tpu.memory_space<vmem>>, vector<1x128xf32>
    tpu.vector_store %arg7[%c0_323, %c0_324], %581 {strides = array<i32>} : memref<1x128xf32, #tpu.memory_space<vmem>>, vector<1x128xf32>,
    %c0_i32_325 = arith.constant 0 : i32
    %583 = arith.cmpi eq, %arg2, %c0_i32_325 : i32
    %584 = arith.extui %583 : i1 to i32
    %c0_i32_326 = arith.constant 0 : i32
    %585 = arith.cmpi ne, %584, %c0_i32_326 : i32
    scf.if %585 {
      %c0_327 = arith.constant 0 : index
      %c0_328 = arith.constant 0 : index
      %586 = vector.load %arg7[%c0_327, %c0_328] : memref<1x128xf32, #tpu.memory_space<vmem>>, vector<1x128xf32>
      %c0_329 = arith.constant 0 : index
      %c0_330 = arith.constant 0 : index
      %c0_331 = arith.constant 0 : index
      %587 = vector.load %arg6[%c0_329, %c0_330, %c0_331] : memref<1x1x128xf32, #tpu.memory_space<vmem>>, vector<1x1x128xf32>
      %588 = vector.shape_cast %587 : vector<1x1x128xf32> to vector<1x128xf32>
      %589 = vector.shape_cast %586 : vector<1x128xf32> to vector<1x1x128xf32>
      tpu.vector_store %arg6[%c0_329, %c0_330, %c0_331], %589 {strides = array<i32>} : memref<1x1x128xf32, #tpu.memory_space<vmem>>, vector<1x1x128xf32>,
    } else {
    }
    return
  }
  func.func @transform_0(%arg0: i32, %arg1: i32, %arg2: i32) -> (i32, i32, i32) {
    %c1_i32 = arith.constant 1 : i32
    %0 = arith.muli %arg1, %c1_i32 : i32
    %1 = arith.addi %0, %arg2 : i32
    %c0_i32 = arith.constant 0 : i32
    %c0_i32_0 = arith.constant 0 : i32
    return %arg0, %c0_i32, %1 : i32, i32, i32
  }
  func.func @transform_1(%arg0: i32, %arg1: i32, %arg2: i32) -> (i32, i32, i32) {
    %c1_i32 = arith.constant 1 : i32
    %0 = arith.muli %arg1, %c1_i32 : i32
    %1 = arith.addi %0, %arg2 : i32
    %c0_i32 = arith.constant 0 : i32
    %c0_i32_0 = arith.constant 0 : i32
    return %arg0, %c0_i32, %1 : i32, i32, i32
  }
  func.func @transform_2(%arg0: i32, %arg1: i32, %arg2: i32) -> (i32, i32, i32) {
    %c1_i32 = arith.constant 1 : i32
    %0 = arith.muli %arg1, %c1_i32 : i32
    %1 = arith.addi %0, %arg2 : i32
    %c0_i32 = arith.constant 0 : i32
    %c0_i32_0 = arith.constant 0 : i32
    return %arg0, %c0_i32, %1 : i32, i32, i32
  }
  func.func @transform_3(%arg0: i32, %arg1: i32, %arg2: i32) -> (i32, i32, i32) {
    %c1_i32 = arith.constant 1 : i32
    %0 = arith.muli %arg0, %c1_i32 : i32
    %1 = arith.addi %0, %arg1 : i32
    %c0_i32 = arith.constant 0 : i32
    %c0_i32_0 = arith.constant 0 : i32
    %c0_i32_1 = arith.constant 0 : i32
    return %1, %c0_i32, %c0_i32_0 : i32, i32, i32
  }
}

</mosaic_0001>

<bundles_post_ra>
// kernel: t_perceptual_loss.3
= control target key start
LH: loop header
LB: loop body
LE: loop exit
PB: predicated region body
PF: predicated region fallthrough
CT: control target
= control target key end

     0   :  { %s555_s12 = smov 0   ;;  %s557_s13 = smov 0   ;;  %s599_s0 = inlined_call_operand.vmem [shape: f32[2,8,256], index: 0, kind: input, shape index: {}]   ;;  %s600_s1 = inlined_call_operand.vmem [shape: f32[2,8,256], index: 1, kind: input, shape index: {}]   ;;  %s601_s2 = inlined_call_operand.vmem [shape: f32[2,1,256], index: 2, kind: input, shape index: {}]   ;;  %s602_s3 = inlined_call_operand.vmem [shape: f32[2,1,128], index: 3, kind: output, shape index: {}]  }
   0x1   :  { %s559_s14 = smov 0  }
   0x2 LB: > { %s32_s15 = sadd.s32 1, %s528_s13  ;;  %p465_p0 = scmp.ge.s32.totalorder %s532_s14, 1  ;;  %s532_s14 = sphi %s559_s14, %s13_s14   ;;  %s528_s13 = sphi %s557_s13, %s604_s13   ;;  %s524_s12 = sphi %s555_s12, %s603_s12  }
   0x3   : > { %p34_p1 = scmp.ge.s32.totalorder %s32_s15, 2  ;;  %p210_p2 = scmp.lt.s32.totalorder %s532_s14, 3 }
   0x5   : > { %s606_s15 = smov (%p34_p1, %s32_s15), 0  ;;  %p211_p3 = pnand %p465_p0, %p210_p2 }
   0x6   : > { %p259_p4 = scmp.lt.s32.totalorder (!%p211_p3), %s524_s12, 1  ;;  %v534_v0 = vmov (!%p211_p3), 0.0   ;;  %v313_v8 = vlaneseq (!%p211_p3) }
   0x7   : > { %214 = sbr.rel (%p211_p3) target bundleno = 76 (0x4c), region = 32  ;;  %301 = vst [vmem:[#allocation2] sm:$0x1] (!%p211_p3), %v534_v0 }
   0x8   : > { %v314_v10 = vshrl.u32 (!%p211_p3), %v313_v8, 7 }
   0xa   : > { %v315_v13 = vsub.s32 (!%p211_p3), 0, %v314_v10 }
   0xe   : > { %s608_s12 = smov (!%p259_p4, %s524_s12), 1  ;;  %v352_v38 = vld [vmem:[#allocation2] sm:$0x1] }
   0xf   : > { %s470_s16 = sshll.u32 %s608_s12, 1  ;;  %s475_s20 = sshll.u32 %s608_s12, 4 }
  0x10   : > { %s289_s19 = scalar_lea.vmem %s601_s2, %s470_s16  ;;  %s266_s23 = scalar_lea.vmem %s599_s0, %s475_s20 }
  0x11   : > { %v305_v1 = vld [vmem:[%s289_s19] sm:$0x1]  ;;  %v330_v2 = vld [vmem:[%s289_s19 + $0x1] sm:$0x1]  ;;  %s278_s26 = scalar_lea.vmem %s600_s1, %s475_s20  ;;  %v327_v14 = vld [vmem:[%s266_s23 + $0x8] sm:$0xff]  ;;  %s295_s29 = scalar_lea.vmem %s602_s3, %s608_s12 }
  0x12   : > { %v471_v3 = vmul.f32 -1.442695, %v305_v1  ;;  %v472_v4 = vmul.f32 -1.442695, %v330_v2  ;;  %v302_v11 = vld [vmem:[%s266_s23] sm:$0xff]  ;;  %v328_v15 = vld [vmem:[%s278_s26 + $0x8] sm:$0xff] }
  0x13   : > { %v303_v12 = vld [vmem:[%s278_s26] sm:$0xff]  ;;  %v329_v18 = vsub.f32 %v327_v14, %v328_v15 }
  0x14   : > { %502 = vpow2.f32 %v471_v3  ;;  %v304_v16 = vsub.f32 %v302_v11, %v303_v12 }
  0x15   : > { %504 = vpow2.f32 %v472_v4 }
  0x1e   : > { %v503_v5 = vpop.eup %502 }
  0x1f   : > { %v505_v6 = vpop.eup %504  ;;  %v309_v7 = vadd.f32 1.0, %v503_v5 }
  0x20   : > { %v334_v9 = vadd.f32 1.0, %v505_v6 }
  0x21   : > { %506 = vrcp.f32 %v309_v7 }
  0x22   : > { %508 = vrcp.f32 %v334_v9 }
  0x2b   : > { %v507_v17 = vpop.eup %506 }
  0x2c   : > { %v509_v19 = vpop.eup %508  ;;  %v316_v20 = vrot.slane %v507_v17, %v315_v13 }
  0x2d   : > { %v341_v21 = vrot.slane %v509_v19, %v315_v13 }
  0x2e   : > { %v318_v22 = vmul.f32 %v316_v20, %v304_v16 }
  0x2f   : > { %v343_v23 = vmul.f32 %v341_v21, %v329_v18 }
  0x30   : > { %v319_v24 = vmul.f32 %v318_v22, %v318_v22 }
  0x31   : > { %v344_v25 = vmul.f32 %v343_v23, %v343_v23 }
  0x32   : > { %v320_v26 = vrot.slane %v319_v24, 4 }
  0x33   : > { %v345_v27 = vrot.slane %v344_v25, 4 }
  0x34   : > { %v321_v28 = vadd.f32 %v320_v26, %v319_v24 }
  0x35   : > { %v346_v29 = vadd.f32 %v345_v27, %v344_v25 }
  0x36   : > { %v322_v30 = vrot.slane %v321_v28, 2 }
  0x37   : > { %v347_v31 = vrot.slane %v346_v29, 2 }
  0x38   : > { %v323_v32 = vadd.f32 %v322_v30, %v321_v28 }
  0x39   : > { %v348_v33 = vadd.f32 %v347_v31, %v346_v29 }
  0x3a   : > { %v324_v34 = vrot.slane %v323_v32, 1 }
  0x3b   : > { %v349_v35 = vrot.slane %v348_v33, 1 }
  0x3c   : > { %v325_v36 = vadd.f32 %v324_v34, %v323_v32 }
  0x3d   : > { %v350_v37 = vadd.f32 %v349_v35, %v348_v33 }
  0x3f   : > { %v351_v39 = vadd.f32 %v350_v37, %v325_v36 }
  0x41   : > { %v353_v40 = vadd.f32 %v352_v38, %v351_v39 }
  0x43   : > { %354 = vst [vmem:[#allocation2] sm:$0x1] %v353_v40 }
  0x4a   : > { %v358_v41 = vld [vmem:[#allocation2] sm:$0x1] }
  0x4b   : > { %359 = vst [vmem:[%s295_s29] sm:$0x1] %v358_v41 }
  0x4c PF: > { %s13_s14 = sadd.s32 1, %s532_s14   ;;  %s603_s12 = smov %s528_s13 }
  0x4d   : > { %p10_p5 = scmp.ge.s32.totalorder %s13_s14, 4   ;;  %s604_s13 = smov %s606_s15 }
  0x4f   :  { %12 = sbr.rel (!%p10_p5) target bundleno = 2 (0x2), region = 76 }

// kernel: t_perceptual_loss.4
= control target key start
LH: loop header
LB: loop body
LE: loop exit
PB: predicated region body
PF: predicated region fallthrough
CT: control target
= control target key end

     0   :  { %s735_s12 = smov 0   ;;  %s737_s13 = smov 0   ;;  %s799_s0 = inlined_call_operand.vmem [shape: f32[2,8,1024], index: 0, kind: input, shape index: {}]   ;;  %s800_s1 = inlined_call_operand.vmem [shape: f32[2,8,1024], index: 1, kind: input, shape index: {}]   ;;  %s801_s2 = inlined_call_operand.vmem [shape: f32[2,1,1024], index: 2, kind: input, shape index: {}]   ;;  %s802_s3 = inlined_call_operand.vmem [shape: f32[2,1,128], index: 3, kind: output, shape index: {}]  }
   0x1   :  { %s739_s14 = smov 0  }
   0x2 LB: > { %s32_s15 = sadd.s32 1, %s708_s13  ;;  %p615_p0 = scmp.ge.s32.totalorder %s712_s14, 1  ;;  %s712_s14 = sphi %s739_s14, %s13_s14   ;;  %s708_s13 = sphi %s737_s13, %s804_s13   ;;  %s704_s12 = sphi %s735_s12, %s803_s12  }
   0x3   : > { %p34_p1 = scmp.ge.s32.totalorder %s32_s15, 2  ;;  %p210_p2 = scmp.lt.s32.totalorder %s712_s14, 3 }
   0x5   : > { %s806_s15 = smov (%p34_p1, %s32_s15), 0  ;;  %p211_p3 = pnand %p615_p0, %p210_p2 }
   0x6   : > { %p259_p4 = scmp.lt.s32.totalorder (!%p211_p3), %s704_s12, 1  ;;  %v714_v0 = vmov (!%p211_p3), 0.0   ;;  %v313_v21 = vlaneseq (!%p211_p3) }
   0x7   : > { %214 = sbr.rel (%p211_p3) target bundleno = 88 (0x58), region = 32  ;;  %301 = vst [vmem:[#allocation2] sm:$0x1] (!%p211_p3), %v714_v0 }
   0x8   : > { %v314_v30 = vshrl.u32 (!%p211_p3), %v313_v21, 7 }
   0xa   : > { %v315_v37 = vsub.s32 (!%p211_p3), 0, %v314_v30 }
   0xe   : > { %s808_s12 = smov (!%p259_p4, %s704_s12), 1 }
   0xf   : > { %s620_s16 = sshll.u32 %s808_s12, 3  ;;  %s631_s20 = sshll.u32 %s808_s12, 6 }
  0x10   : > { %s289_s19 = scalar_lea.vmem %s801_s2, %s620_s16  ;;  %s763_s23 = scalar_lea.vmem %s799_s0, %s631_s20 }
  0x11   : > { %v305_v1 = vld [vmem:[%s289_s19] sm:$0x1]  ;;  %v330_v2 = vld [vmem:[%s289_s19 + $0x1] sm:$0x1]  ;;  %v355_v5 = vld [vmem:[%s289_s19 + $0x2] sm:$0x1]  ;;  %s768_s26 = scalar_lea.vmem %s800_s1, %s631_s20  ;;  %s295_s29 = scalar_lea.vmem %s802_s3, %s808_s12 }
  0x12   : > { %v621_v3 = vmul.f32 -1.442695, %v305_v1  ;;  %v622_v4 = vmul.f32 -1.442695, %v330_v2  ;;  %v623_v6 = vmul.f32 -1.442695, %v355_v5 }
  0x13   : > { %v380_v7 = vld [vmem:[%s289_s19 + $0x3] sm:$0x1]  ;;  %v405_v9 = vld [vmem:[%s289_s19 + $0x4] sm:$0x1]  ;;  %v430_v11 = vld [vmem:[%s289_s19 + $0x5] sm:$0x1] }
  0x14   : > { %658 = vpow2.f32 %v621_v3  ;;  %v624_v8 = vmul.f32 -1.442695, %v380_v7  ;;  %v625_v10 = vmul.f32 -1.442695, %v405_v9  ;;  %v626_v12 = vmul.f32 -1.442695, %v430_v11 }
  0x15   : > { %660 = vpow2.f32 %v622_v4  ;;  %v455_v13 = vld [vmem:[%s289_s19 + $0x6] sm:$0x1]  ;;  %v480_v15 = vld [vmem:[%s289_s19 + $0x7] sm:$0x1]  ;;  %v327_v38 = vld [vmem:[%s763_s23 + $0x8] sm:$0xff] }
  0x16   : > { %662 = vpow2.f32 %v623_v6  ;;  %v627_v14 = vmul.f32 -1.442695, %v455_v13  ;;  %v628_v16 = vmul.f32 -1.442695, %v480_v15  ;;  %v302_v35 = vld [vmem:[%s763_s23] sm:$0xff]  ;;  %v328_v39 = vld [vmem:[%s768_s26 + $0x8] sm:$0xff] }
  0x17   : > { %664 = vpow2.f32 %v624_v8  ;;  %v303_v36 = vld [vmem:[%s768_s26] sm:$0xff]  ;;  %v352_v40 = vld [vmem:[%s763_s23 + $0x10] sm:$0xff]  ;;  %v377_v43 = vld [vmem:[%s763_s23 + $0x18] sm:$0xff]  ;;  %v329_v46 = vsub.f32 %v327_v38, %v328_v39 }
  0x18   : > { %666 = vpow2.f32 %v625_v10  ;;  %v353_v41 = vld [vmem:[%s768_s26 + $0x10] sm:$0xff]  ;;  %v304_v42 = vsub.f32 %v302_v35, %v303_v36  ;;  %v378_v44 = vld [vmem:[%s768_s26 + $0x18] sm:$0xff]  ;;  %v402_v47 = vld [vmem:[%s763_s23 + $0x20] sm:$0xff] }
  0x19   : > { %668 = vpow2.f32 %v626_v12  ;;  %v403_v48 = vld [vmem:[%s768_s26 + $0x20] sm:$0xff]  ;;  %v354_v51 = vsub.f32 %v352_v40, %v353_v41  ;;  %v427_v52 = vld [vmem:[%s763_s23 + $0x28] sm:$0xff]  ;;  %v379_v56 = vsub.f32 %v377_v43, %v378_v44  ;;  %v452_v57 = vld [vmem:[%s763_s23 + $0x30] sm:$0xff] }
  0x1a   : > { %670 = vpow2.f32 %v627_v14  ;;  %v428_v53 = vld [vmem:[%s768_s26 + $0x28] sm:$0xff]  ;;  %v453_v58 = vld [vmem:[%s768_s26 + $0x30] sm:$0xff]  ;;  %v404_v62 = vsub.f32 %v402_v47, %v403_v48  ;;  %v477_v63 = vld [vmem:[%s763_s23 + $0x38] sm:$0xff] }
  0x1b   : > { %672 = vpow2.f32 %v628_v16  ;;  %v478_v0 = vld [vmem:[%s768_s26 + $0x38] sm:$0xff]  ;;  %v429_v4 = vsub.f32 %v427_v52, %v428_v53  ;;  %v454_v9 = vsub.f32 %v452_v57, %v453_v58 }
  0x1c   : > { %v479_v14 = vsub.f32 %v477_v63, %v478_v0 }
  0x1e   : > { %v659_v17 = vpop.eup %658 }
  0x1f   : > { %v661_v18 = vpop.eup %660  ;;  %v309_v19 = vadd.f32 1.0, %v659_v17 }
  0x20   : > { %v663_v20 = vpop.eup %662  ;;  %v334_v22 = vadd.f32 1.0, %v661_v18 }
  0x21   : > { %v665_v23 = vpop.eup %664  ;;  %674 = vrcp.f32 %v309_v19  ;;  %v359_v24 = vadd.f32 1.0, %v663_v20 }
  0x22   : > { %v667_v25 = vpop.eup %666  ;;  %676 = vrcp.f32 %v334_v22  ;;  %v384_v26 = vadd.f32 1.0, %v665_v23 }
  0x23   : > { %v669_v27 = vpop.eup %668  ;;  %678 = vrcp.f32 %v359_v24  ;;  %v409_v28 = vadd.f32 1.0, %v667_v25 }
  0x24   : > { %v671_v29 = vpop.eup %670  ;;  %680 = vrcp.f32 %v384_v26  ;;  %v434_v31 = vadd.f32 1.0, %v669_v27 }
  0x25   : > { %v673_v32 = vpop.eup %672  ;;  %682 = vrcp.f32 %v409_v28  ;;  %v459_v33 = vadd.f32 1.0, %v671_v29 }
  0x26   : > { %684 = vrcp.f32 %v434_v31  ;;  %v484_v34 = vadd.f32 1.0, %v673_v32 }
  0x27   : > { %686 = vrcp.f32 %v459_v33 }
  0x28   : > { %688 = vrcp.f32 %v484_v34 }
  0x2b   : > { %v675_v45 = vpop.eup %674 }
  0x2c   : > { %v677_v49 = vpop.eup %676  ;;  %v316_v50 = vrot.slane %v675_v45, %v315_v37 }
  0x2d   : > { %v679_v54 = vpop.eup %678  ;;  %v341_v55 = vrot.slane %v677_v49, %v315_v37 }
  0x2e   : > { %v681_v59 = vpop.eup %680  ;;  %v318_v60 = vmul.f32 %v316_v50, %v304_v42  ;;  %v366_v61 = vrot.slane %v679_v54, %v315_v37 }
  0x2f   : > { %v683_v1 = vpop.eup %682  ;;  %v343_v2 = vmul.f32 %v341_v55, %v329_v46  ;;  %v391_v3 = vrot.slane %v681_v59, %v315_v37 }
  0x30   : > { %v685_v5 = vpop.eup %684  ;;  %v319_v6 = vmul.f32 %v318_v60, %v318_v60  ;;  %v368_v7 = vmul.f32 %v366_v61, %v354_v51  ;;  %v416_v8 = vrot.slane %v683_v1, %v315_v37 }
  0x31   : > { %v687_v10 = vpop.eup %686  ;;  %v344_v11 = vmul.f32 %v343_v2, %v343_v2  ;;  %v393_v12 = vmul.f32 %v391_v3, %v379_v56  ;;  %v441_v13 = vrot.slane %v685_v5, %v315_v37 }
  0x32   : > { %v689_v15 = vpop.eup %688  ;;  %v320_v16 = vrot.slane %v319_v6, 4  ;;  %v369_v17 = vmul.f32 %v368_v7, %v368_v7  ;;  %v418_v18 = vmul.f32 %v416_v8, %v404_v62  ;;  %v466_v19 = vrot.slane %v687_v10, %v315_v37 }
  0x33   : > { %v345_v20 = vrot.slane %v344_v11, 4  ;;  %v394_v21 = vmul.f32 %v393_v12, %v393_v12  ;;  %v443_v22 = vmul.f32 %v441_v13, %v429_v4  ;;  %v491_v23 = vrot.slane %v689_v15, %v315_v37 }
  0x34   : > { %v321_v24 = vadd.f32 %v320_v16, %v319_v6  ;;  %v370_v25 = vrot.slane %v369_v17, 4  ;;  %v419_v26 = vmul.f32 %v418_v18, %v418_v18  ;;  %v468_v27 = vmul.f32 %v466_v19, %v454_v9  ;;  %v502_v18 = vld [vmem:[#allocation2] sm:$0x1] }
  0x35   : > { %v346_v28 = vadd.f32 %v345_v20, %v344_v11  ;;  %v395_v29 = vrot.slane %v394_v21, 4  ;;  %v444_v30 = vmul.f32 %v443_v22, %v443_v22  ;;  %v493_v31 = vmul.f32 %v491_v23, %v479_v14 }
  0x36   : > { %v322_v32 = vrot.slane %v321_v24, 2  ;;  %v371_v33 = vadd.f32 %v370_v25, %v369_v17  ;;  %v420_v34 = vrot.slane %v419_v26, 4  ;;  %v469_v35 = vmul.f32 %v468_v27, %v468_v27 }
  0x37   : > { %v347_v36 = vrot.slane %v346_v28, 2  ;;  %v396_v38 = vadd.f32 %v395_v29, %v394_v21  ;;  %v445_v39 = vrot.slane %v444_v30, 4  ;;  %v494_v40 = vmul.f32 %v493_v31, %v493_v31 }
  0x38   : > { %v323_v41 = vadd.f32 %v322_v32, %v321_v24  ;;  %v372_v42 = vrot.slane %v371_v33, 2  ;;  %v421_v43 = vadd.f32 %v420_v34, %v419_v26  ;;  %v470_v37 = vrot.slane %v469_v35, 4 }
  0x39   : > { %v348_v44 = vadd.f32 %v347_v36, %v346_v28  ;;  %v397_v45 = vrot.slane %v396_v38, 2  ;;  %v446_v46 = vadd.f32 %v445_v39, %v444_v30  ;;  %v495_v47 = vrot.slane %v494_v40, 4 }
  0x3a   : > { %v324_v48 = vrot.slane %v323_v41, 1  ;;  %v373_v49 = vadd.f32 %v372_v42, %v371_v33  ;;  %v422_v50 = vrot.slane %v421_v43, 2  ;;  %v471_v51 = vadd.f32 %v470_v37, %v469_v35 }
  0x3b   : > { %v349_v52 = vrot.slane %v348_v44, 1  ;;  %v398_v53 = vadd.f32 %v397_v45, %v396_v38  ;;  %v447_v54 = vrot.slane %v446_v46, 2  ;;  %v496_v55 = vadd.f32 %v495_v47, %v494_v40 }
  0x3c   : > { %v325_v56 = vadd.f32 %v324_v48, %v323_v41  ;;  %v374_v57 = vrot.slane %v373_v49, 1  ;;  %v423_v58 = vadd.f32 %v422_v50, %v421_v43  ;;  %v472_v59 = vrot.slane %v471_v51, 2 }
  0x3d   : > { %v350_v60 = vadd.f32 %v349_v52, %v348_v44  ;;  %v399_v61 = vrot.slane %v398_v53, 1  ;;  %v448_v62 = vadd.f32 %v447_v54, %v446_v46  ;;  %v497_v63 = vrot.slane %v496_v55, 2 }
  0x3e   : > { %v375_v0 = vadd.f32 %v374_v57, %v373_v49  ;;  %v424_v1 = vrot.slane %v423_v58, 1  ;;  %v473_v2 = vadd.f32 %v472_v59, %v471_v51 }
  0x3f   : > { %v351_v3 = vadd.f32 %v350_v60, %v325_v56  ;;  %v400_v4 = vadd.f32 %v399_v61, %v398_v53  ;;  %v449_v5 = vrot.slane %v448_v62, 1  ;;  %v498_v6 = vadd.f32 %v497_v63, %v496_v55 }
  0x40   : > { %v425_v8 = vadd.f32 %v424_v1, %v423_v58  ;;  %v474_v9 = vrot.slane %v473_v2, 1 }
  0x41   : > { %v376_v7 = vadd.f32 %v375_v0, %v351_v3  ;;  %v450_v11 = vadd.f32 %v449_v5, %v448_v62  ;;  %v499_v12 = vrot.slane %v498_v6, 1 }
  0x42   : > { %v475_v14 = vadd.f32 %v474_v9, %v473_v2 }
  0x43   : > { %v401_v10 = vadd.f32 %v400_v4, %v376_v7  ;;  %v500_v16 = vadd.f32 %v499_v12, %v498_v6 }
  0x45   : > { %v426_v13 = vadd.f32 %v425_v8, %v401_v10 }
  0x47   : > { %v451_v15 = vadd.f32 %v450_v11, %v426_v13 }
  0x49   : > { %v476_v17 = vadd.f32 %v475_v14, %v451_v15 }
  0x4b   : > { %v501_v19 = vadd.f32 %v500_v16, %v476_v17 }
  0x4d   : > { %v503_v20 = vadd.f32 %v502_v18, %v501_v19 }
  0x4f   : > { %504 = vst [vmem:[#allocation2] sm:$0x1] %v503_v20 }
  0x56   : > { %v508_v21 = vld [vmem:[#allocation2] sm:$0x1] }
  0x57   : > { %509 = vst [vmem:[%s295_s29] sm:$0x1] %v508_v21 }
  0x58 PF: > { %s13_s14 = sadd.s32 1, %s712_s14   ;;  %s803_s12 = smov %s708_s13 }
  0x59   : > { %p10_p5 = scmp.ge.s32.totalorder %s13_s14, 4   ;;  %s804_s13 = smov %s806_s15 }
  0x5b   :  { %12 = sbr.rel (!%p10_p5) target bundleno = 2 (0x2), region = 76 }

// kernel: t_perceptual_loss.5
= control target key start
LH: loop header
LB: loop body
LE: loop exit
PB: predicated region body
PF: predicated region fallthrough
CT: control target
= control target key end

     0   :  { %s1488_s12 = smov 0   ;;  %s1490_s13 = smov 0   ;;  %s1949_s0 = inlined_call_operand.vmem [shape: f32[2,4,4096], index: 0, kind: input, shape index: {}]   ;;  %s1950_s1 = inlined_call_operand.vmem [shape: f32[2,4,4096], index: 1, kind: input, shape index: {}]   ;;  %s1951_s2 = inlined_call_operand.vmem [shape: f32[2,1,4096], index: 2, kind: input, shape index: {}]   ;;  %s1952_s3 = inlined_call_operand.vmem [shape: f32[2,1,128], index: 3, kind: output, shape index: {}]  }
   0x1   :  { %s1492_s14 = smov 0  }
   0x2 LB: > { %s32_s15 = sadd.s32 1, %s1461_s13  ;;  %p1248_p0 = scmp.ge.s32.totalorder %s1465_s14, 1  ;;  %s1465_s14 = sphi %s1492_s14, %s13_s14   ;;  %s1461_s13 = sphi %s1490_s13, %s1959_s13   ;;  %s1457_s12 = sphi %s1488_s12, %s1958_s12  }
   0x3   : > { %p34_p1 = scmp.ge.s32.totalorder %s32_s15, 2  ;;  %p210_p2 = scmp.lt.s32.totalorder %s1465_s14, 3 }
   0x5   : > { %s1961_s15 = smov (%p34_p1, %s32_s15), 0  ;;  %p211_p3 = pnand %p1248_p0, %p210_p2 }
   0x6   : > { %p259_p4 = scmp.lt.s32.totalorder (!%p211_p3), %s1457_s12, 1  ;;  %v1467_v0 = vmov (!%p211_p3), 0.0   ;;  %v313_v14 = vlaneseq (!%p211_p3)  ;;  %vm320_vm0 = vcmask (!%p211_p3), 1043456  }
   0x7   : > { %214 = sbr.rel (%p211_p3) target bundleno = 191 (0xbf), region = 32  ;;  %301 = vst [vmem:[#allocation2] sm:$0x1] (!%p211_p3), %v1467_v0 }
   0x8   : > { %v314_v21 = vshrl.u32 (!%p211_p3), %v313_v14, 7 }
   0xa   : > { %v1567_v43 = vsub.s32 (!%p211_p3), 0, %v314_v21 }
   0xe   : > { %s1963_s12 = smov (!%p259_p4, %s1457_s12), 1 }
   0xf   : > { %s1253_s16 = sshll.u32 %s1963_s12, 5  ;;  %s1288_s20 = sshll.u32 %s1963_s12, 7 }
  0x10   : > { %s1512_s19 = scalar_lea.vmem %s1951_s2, %s1253_s16  ;;  %s1526_s23 = scalar_lea.vmem %s1949_s0, %s1288_s20 }
  0x11   : > { %v305_v1 = vld [vmem:[%s1512_s19] sm:$0x1]  ;;  %v332_v2 = vld [vmem:[%s1512_s19 + $0x1] sm:$0x1]  ;;  %v358_v5 = vld [vmem:[%s1512_s19 + $0x2] sm:$0x1]  ;;  %s1531_s26 = scalar_lea.vmem %s1950_s1, %s1288_s20  ;;  %s295_s29 = scalar_lea.vmem %s1952_s3, %s1963_s12 }
  0x12   : > { %v1254_v3 = vmul.f32 -1.442695, %v305_v1  ;;  %v1255_v4 = vmul.f32 -1.442695, %v332_v2  ;;  %v1256_v6 = vmul.f32 -1.442695, %v358_v5 }
  0x13   : > { %v384_v7 = vld [vmem:[%s1512_s19 + $0x3] sm:$0x1]  ;;  %v410_v9 = vld [vmem:[%s1512_s19 + $0x4] sm:$0x1]  ;;  %v436_v11 = vld [vmem:[%s1512_s19 + $0x5] sm:$0x1] }
  0x14   : > { %1315 = vpow2.f32 %v1254_v3  ;;  %v1257_v8 = vmul.f32 -1.442695, %v384_v7  ;;  %v1258_v10 = vmul.f32 -1.442695, %v410_v9  ;;  %v1259_v12 = vmul.f32 -1.442695, %v436_v11 }
  0x15   : > { %1317 = vpow2.f32 %v1255_v4  ;;  %v462_v13 = vld [vmem:[%s1512_s19 + $0x6] sm:$0x1]  ;;  %v488_v16 = vld [vmem:[%s1512_s19 + $0x7] sm:$0x1]  ;;  %v514_v18 = vld [vmem:[%s1512_s19 + $0x8] sm:$0x1] }
  0x16   : > { %1319 = vpow2.f32 %v1256_v6  ;;  %v1260_v15 = vmul.f32 -1.442695, %v462_v13  ;;  %v1261_v17 = vmul.f32 -1.442695, %v488_v16  ;;  %v1262_v19 = vmul.f32 -1.442695, %v514_v18 }
  0x17   : > { %1321 = vpow2.f32 %v1257_v8  ;;  %v540_v20 = vld [vmem:[%s1512_s19 + $0x9] sm:$0x1]  ;;  %v1536_v24 = vld [vmem:[%s1526_s23] sm:$0xf]  ;;  %v566_v26 = vld [vmem:[%s1512_s19 + $0xa] sm:$0x1] }
  0x18   : > { %1323 = vpow2.f32 %v1258_v10  ;;  %v1263_v22 = vmul.f32 -1.442695, %v540_v20  ;;  %v1539_v25 = vld [vmem:[%s1531_s26] sm:$0xf]  ;;  %v1543_v29 = vld [vmem:[%s1526_s23 + $0x4] sm:$0xf] }
  0x19   : > { %1325 = vpow2.f32 %v1259_v12  ;;  %v1546_v30 = vld [vmem:[%s1531_s26 + $0x4] sm:$0xf]  ;;  %v1549_v33 = vld [vmem:[%s1526_s23 + $0x8] sm:$0xf]  ;;  %v1555_v37 = vld [vmem:[%s1526_s23 + $0xc] sm:$0xf]  ;;  %v304_v51 = vsub.f32 %v1536_v24, %v1539_v25 }
  0x1a   : > { %1327 = vpow2.f32 %v1260_v15  ;;  %v1552_v34 = vld [vmem:[%s1531_s26 + $0x8] sm:$0xf]  ;;  %v1558_v38 = vld [vmem:[%s1531_s26 + $0xc] sm:$0xf]  ;;  %v1561_v39 = vld [vmem:[%s1526_s23 + $0x10] sm:$0xf]  ;;  %v331_v57 = vsub.f32 %v1543_v29, %v1546_v30 }
  0x1b   : > { %1329 = vpow2.f32 %v1261_v17  ;;  %v1564_v40 = vld [vmem:[%s1531_s26 + $0x10] sm:$0xf]  ;;  %v1264_v41 = vmul.f32 -1.442695, %v566_v26  ;;  %v592_v42 = vld [vmem:[%s1512_s19 + $0xb] sm:$0x1]  ;;  %v357_v2 = vsub.f32 %v1549_v33, %v1552_v34  ;;  %v383_v9 = vsub.f32 %v1555_v37, %v1558_v38 }
  0x1c   : > { %1331 = vpow2.f32 %v1262_v19  ;;  %v1570_v45 = vld [vmem:[%s1526_s23 + $0x14] sm:$0xf]  ;;  %v1576_v47 = vld [vmem:[%s1526_s23 + $0x18] sm:$0xf]  ;;  %v618_v49 = vld [vmem:[%s1512_s19 + $0xc] sm:$0x1]  ;;  %v409_v10 = vsub.f32 %v1561_v39, %v1564_v40 }
  0x1d   : > { %1333 = vpow2.f32 %v1263_v22  ;;  %v1573_v46 = vld [vmem:[%s1531_s26 + $0x14] sm:$0xf]  ;;  %v1579_v48 = vld [vmem:[%s1531_s26 + $0x18] sm:$0xf]  ;;  %v1585_v52 = vld [vmem:[%s1526_s23 + $0x1c] sm:$0xf] }
  0x1e   : > { %v1316_v23 = vpop.eup %1315  ;;  %v1588_v53 = vld [vmem:[%s1531_s26 + $0x1c] sm:$0xf]  ;;  %v1591_v54 = vld [vmem:[%s1526_s23 + $0x20] sm:$0xf]  ;;  %v1599_v59 = vld [vmem:[%s1526_s23 + $0x24] sm:$0xf]  ;;  %v435_v15 = vsub.f32 %v1570_v45, %v1573_v46  ;;  %v461_v16 = vsub.f32 %v1576_v47, %v1579_v48 }
  0x1f   : > { %v1318_v27 = vpop.eup %1317  ;;  %v309_v28 = vadd.f32 1.0, %v1316_v23  ;;  %v1594_v55 = vld [vmem:[%s1531_s26 + $0x20] sm:$0xf]  ;;  %v1602_v60 = vld [vmem:[%s1531_s26 + $0x24] sm:$0xf]  ;;  %v487_v21 = vsub.f32 %v1585_v52, %v1588_v53 }
  0x20   : > { %v1320_v31 = vpop.eup %1319  ;;  %v336_v32 = vadd.f32 1.0, %v1318_v27  ;;  %v1605_v61 = vld [vmem:[%s1526_s23 + $0x28] sm:$0xf]  ;;  %v1265_v63 = vmul.f32 -1.442695, %v592_v42  ;;  %v513_v23 = vsub.f32 %v1591_v54, %v1594_v55 }
  0x21   : > { %v1322_v35 = vpop.eup %1321  ;;  %1335 = vrcp.f32 %v309_v28  ;;  %v362_v36 = vadd.f32 1.0, %v1320_v31  ;;  %v1608_v62 = vld [vmem:[%s1531_s26 + $0x28] sm:$0xf]  ;;  %v644_v0 = vld [vmem:[%s1512_s19 + $0xd] sm:$0x1] }
  0x22   : > { %1337 = vrcp.f32 %v336_v32  ;;  %v388_v44 = vadd.f32 1.0, %v1322_v35  ;;  %v1324_v50 = vpop.eup %1323  ;;  %v1614_v4 = vld [vmem:[%s1526_s23 + $0x2c] sm:$0xf]  ;;  %v1620_v6 = vld [vmem:[%s1526_s23 + $0x30] sm:$0xf]  ;;  %v539_v32 = vsub.f32 %v1599_v59, %v1602_v60  ;;  %v1953_v54 = vsub.f32 %v1605_v61, %v1608_v62 }
  0x23   : > { %1339 = vrcp.f32 %v362_v36  ;;  %v1326_v56 = vpop.eup %1325  ;;  %v414_v58 = vadd.f32 1.0, %v1324_v50  ;;  %v1617_v5 = vld [vmem:[%s1531_s26 + $0x2c] sm:$0xf]  ;;  %v1623_v7 = vld [vmem:[%s1531_s26 + $0x30] sm:$0xf] }
  0x24   : > { %1341 = vrcp.f32 %v388_v44  ;;  %v1328_v1 = vpop.eup %1327  ;;  %v440_v3 = vadd.f32 1.0, %v1326_v56  ;;  %v1266_v8 = vmul.f32 -1.442695, %v618_v49  ;;  %v1630_v12 = vld [vmem:[%s1526_s23 + $0x34] sm:$0xf] }
  0x25   : > { %1343 = vpow2.f32 %v1264_v41  ;;  %v466_v11 = vadd.f32 1.0, %v1328_v1  ;;  %v1633_v13 = vld [vmem:[%s1531_s26 + $0x34] sm:$0xf]  ;;  %v1330_v14 = vpop.eup %1329  ;;  %v1267_v17 = vmul.f32 -1.442695, %v644_v0 }
  0x26   : > { %1345 = vrcp.f32 %v414_v58  ;;  %v1640_v18 = vld [vmem:[%s1526_s23 + $0x38] sm:$0xf]  ;;  %v1332_v20 = vpop.eup %1331  ;;  %v492_v22 = vadd.f32 1.0, %v1330_v14  ;;  %v670_v26 = vld [vmem:[%s1512_s19 + $0xe] sm:$0x1] }
  0x27   : > { %1347 = vrcp.f32 %v440_v3  ;;  %v1643_v19 = vld [vmem:[%s1531_s26 + $0x38] sm:$0xf]  ;;  %v1651_v27 = vld [vmem:[%s1526_s23 + $0x3c] sm:$0xf]  ;;  %v1334_v28 = vpop.eup %1333  ;;  %v518_v31 = vadd.f32 1.0, %v1332_v20 }
  0x28   : > { %1349 = vrcp.f32 %v466_v11  ;;  %v1658_v36 = vld [vmem:[%s1531_s26 + $0x3c] sm:$0xf]  ;;  %v696_v41 = vld [vmem:[%s1512_s19 + $0xf] sm:$0x1]  ;;  %v544_v42 = vadd.f32 1.0, %v1334_v28  ;;  %v669_v0 = vsub.f32 %v1640_v18, %v1643_v19 }
  0x29   : > { %1351 = vpow2.f32 %v1265_v63  ;;  %v722_v50 = vld [vmem:[%s1512_s19 + $0x10] sm:$0x1]  ;;  %v748_v56 = vld [vmem:[%s1512_s19 + $0x11] sm:$0x1]  ;;  %v1268_v1 = vmul.f32 -1.442695, %v670_v26 }
  0x2a   : > { %1353 = vrcp.f32 %v492_v22  ;;  %v1269_v20 = vmul.f32 -1.442695, %v696_v41  ;;  %v774_v22 = vld [vmem:[%s1512_s19 + $0x12] sm:$0x1]  ;;  %v1676_v44 = vmul.f32 -1.442695, %v748_v56 }
  0x2b   : > { %v1336_v58 = vpop.eup %1335  ;;  %1355 = vrcp.f32 %v518_v31  ;;  %v1270_v31 = vmul.f32 -1.442695, %v722_v50  ;;  %v800_v63 = vld [vmem:[%s1512_s19 + $0x13] sm:$0x1] }
  0x2c   : > { %v1338_v3 = vpop.eup %1337  ;;  %v316_v11 = vrot.slane %v1336_v58, %v1567_v43  ;;  %1357 = vrcp.f32 %v544_v42  ;;  %v1683_v58 = vmul.f32 -1.442695, %v774_v22  ;;  %v1689_v50 = vmul.f32 -1.442695, %v800_v63 }
  0x2d   : > { %v1340_v28 = vpop.eup %1339  ;;  %v343_v49 = vrot.slane %v1338_v3, %v1567_v43  ;;  %1359 = vpow2.f32 %v1266_v8 }
  0x2e   : > { %v1342_v35 = vpop.eup %1341  ;;  %v318_v26 = vmul.f32 %v316_v11, %v304_v51  ;;  %v369_v42 = vrot.slane %v1340_v28, %v1567_v43  ;;  %1361 = vpow2.f32 %v1267_v17 }
  0x2f   : > { %v1344_v41 = vpop.eup %1343  ;;  %v345_v3 = vmul.f32 %v343_v49, %v331_v57  ;;  %v395_v8 = vrot.slane %v1342_v35, %v1567_v43  ;;  %1363 = vpow2.f32 %v1268_v1 }
  0x30   : > { %v1346_v56 = vpop.eup %1345  ;;  %v319_v14 = vmul.f32 %v318_v26, %v318_v26  ;;  %v371_v24 = vmul.f32 %v369_v42, %v357_v2  ;;  %v570_v25 = vadd.f32 1.0, %v1344_v41  ;;  %1365 = vpow2.f32 %v1269_v20 }
  0x31   : > { %v1348_v51 = vpop.eup %1347  ;;  %v346_v17 = vmul.f32 %v345_v3, %v345_v3  ;;  %v397_v29 = vmul.f32 %v395_v8, %v383_v9  ;;  %v421_v30 = vrot.slane %v1346_v56, %v1567_v43  ;;  %1367 = vpow2.f32 %v1270_v31 }
  0x32   : > { %v1350_v57 = vpop.eup %1349  ;;  %v321_v35 = vsel %vm320_vm0, %v319_v14, 0.0  ;;  %v372_v49 = vmul.f32 %v371_v24, %v371_v24  ;;  %v447_v63 = vrot.slane %v1348_v51, %v1567_v43  ;;  %1369 = vrcp.f32 %v570_v25 }
  0x33   : > { %v1700_v33 = vpop.eup %1351  ;;  %v322_v34 = vrot.slane %v321_v35, 4  ;;  %v347_v2 = vsel %vm320_vm0, %v346_v17, 0.0  ;;  %v398_v1 = vmul.f32 %v397_v29, %v397_v29  ;;  %v423_v37 = vmul.f32 %v421_v30, %v409_v10 }
  0x34   : > { %v1354_v38 = vpop.eup %1353  ;;  %v348_v9 = vrot.slane %v347_v2, 4  ;;  %v373_v11 = vsel %vm320_vm0, %v372_v49, 0.0  ;;  %v449_v14 = vmul.f32 %v447_v63, %v435_v15  ;;  %v473_v20 = vrot.slane %v1350_v57, %v1567_v43 }
  0x35   : > { %v1356_v22 = vpop.eup %1355  ;;  %v323_v28 = vadd.f32 %v322_v34, %v321_v35  ;;  %v374_v31 = vrot.slane %v373_v11, 4  ;;  %v399_v26 = vsel %vm320_vm0, %v398_v1, 0.0  ;;  %v424_v42 = vmul.f32 %v423_v37, %v423_v37 }
  0x36   : > { %v1712_v41 = vpop.eup %1357  ;;  %v349_v39 = vadd.f32 %v348_v9, %v347_v2  ;;  %v400_v40 = vrot.slane %v399_v26, 4  ;;  %v450_v10 = vmul.f32 %v449_v14, %v449_v14  ;;  %v475_v3 = vmul.f32 %v473_v20, %v461_v16 }
  0x37   : > { %v1717_v8 = vpop.eup %1359  ;;  %v324_v45 = vrot.slane %v323_v28, 2  ;;  %v375_v46 = vadd.f32 %v374_v31, %v373_v11  ;;  %v425_v15 = vsel %vm320_vm0, %v424_v42, 0.0  ;;  %v499_v56 = vrot.slane %v1354_v38, %v1567_v43 }
  0x38   : > { %v1721_v24 = vpop.eup %1361  ;;  %v350_v25 = vrot.slane %v349_v39, 2  ;;  %v401_v51 = vadd.f32 %v400_v40, %v399_v26  ;;  %v426_v17 = vrot.slane %v425_v15, 4  ;;  %v451_v29 = vsel %vm320_vm0, %v450_v10, 0.0 }
  0x39   : > { %v1724_v30 = vpop.eup %1363  ;;  %v325_v57 = vadd.f32 %v324_v45, %v323_v28  ;;  %v376_v47 = vrot.slane %v375_v46, 2  ;;  %v452_v48 = vrot.slane %v451_v29, 4  ;;  %v476_v16 = vmul.f32 %v475_v3, %v475_v3 }
  0x3a   : > { %v1726_v35 = vpop.eup %1365  ;;  %v351_v49 = vadd.f32 %v350_v25, %v349_v39  ;;  %v402_v63 = vrot.slane %v401_v51, 2  ;;  %v427_v34 = vadd.f32 %v426_v17, %v425_v15  ;;  %v501_v2 = vmul.f32 %v499_v56, %v487_v21 }
  0x3b   : > { %v1731_v1 = vpop.eup %1367  ;;  %v326_v37 = vrot.slane %v325_v57, 1  ;;  %v377_v38 = vadd.f32 %v376_v47, %v375_v46  ;;  %v453_v9 = vadd.f32 %v452_v48, %v451_v29  ;;  %v477_v11 = vsel %vm320_vm0, %v476_v16, 0.0 }
  0x3c   : > { %v1370_v14 = vpop.eup %1369  ;;  %v352_v20 = vrot.slane %v351_v49, 1  ;;  %v403_v28 = vadd.f32 %v402_v63, %v401_v51  ;;  %v428_v31 = vrot.slane %v427_v34, 2  ;;  %v478_v26 = vrot.slane %v477_v11, 4 }
  0x3d   : > { %v327_v42 = vadd.f32 %v326_v37, %v325_v57  ;;  %v378_v39 = vrot.slane %v377_v38, 1  ;;  %v454_v40 = vrot.slane %v453_v9, 2  ;;  %v502_v10 = vmul.f32 %v501_v2, %v501_v2 }
  0x3e   : > { %v353_v3 = vadd.f32 %v352_v20, %v351_v49  ;;  %v404_v45 = vrot.slane %v403_v28, 1  ;;  %v429_v52 = vadd.f32 %v428_v31, %v427_v34  ;;  %v479_v53 = vadd.f32 %v478_v26, %v477_v11 }
  0x3f   : > { %v379_v21 = vadd.f32 %v378_v39, %v377_v38  ;;  %v455_v15 = vadd.f32 %v454_v40, %v453_v9  ;;  %v503_v46 = vsel %vm320_vm0, %v502_v10, 0.0  ;;  %v525_v56 = vrot.slane %v1356_v22, %v1567_v43 }
  0x40   : > { %v354_v25 = vadd.f32 %v353_v3, %v327_v42  ;;  %v405_v17 = vadd.f32 %v404_v45, %v403_v28  ;;  %v430_v29 = vrot.slane %v429_v52, 1  ;;  %v480_v51 = vrot.slane %v479_v53, 2 }
  0x41   : > { %v456_v47 = vrot.slane %v455_v15, 1  ;;  %v504_v48 = vrot.slane %v503_v46, 4  ;;  %v527_v57 = vmul.f32 %v525_v56, %v513_v23  ;;  %v551_v16 = vrot.slane %v1712_v41, %v1567_v43 }
  0x42   : > { %v380_v49 = vadd.f32 %v379_v21, %v354_v25  ;;  %v431_v63 = vadd.f32 %v430_v29, %v429_v52  ;;  %v481_v34 = vadd.f32 %v480_v51, %v479_v53  ;;  %v577_v2 = vrot.slane %v1370_v14, %v1567_v43  ;;  %v1756_v52 = vld [vmem:[%s1526_s23 + $0x40] sm:$0xf]  ;;  %v1767_v29 = vld [vmem:[%s1531_s26 + $0x44] sm:$0xf] }
  0x43   : > { %v457_v37 = vadd.f32 %v456_v47, %v455_v15  ;;  %v505_v22 = vadd.f32 %v504_v48, %v503_v46  ;;  %v528_v38 = vmul.f32 %v527_v57, %v527_v57  ;;  %v553_v9 = vmul.f32 %v551_v16, %v539_v32  ;;  %v826_v46 = vld [vmem:[%s1512_s19 + $0x14] sm:$0x1]  ;;  %v1772_v57 = vld [vmem:[%s1526_s23 + $0x48] sm:$0xf] }
  0x44   : > { %v406_v11 = vadd.f32 %v405_v17, %v380_v49  ;;  %v482_v20 = vrot.slane %v481_v34, 1  ;;  %v579_v55 = vmul.f32 %v577_v2, %v1953_v54  ;;  %v596_v23 = vadd.f32 1.0, %v1700_v33  ;;  %v1775_v16 = vld [vmem:[%s1531_s26 + $0x48] sm:$0xf]  ;;  %v852_v49 = vld [vmem:[%s1512_s19 + $0x15] sm:$0x1] }
  0x45   : > { %v506_v41 = vrot.slane %v505_v22, 2  ;;  %v529_v28 = vsel %vm320_vm0, %v528_v38, 0.0  ;;  %v554_v31 = vmul.f32 %v553_v9, %v553_v9  ;;  %v622_v14 = vadd.f32 1.0, %v1717_v8  ;;  %v1785_v38 = vld [vmem:[%s1531_s26 + $0x4c] sm:$0xf] }
  0x46   : > { %v432_v26 = vadd.f32 %v431_v63, %v406_v11  ;;  %v483_v42 = vadd.f32 %v482_v20, %v481_v34  ;;  %v530_v39 = vrot.slane %v529_v28, 4  ;;  %v580_v59 = vmul.f32 %v579_v55, %v579_v55  ;;  %v1781_v34 = vld [vmem:[%s1526_s23 + $0x4c] sm:$0xf]  ;;  %v904_v9 = vld [vmem:[%s1512_s19 + $0x17] sm:$0x1] }
  0x47   : > { %v507_v60 = vadd.f32 %v506_v41, %v505_v22  ;;  %v555_v32 = vsel %vm320_vm0, %v554_v31, 0.0  ;;  %1371 = vrcp.f32 %v596_v23  ;;  %v648_v61 = vadd.f32 1.0, %v1721_v24  ;;  %v1759_v24 = vld [vmem:[%s1531_s26 + $0x40] sm:$0xf]  ;;  %v1792_v54 = vld [vmem:[%s1526_s23 + $0x50] sm:$0xf] }
  0x48   : > { %v458_v62 = vadd.f32 %v457_v37, %v432_v26  ;;  %v531_v33 = vadd.f32 %v530_v39, %v529_v28  ;;  %v556_v40 = vrot.slane %v555_v32, 4  ;;  %v581_v10 = vsel %vm320_vm0, %v580_v59, 0.0  ;;  %v878_v37 = vld [vmem:[%s1512_s19 + $0x16] sm:$0x1]  ;;  %v1795_v55 = vld [vmem:[%s1531_s26 + $0x50] sm:$0xf] }
  0x49   : > { %v508_v8 = vrot.slane %v507_v60, 1  ;;  %v582_v3 = vrot.slane %v581_v10, 4  ;;  %1373 = vrcp.f32 %v622_v14  ;;  %v674_v45 = vadd.f32 1.0, %v1724_v30  ;;  %v1764_v30 = vld [vmem:[%s1526_s23 + $0x44] sm:$0xf] }
  0x4a   : > { %v484_v53 = vadd.f32 %v483_v42, %v458_v62  ;;  %v532_v21 = vrot.slane %v531_v33, 2  ;;  %v557_v15 = vadd.f32 %v556_v40, %v555_v32  ;;  %1375 = vrcp.f32 %v648_v61  ;;  %v930_v14 = vld [vmem:[%s1512_s19 + $0x18] sm:$0x1]  ;;  %v1805_v62 = vld [vmem:[%s1526_s23 + $0x54] sm:$0xf] }
  0x4b   : > { %v509_v56 = vadd.f32 %v508_v8, %v507_v60  ;;  %v583_v25 = vadd.f32 %v582_v3, %v581_v10  ;;  %1377 = vrcp.f32 %v674_v45  ;;  %v700_v17 = vadd.f32 1.0, %v1726_v35 }
  0x4c   : > { %v533_v51 = vadd.f32 %v532_v21, %v531_v33  ;;  %v558_v47 = vrot.slane %v557_v15, 2  ;;  %v726_v48 = vadd.f32 1.0, %v1731_v1  ;;  %1379 = vpow2.f32 %v1676_v44  ;;  %v1808_v33 = vld [vmem:[%s1531_s26 + $0x54] sm:$0xf] }
  0x4d   : > { %v584_v63 = vrot.slane %v583_v25, 2  ;;  %1381 = vrcp.f32 %v700_v17  ;;  %v721_v35 = vsub.f32 %v1756_v52, %v1759_v24  ;;  %v1274_v2 = vmul.f32 -1.442695, %v826_v46 }
  0x4e   : > { %v510_v1 = vadd.f32 %v509_v56, %v484_v53  ;;  %v534_v22 = vrot.slane %v533_v51, 1  ;;  %v559_v44 = vadd.f32 %v558_v47, %v557_v15  ;;  %1383 = vrcp.f32 %v726_v48 }
  0x4f   : > { %v585_v11 = vadd.f32 %v584_v63, %v583_v25  ;;  %v747_v20 = vsub.f32 %v1764_v30, %v1767_v29  ;;  %1385 = vpow2.f32 %v1683_v58  ;;  %v1275_v23 = vmul.f32 -1.442695, %v852_v49 }
  0x50   : > { %v535_v41 = vadd.f32 %v534_v22, %v533_v51  ;;  %v560_v28 = vrot.slane %v559_v44, 1  ;;  %1387 = vpow2.f32 %v1689_v50  ;;  %v1276_v31 = vmul.f32 -1.442695, %v878_v37  ;;  %v956_v50 = vld [vmem:[%s1512_s19 + $0x19] sm:$0x1] }
  0x51   : > { %v1372_v26 = vpop.eup %1371  ;;  %v586_v42 = vrot.slane %v585_v11, 1  ;;  %v773_v39 = vsub.f32 %v1772_v57, %v1775_v16  ;;  %1389 = vpow2.f32 %v1274_v2  ;;  %v1277_v58 = vmul.f32 -1.442695, %v904_v9 }
  0x52   : > { %v536_v59 = vadd.f32 %v535_v41, %v510_v1  ;;  %v561_v60 = vadd.f32 %v560_v28, %v559_v44  ;;  %v603_v32 = vrot.slane %v1372_v26, %v1567_v43  ;;  %v799_v61 = vsub.f32 %v1781_v34, %v1785_v38 }
  0x53   : > { %v1374_v40 = vpop.eup %1373  ;;  %v587_v10 = vadd.f32 %v586_v42, %v585_v11  ;;  %v825_v8 = vsub.f32 %v1792_v54, %v1795_v55  ;;  %1391 = vpow2.f32 %v1275_v23  ;;  %v1278_v3 = vmul.f32 -1.442695, %v930_v14 }
  0x54   : > { %v1376_v45 = vpop.eup %1375  ;;  %v562_v53 = vadd.f32 %v561_v60, %v536_v59  ;;  %v1954_v21 = vsub.f32 %v1614_v4, %v1617_v5  ;;  %v629_v46 = vrot.slane %v1374_v40, %v1567_v43  ;;  %1393 = vpow2.f32 %v1276_v31 }
  0x55   : > { %v1378_v56 = vpop.eup %1377  ;;  %v655_v25 = vrot.slane %v1376_v45, %v1567_v43  ;;  %v851_v17 = vsub.f32 %v1805_v62, %v1808_v33  ;;  %1395 = vpow2.f32 %v1277_v58  ;;  %v1279_v51 = vmul.f32 -1.442695, %v956_v50 }
  0x56   : > { %v605_v15 = vmul.f32 %v603_v32, %v1954_v21  ;;  %v1380_v47 = vpop.eup %1379  ;;  %v1955_v49 = vsub.f32 %v1620_v6, %v1623_v7  ;;  %v681_v4 = vrot.slane %v1378_v56, %v1567_v43  ;;  %1397 = vpow2.f32 %v1278_v3 }
  0x57   : > { %v1382_v5 = vpop.eup %1381  ;;  %v1824_v2 = vadd.f32 %v587_v10, %v562_v53  ;;  %v1956_v37 = vsub.f32 %v1630_v12, %v1633_v13  ;;  %v752_v22 = vadd.f32 1.0, %v1380_v47  ;;  %1399 = vpow2.f32 %v1279_v51 }
  0x58   : > { %v606_v48 = vmul.f32 %v605_v15, %v605_v15  ;;  %v631_v63 = vmul.f32 %v629_v46, %v1955_v49  ;;  %v1384_v44 = vpop.eup %1383  ;;  %v683_v6 = vmul.f32 %v681_v4, %v669_v0  ;;  %v707_v7 = vrot.slane %v1382_v5, %v1567_v43 }
  0x59   : > { %v657_v1 = vmul.f32 %v655_v25, %v1956_v37  ;;  %v1386_v23 = vpop.eup %1385  ;;  %v733_v31 = vrot.slane %v1384_v44, %v1567_v43  ;;  %1401 = vrcp.f32 %v752_v22  ;;  %v1957_v26 = vsub.f32 %v1651_v27, %v1658_v36 }
  0x5a   : > { %v607_v9 = vsel %vm320_vm0, %v606_v48, 0.0  ;;  %v632_v11 = vmul.f32 %v631_v63, %v631_v63  ;;  %v1388_v12 = vpop.eup %1387  ;;  %v684_v14 = vmul.f32 %v683_v6, %v683_v6  ;;  %v778_v58 = vadd.f32 1.0, %v1386_v23 }
  0x5b   : > { %v608_v41 = vrot.slane %v607_v9, 4  ;;  %v658_v28 = vmul.f32 %v657_v1, %v657_v1  ;;  %v709_v42 = vmul.f32 %v707_v7, %v1957_v26  ;;  %v1390_v59 = vpop.eup %1389  ;;  %v735_v60 = vmul.f32 %v733_v31, %v721_v35 }
  0x5c   : > { %v633_v13 = vsel %vm320_vm0, %v632_v11, 0.0  ;;  %v685_v50 = vsel %vm320_vm0, %v684_v14, 0.0  ;;  %1403 = vrcp.f32 %v778_v58  ;;  %v804_v46 = vadd.f32 1.0, %v1388_v12 }
  0x5d   : > { %v609_v18 = vadd.f32 %v608_v41, %v607_v9  ;;  %v634_v19 = vrot.slane %v633_v13, 4  ;;  %v659_v0 = vsel %vm320_vm0, %v658_v28, 0.0  ;;  %v710_v40 = vmul.f32 %v709_v42, %v709_v42  ;;  %v1392_v10 = vpop.eup %1391 }
  0x5e   : > { %v660_v32 = vrot.slane %v659_v0, 4  ;;  %v686_v27 = vrot.slane %v685_v50, 4  ;;  %v736_v36 = vmul.f32 %v735_v60, %v735_v60  ;;  %v1394_v53 = vpop.eup %1393  ;;  %v830_v56 = vadd.f32 1.0, %v1390_v59  ;;  %v1852_v60 = vld [vmem:[%s1526_s23 + $0x58] sm:$0xf] }
  0x5f   : > { %v610_v3 = vrot.slane %v609_v18, 2  ;;  %v635_v45 = vadd.f32 %v634_v19, %v633_v13  ;;  %v711_v15 = vsel %vm320_vm0, %v710_v40, 0.0  ;;  %v1396_v25 = vpop.eup %1395  ;;  %1405 = vrcp.f32 %v804_v46  ;;  %v1870_v46 = vld [vmem:[%s1526_s23 + $0x60] sm:$0xf] }
  0x60   : > { %v661_v21 = vadd.f32 %v660_v32, %v659_v0  ;;  %v687_v24 = vadd.f32 %v686_v27, %v685_v50  ;;  %v712_v35 = vrot.slane %v711_v15, 4  ;;  %v1398_v47 = vpop.eup %1397  ;;  %v737_v49 = vsel %vm320_vm0, %v736_v36, 0.0  ;;  %v1855_v32 = vld [vmem:[%s1531_s26 + $0x58] sm:$0xf]  ;;  %v1859_v27 = vld [vmem:[%s1526_s23 + $0x5c] sm:$0xf] }
  0x61   : > { %v611_v51 = vadd.f32 %v610_v3, %v609_v18  ;;  %v636_v52 = vrot.slane %v635_v45, 2  ;;  %v856_v63 = vadd.f32 1.0, %v1392_v10  ;;  %v1400_v4 = vpop.eup %1399  ;;  %v738_v9 = vrot.slane %v737_v49, 4  ;;  %v1862_v36 = vld [vmem:[%s1531_s26 + $0x5c] sm:$0xf] }
  0x62   : > { %v662_v48 = vrot.slane %v661_v21, 2  ;;  %v688_v1 = vrot.slane %v687_v24, 2  ;;  %v713_v22 = vadd.f32 %v712_v35, %v711_v15  ;;  %1407 = vrcp.f32 %v830_v56  ;;  %v1873_v56 = vld [vmem:[%s1531_s26 + $0x60] sm:$0xf] }
  0x63   : > { %v612_v5 = vrot.slane %v611_v51, 1  ;;  %v637_v37 = vadd.f32 %v636_v52, %v635_v45  ;;  %v882_v11 = vadd.f32 1.0, %v1394_v53  ;;  %v1402_v6 = vpop.eup %1401  ;;  %v739_v12 = vadd.f32 %v738_v9, %v737_v49  ;;  %v1034_v9 = vld [vmem:[%s1512_s19 + $0x1c] sm:$0x1] }
  0x64   : > { %v663_v44 = vadd.f32 %v662_v48, %v661_v21  ;;  %v689_v41 = vadd.f32 %v688_v1, %v687_v24  ;;  %v714_v28 = vrot.slane %v713_v22, 2  ;;  %v759_v13 = vrot.slane %v1402_v6, %v1567_v43 }
  0x65   : > { %v613_v7 = vadd.f32 %v612_v5, %v611_v51  ;;  %v638_v23 = vrot.slane %v637_v37, 1  ;;  %1409 = vrcp.f32 %v856_v63  ;;  %v740_v19 = vrot.slane %v739_v12, 2  ;;  %v982_v51 = vld [vmem:[%s1512_s19 + $0x1a] sm:$0x1] }
  0x66   : > { %v664_v31 = vrot.slane %v663_v44, 1  ;;  %v690_v42 = vrot.slane %v689_v41, 1  ;;  %v715_v58 = vadd.f32 %v714_v28, %v713_v22  ;;  %v1404_v59 = vpop.eup %1403  ;;  %v761_v0 = vmul.f32 %v759_v13, %v747_v20 }
  0x67   : > { %v614_v14 = vadd.f32 %v613_v7, %v1824_v2  ;;  %v639_v26 = vadd.f32 %v638_v23, %v637_v37  ;;  %1411 = vrcp.f32 %v882_v11  ;;  %v785_v10 = vrot.slane %v1404_v59, %v1567_v43  ;;  %v1008_v37 = vld [vmem:[%s1512_s19 + $0x1b] sm:$0x1] }
  0x68   : > { %v665_v18 = vadd.f32 %v664_v31, %v663_v44  ;;  %v691_v50 = vadd.f32 %v690_v42, %v689_v41  ;;  %v716_v40 = vrot.slane %v715_v58, 1  ;;  %v741_v3 = vadd.f32 %v740_v19, %v739_v12 }
  0x69   : > { %v640_v2 = vadd.f32 %v639_v26, %v614_v14  ;;  %v762_v45 = vmul.f32 %v761_v0, %v761_v0  ;;  %v908_v30 = vadd.f32 1.0, %v1396_v25  ;;  %v934_v29 = vadd.f32 1.0, %v1398_v47  ;;  %v1406_v52 = vpop.eup %1405 }
  0x6a   : > { %v717_v53 = vadd.f32 %v716_v40, %v715_v58  ;;  %v787_v21 = vmul.f32 %v785_v10, %v773_v39  ;;  %v877_v15 = vsub.f32 %v1852_v60, %v1855_v32  ;;  %v742_v24 = vrot.slane %v741_v3, 1  ;;  %v953_v40 = vld [vmem:[%s1526_s23 + $0x64] sm:$0xf] }
  0x6b   : > { %v666_v20 = vadd.f32 %v665_v18, %v640_v2  ;;  %v763_v25 = vsel %vm320_vm0, %v762_v45, 0.0  ;;  %1413 = vrcp.f32 %v908_v30  ;;  %v960_v35 = vadd.f32 1.0, %v1400_v4  ;;  %v954_v10 = vld [vmem:[%s1531_s26 + $0x64] sm:$0xf] }
  0x6c   : > { %v764_v48 = vrot.slane %v763_v25, 4  ;;  %v788_v57 = vmul.f32 %v787_v21, %v787_v21  ;;  %v811_v16 = vrot.slane %v1406_v52, %v1567_v43  ;;  %v1408_v39 = vpop.eup %1407  ;;  %v903_v49 = vsub.f32 %v1859_v27, %v1862_v36 }
  0x6d   : > { %v692_v47 = vadd.f32 %v691_v50, %v666_v20  ;;  %v929_v63 = vsub.f32 %v1870_v46, %v1873_v56  ;;  %1415 = vrcp.f32 %v934_v29  ;;  %v1280_v5 = vmul.f32 -1.442695, %v982_v51 }
  0x6e   : > { %v743_v1 = vadd.f32 %v742_v24, %v741_v3  ;;  %v765_v22 = vadd.f32 %v764_v48, %v763_v25  ;;  %v789_v44 = vsel %vm320_vm0, %v788_v57, 0.0  ;;  %v813_v4 = vmul.f32 %v811_v16, %v799_v61 }
  0x6f   : > { %v1410_v11 = vpop.eup %1409  ;;  %v718_v6 = vadd.f32 %v717_v53, %v692_v47  ;;  %v790_v7 = vrot.slane %v789_v44, 4  ;;  %v837_v23 = vrot.slane %v1408_v39, %v1567_v43  ;;  %1417 = vrcp.f32 %v960_v35 }
  0x70   : > { %v766_v41 = vrot.slane %v765_v22, 2  ;;  %v814_v28 = vmul.f32 %v813_v4, %v813_v4  ;;  %v863_v31 = vrot.slane %v1410_v11, %v1567_v43  ;;  %v1281_v12 = vmul.f32 -1.442695, %v1008_v37 }
  0x71   : > { %v1412_v13 = vpop.eup %1411  ;;  %v791_v14 = vadd.f32 %v790_v7, %v789_v44  ;;  %v839_v26 = vmul.f32 %v837_v23, %v825_v8  ;;  %1419 = vpow2.f32 %v1280_v5  ;;  %v1282_v34 = vmul.f32 -1.442695, %v1034_v9 }
  0x72   : > { %v767_v38 = vadd.f32 %v766_v41, %v765_v22  ;;  %v815_v61 = vsel %vm320_vm0, %v814_v28, 0.0  ;;  %v865_v42 = vmul.f32 %v863_v31, %v851_v17  ;;  %v889_v58 = vrot.slane %v1412_v13, %v1567_v43 }
  0x73   : > { %v744_v59 = vadd.f32 %v743_v1, %v718_v6  ;;  %v792_v18 = vrot.slane %v791_v14, 2  ;;  %v816_v19 = vrot.slane %v815_v61, 4  ;;  %v840_v0 = vmul.f32 %v839_v26, %v839_v26 }
  0x74   : > { %v768_v60 = vrot.slane %v767_v38, 1  ;;  %v866_v54 = vmul.f32 %v865_v42, %v865_v42  ;;  %v891_v55 = vmul.f32 %v889_v58, %v877_v15  ;;  %1421 = vpow2.f32 %v1281_v12  ;;  %v1060_v12 = vld [vmem:[%s1512_s19 + $0x1d] sm:$0x1] }
  0x75   : > { %v1414_v8 = vpop.eup %1413  ;;  %v793_v32 = vadd.f32 %v792_v18, %v791_v14  ;;  %v817_v2 = vadd.f32 %v816_v19, %v815_v61  ;;  %v841_v50 = vsel %vm320_vm0, %v840_v0, 0.0  ;;  %1423 = vpow2.f32 %v1282_v34  ;;  %v1112_v0 = vld [vmem:[%s1512_s19 + $0x1f] sm:$0x1] }
  0x76   : > { %v769_v62 = vadd.f32 %v768_v60, %v767_v38  ;;  %v842_v33 = vrot.slane %v841_v50, 4  ;;  %v867_v17 = vsel %vm320_vm0, %v866_v54, 0.0  ;;  %v892_v3 = vmul.f32 %v891_v55, %v891_v55  ;;  %v1086_v38 = vld [vmem:[%s1512_s19 + $0x1e] sm:$0x1]  ;;  %v979_v55 = vld [vmem:[%s1526_s23 + $0x68] sm:$0xf] }
  0x77   : > { %v1416_v45 = vpop.eup %1415  ;;  %v794_v27 = vrot.slane %v793_v32, 1  ;;  %v818_v36 = vrot.slane %v817_v2, 2  ;;  %v868_v30 = vrot.slane %v867_v17, 4  ;;  %v915_v29 = vrot.slane %v1414_v8, %v1567_v43  ;;  %v980_v8 = vld [vmem:[%s1531_s26 + $0x68] sm:$0xf] }
  0x78   : > { %v843_v20 = vadd.f32 %v842_v33, %v841_v50  ;;  %v893_v53 = vsel %vm320_vm0, %v892_v3, 0.0  ;;  %v941_v21 = vrot.slane %v1416_v45, %v1567_v43  ;;  %v955_v15 = vsub.f32 %v953_v40, %v954_v10 }
  0x79   : > { %v1418_v46 = vpop.eup %1417  ;;  %v819_v56 = vadd.f32 %v818_v36, %v817_v2  ;;  %v869_v51 = vadd.f32 %v868_v30, %v867_v17  ;;  %v894_v52 = vrot.slane %v893_v53, 4  ;;  %v917_v25 = vmul.f32 %v915_v29, %v903_v49  ;;  %v1005_v36 = vld [vmem:[%s1526_s23 + $0x6c] sm:$0xf] }
  0x7a   : > { %v844_v24 = vrot.slane %v843_v20, 2  ;;  %v943_v35 = vmul.f32 %v941_v21, %v929_v63  ;;  %v967_v47 = vrot.slane %v1418_v46, %v1567_v43  ;;  %v770_v57 = vadd.f32 %v769_v62, %v744_v59  ;;  %v1006_v30 = vld [vmem:[%s1531_s26 + $0x6c] sm:$0xf]  ;;  %v1031_v21 = vld [vmem:[%s1526_s23 + $0x70] sm:$0xf] }
  0x7b   : > { %v1420_v48 = vpop.eup %1419  ;;  %v795_v16 = vadd.f32 %v794_v27, %v793_v32  ;;  %v820_v39 = vrot.slane %v819_v56, 1  ;;  %v870_v5 = vrot.slane %v869_v51, 2  ;;  %v918_v37 = vmul.f32 %v917_v25, %v917_v25 }
  0x7c   : > { %v944_v1 = vmul.f32 %v943_v35, %v943_v35  ;;  %v969_v22 = vmul.f32 %v967_v47, %v955_v15  ;;  %v845_v44 = vadd.f32 %v844_v24, %v843_v20  ;;  %v895_v4 = vadd.f32 %v894_v52, %v893_v53  ;;  %v1032_v15 = vld [vmem:[%s1531_s26 + $0x70] sm:$0xf] }
  0x7d   : > { %v986_v9 = vadd.f32 1.0, %v1420_v48  ;;  %v919_v6 = vsel %vm320_vm0, %v918_v37, 0.0  ;;  %v796_v63 = vadd.f32 %v795_v16, %v770_v57  ;;  %v821_v41 = vadd.f32 %v820_v39, %v819_v56 }
  0x7e   : > { %v1422_v11 = vpop.eup %1421  ;;  %v920_v7 = vrot.slane %v919_v6, 4  ;;  %v970_v23 = vmul.f32 %v969_v22, %v969_v22  ;;  %v871_v28 = vadd.f32 %v870_v5, %v869_v51  ;;  %v945_v31 = vsel %vm320_vm0, %v944_v1, 0.0 }
  0x7f   : > { %v1424_v49 = vpop.eup %1423  ;;  %1425 = vrcp.f32 %v986_v9  ;;  %v846_v13 = vrot.slane %v845_v44, 1  ;;  %v896_v14 = vrot.slane %v895_v4, 2  ;;  %v1012_v26 = vadd.f32 1.0, %v1422_v11 }
  0x80   : > { %v1038_v34 = vadd.f32 1.0, %v1424_v49  ;;  %v921_v61 = vadd.f32 %v920_v7, %v919_v6  ;;  %v946_v42 = vrot.slane %v945_v31, 4  ;;  %v971_v58 = vsel %vm320_vm0, %v970_v23, 0.0 }
  0x81   : > { %v1283_v59 = vmul.f32 -1.442695, %v1060_v12  ;;  %v822_v18 = vadd.f32 %v821_v41, %v796_v63  ;;  %v872_v19 = vrot.slane %v871_v28, 1  ;;  %1427 = vrcp.f32 %v1012_v26 }
  0x82   : > { %v847_v60 = vadd.f32 %v846_v13, %v845_v44  ;;  %v897_v54 = vadd.f32 %v896_v14, %v895_v4  ;;  %1429 = vrcp.f32 %v1038_v34  ;;  %v1284_v32 = vmul.f32 -1.442695, %v1086_v38 }
  0x83   : > { %v972_v2 = vrot.slane %v971_v58, 4  ;;  %1431 = vpow2.f32 %v1283_v59  ;;  %v922_v50 = vrot.slane %v921_v61, 2  ;;  %v947_v40 = vadd.f32 %v946_v42, %v945_v31 }
  0x84   : > { %1433 = vpow2.f32 %v1284_v32  ;;  %v1285_v10 = vmul.f32 -1.442695, %v1112_v0  ;;  %v981_v62 = vsub.f32 %v979_v55, %v980_v8  ;;  %v848_v33 = vadd.f32 %v847_v60, %v822_v18  ;;  %v1057_v0 = vld [vmem:[%s1526_s23 + $0x74] sm:$0xf]  ;;  %v1083_v8 = vld [vmem:[%s1526_s23 + $0x78] sm:$0xf] }
  0x85   : > { %v873_v17 = vadd.f32 %v872_v19, %v871_v28  ;;  %v898_v3 = vrot.slane %v897_v54, 1  ;;  %v973_v27 = vadd.f32 %v972_v2, %v971_v58  ;;  %v923_v29 = vadd.f32 %v922_v50, %v921_v61  ;;  %v1058_v60 = vld [vmem:[%s1531_s26 + $0x74] sm:$0xf]  ;;  %v1084_v32 = vld [vmem:[%s1531_s26 + $0x78] sm:$0xf] }
  0x86   : > { %1435 = vpow2.f32 %v1285_v10  ;;  %v948_v20 = vrot.slane %v947_v40, 2  ;;  %v1007_v52 = vsub.f32 %v1005_v36, %v1006_v30  ;;  %v1033_v35 = vsub.f32 %v1031_v21, %v1032_v15 }
  0x87   : > { %v874_v46 = vadd.f32 %v873_v17, %v848_v33  ;;  %v899_v56 = vadd.f32 %v898_v3, %v897_v54  ;;  %v974_v25 = vrot.slane %v973_v27, 2  ;;  %v924_v48 = vrot.slane %v923_v29, 1  ;;  %v1109_v33 = vld [vmem:[%s1526_s23 + $0x7c] sm:$0xf] }
  0x88   : > { %v949_v57 = vadd.f32 %v948_v20, %v947_v40  ;;  %v1059_v2 = vsub.f32 %v1057_v0, %v1058_v60  ;;  %v1110_v17 = vld [vmem:[%s1531_s26 + $0x7c] sm:$0xf] }
  0x89   : > { %v1426_v45 = vpop.eup %1425  ;;  %v900_v22 = vadd.f32 %v899_v56, %v874_v46  ;;  %v975_v11 = vadd.f32 %v974_v25, %v973_v27  ;;  %v925_v23 = vadd.f32 %v924_v48, %v923_v29  ;;  %v1085_v27 = vsub.f32 %v1083_v8, %v1084_v32 }
  0x8a   : > { %v993_v53 = vrot.slane %v1426_v45, %v1567_v43  ;;  %v950_v41 = vrot.slane %v949_v57, 1  ;;  %v1111_v20 = vsub.f32 %v1109_v33, %v1110_v17 }
  0x8b   : > { %v1428_v24 = vpop.eup %1427  ;;  %v976_v61 = vrot.slane %v975_v11, 1  ;;  %v926_v58 = vadd.f32 %v925_v23, %v900_v22 }
  0x8c   : > { %v995_v51 = vmul.f32 %v993_v53, %v981_v62  ;;  %v1430_v47 = vpop.eup %1429  ;;  %v1019_v39 = vrot.slane %v1428_v24, %v1567_v43  ;;  %v951_v59 = vadd.f32 %v950_v41, %v949_v57 }
  0x8d   : > { %v1432_v5 = vpop.eup %1431  ;;  %v1045_v37 = vrot.slane %v1430_v47, %v1567_v43  ;;  %v977_v40 = vadd.f32 %v976_v61, %v975_v11 }
  0x8e   : > { %v996_v16 = vmul.f32 %v995_v51, %v995_v51  ;;  %v1434_v1 = vpop.eup %1433  ;;  %v1021_v4 = vmul.f32 %v1019_v39, %v1007_v52  ;;  %v1064_v9 = vadd.f32 1.0, %v1432_v5  ;;  %v952_v50 = vadd.f32 %v951_v59, %v926_v58  ;;  %v1135_v59 = vld [vmem:[#allocation2] sm:$0x1] }
  0x8f   : > { %v1047_v49 = vmul.f32 %v1045_v37, %v1033_v35  ;;  %v1090_v63 = vadd.f32 1.0, %v1434_v1 }
  0x90   : > { %v997_v44 = vsel %vm320_vm0, %v996_v16, 0.0  ;;  %v1436_v7 = vpop.eup %1435  ;;  %v1022_v28 = vmul.f32 %v1021_v4, %v1021_v4  ;;  %1437 = vrcp.f32 %v1064_v9  ;;  %v978_v21 = vadd.f32 %v977_v40, %v952_v50 }
  0x91   : > { %v998_v6 = vrot.slane %v997_v44, 4  ;;  %v1048_v12 = vmul.f32 %v1047_v49, %v1047_v49  ;;  %1439 = vrcp.f32 %v1090_v63  ;;  %v1116_v13 = vadd.f32 1.0, %v1436_v7 }
  0x92   : > { %v1023_v14 = vsel %vm320_vm0, %v1022_v28, 0.0 }
  0x93   : > { %v999_v31 = vadd.f32 %v998_v6, %v997_v44  ;;  %v1024_v34 = vrot.slane %v1023_v14, 4  ;;  %v1049_v38 = vsel %vm320_vm0, %v1048_v12, 0.0  ;;  %1441 = vrcp.f32 %v1116_v13 }
  0x94   : > { %v1050_v42 = vrot.slane %v1049_v38, 4 }
  0x95   : > { %v1000_v26 = vrot.slane %v999_v31, 2  ;;  %v1025_v19 = vadd.f32 %v1024_v34, %v1023_v14 }
  0x96   : > { %v1051_v54 = vadd.f32 %v1050_v42, %v1049_v38 }
  0x97   : > { %v1001_v18 = vadd.f32 %v1000_v26, %v999_v31  ;;  %v1026_v55 = vrot.slane %v1025_v19, 2 }
  0x98   : > { %v1052_v62 = vrot.slane %v1051_v54, 2 }
  0x99   : > { %v1002_v10 = vrot.slane %v1001_v18, 1  ;;  %v1027_v45 = vadd.f32 %v1026_v55, %v1025_v19 }
  0x9a   : > { %v1438_v3 = vpop.eup %1437  ;;  %v1053_v46 = vadd.f32 %v1052_v62, %v1051_v54 }
  0x9b   : > { %v1440_v36 = vpop.eup %1439  ;;  %v1071_v30 = vrot.slane %v1438_v3, %v1567_v43  ;;  %v1003_v15 = vadd.f32 %v1002_v10, %v1001_v18  ;;  %v1028_v51 = vrot.slane %v1027_v45, 1 }
  0x9c   : > { %v1097_v29 = vrot.slane %v1440_v36, %v1567_v43  ;;  %v1054_v57 = vrot.slane %v1053_v46, 1 }
  0x9d   : > { %v1442_v53 = vpop.eup %1441  ;;  %v1073_v56 = vmul.f32 %v1071_v30, %v1059_v2  ;;  %v1004_v48 = vadd.f32 %v1003_v15, %v978_v21  ;;  %v1029_v39 = vadd.f32 %v1028_v51, %v1027_v45 }
  0x9e   : > { %v1099_v52 = vmul.f32 %v1097_v29, %v1085_v27  ;;  %v1123_v24 = vrot.slane %v1442_v53, %v1567_v43  ;;  %v1055_v43 = vadd.f32 %v1054_v57, %v1053_v46 }
  0x9f   : > { %v1074_v25 = vmul.f32 %v1073_v56, %v1073_v56  ;;  %v1030_v6 = vadd.f32 %v1029_v39, %v1004_v48 }
  0xa0   : > { %v1100_v35 = vmul.f32 %v1099_v52, %v1099_v52  ;;  %v1125_v47 = vmul.f32 %v1123_v24, %v1111_v20 }
  0xa1   : > { %v1075_v16 = vsel %vm320_vm0, %v1074_v25, 0.0  ;;  %v1056_v31 = vadd.f32 %v1055_v43, %v1030_v6 }
  0xa2   : > { %v1076_v5 = vrot.slane %v1075_v16, 4  ;;  %v1101_v37 = vsel %vm320_vm0, %v1100_v35, 0.0  ;;  %v1126_v1 = vmul.f32 %v1125_v47, %v1125_v47 }
  0xa3   : > { %v1102_v22 = vrot.slane %v1101_v37, 4 }
  0xa4   : > { %v1077_v44 = vadd.f32 %v1076_v5, %v1075_v16  ;;  %v1127_v4 = vsel %vm320_vm0, %v1126_v1, 0.0 }
  0xa5   : > { %v1103_v9 = vadd.f32 %v1102_v22, %v1101_v37  ;;  %v1128_v11 = vrot.slane %v1127_v4, 4 }
  0xa6   : > { %v1078_v49 = vrot.slane %v1077_v44, 2 }
  0xa7   : > { %v1104_v63 = vrot.slane %v1103_v9, 2  ;;  %v1129_v7 = vadd.f32 %v1128_v11, %v1127_v4 }
  0xa8   : > { %v1079_v23 = vadd.f32 %v1078_v49, %v1077_v44 }
  0xa9   : > { %v1105_v41 = vadd.f32 %v1104_v63, %v1103_v9  ;;  %v1130_v28 = vrot.slane %v1129_v7, 2 }
  0xaa   : > { %v1080_v12 = vrot.slane %v1079_v23, 1 }
  0xab   : > { %v1106_v13 = vrot.slane %v1105_v41, 1  ;;  %v1131_v14 = vadd.f32 %v1130_v28, %v1129_v7 }
  0xac   : > { %v1081_v26 = vadd.f32 %v1080_v12, %v1079_v23 }
  0xad   : > { %v1107_v34 = vadd.f32 %v1106_v13, %v1105_v41  ;;  %v1132_v38 = vrot.slane %v1131_v14, 1 }
  0xae   : > { %v1082_v61 = vadd.f32 %v1081_v26, %v1056_v31 }
  0xaf   : > { %v1133_v42 = vadd.f32 %v1132_v38, %v1131_v14 }
  0xb0   : > { %v1108_v58 = vadd.f32 %v1107_v34, %v1082_v61 }
  0xb2   : > { %v1134_v18 = vadd.f32 %v1133_v42, %v1108_v58 }
  0xb4   : > { %v1136_v19 = vadd.f32 %v1135_v59, %v1134_v18 }
  0xb6   : > { %1137 = vst [vmem:[#allocation2] sm:$0x1] %v1136_v19 }
  0xbd   : > { %v1141_v0 = vld [vmem:[#allocation2] sm:$0x1] }
  0xbe   : > { %1142 = vst [vmem:[%s295_s29] sm:$0x1] %v1141_v0 }
  0xbf PF: > { %s13_s14 = sadd.s32 1, %s1465_s14   ;;  %s1958_s12 = smov %s1461_s13 }
  0xc0   : > { %p10_p5 = scmp.ge.s32.totalorder %s13_s14, 4   ;;  %s1959_s13 = smov %s1961_s15 }
  0xc2   :  { %12 = sbr.rel (!%p10_p5) target bundleno = 2 (0x2), region = 76 }

</bundles_post_ra>
